<compile_context>
chip_gen: v5e
topology: v5e:2x2
jax: 0.10.0
libtpu: 0.0.40
codegen_flags: <defaults>
</compile_context>

<pallas_src>
import jax
import jax.numpy as jnp
from jax import lax
from jax.experimental import pallas as pl
from jax.experimental.pallas import tpu as pltpu


_LANES = 128             # vreg lane width; last dim of every dense block
_MAX_BLOCK_ROWS = 4096   # cap on sublane rows per block (4096*128 elems = 2 MiB/buffer)


def _cdiv(a, b):
    return -(-a // b)


def _round_up(a, b):
    return _cdiv(a, b) * b


def _vmem_bytes():
    """Per-TensorCore VMEM capacity; conservative default if the query is unavailable."""
    try:
        return int(pltpu.get_tpu_info().vmem_capacity_bytes)
    except Exception:
        return 64 * 1024 * 1024  # v7x per-TC VMEM: the smallest of the supported gens


# ----------------------------------------------------------------------------------
# Main path: fused softmax + lane gather on dense (block_rows, 128) tiles.
# ----------------------------------------------------------------------------------
def _gather_kernel(logits_ref, idx_ref, out_ref):
    # logits_ref: (1, V) f32, constant index_map (fetched once, resident across the grid)
    # idx_ref:    (R, 128) i32 dense tile
    # out_ref:    (R, 128) f32 dense tile
    V = logits_ref.shape[1]

    # 128-wide softmax, recomputed per step: EUP exp + XLU reduce ride idle slots.
    z = logits_ref[...]
    z = z - jnp.max(z, axis=-1, keepdims=True)
    e = jnp.exp(z)
    p = e / jnp.sum(e, axis=-1, keepdims=True)                 # (1, V), exact f32 path

    idx = idx_ref[...]
    idx = jnp.where(idx < 0, idx + V, idx)                     # PyTorch-style negative wrap
    probs_b = jnp.broadcast_to(p, (idx.shape[0], V))           # sublane broadcast of one row
    # Lane gather (tpu dynamic-gather): out[r, c] = probs_b[r, idx[r, c]].
    out_ref[...] = jnp.take_along_axis(probs_b, idx, axis=-1, mode="clip")


def _forward_gather(logits, flat, block_rows_cap=None):
    V = logits.shape[1]
    M = flat.shape[0]
    rows = _cdiv(M, _LANES)

    vmem = _vmem_bytes()
    # Live VMEM per block row ~ double-buffered idx(i32)+out(f32) blocks plus ~2
    # block-sized f32 temporaries inside the kernel (broadcast probs / gather result).
    per_row_bytes = _LANES * 4 * 6
    cap = max(8, min(((vmem // 4) // per_row_bytes) // 8 * 8, _MAX_BLOCK_ROWS))
    if block_rows_cap is not None:
        cap = max(8, min(cap, _round_up(block_rows_cap, 8)))
    # Split the rows as evenly as possible -> padding stays below 8 rows per block.
    n_blocks = _cdiv(rows, cap)
    block_rows = _round_up(_cdiv(rows, n_blocks), 8)
    rows_padded = n_blocks * block_rows
    padded = rows_padded * _LANES

    if padded != M:
        flat = jnp.pad(flat, (0, padded - M))   # pad with index 0 (valid); trimmed below
    idx2d = flat.reshape(rows_padded, _LANES)

    out = pl.pallas_call(
        _gather_kernel,
        out_shape=jax.ShapeDtypeStruct((rows_padded, _LANES), jnp.float32),
        grid=(n_blocks,),
        in_specs=[
            pl.BlockSpec((1, V), lambda i: (0, 0)),                # logits: resident
            pl.BlockSpec((block_rows, _LANES), lambda i: (i, 0)),  # dense idx tile
        ],
        out_specs=pl.BlockSpec((block_rows, _LANES), lambda i: (i, 0)),
        compiler_params=pltpu.CompilerParams(
            dimension_semantics=("parallel",),
            vmem_limit_bytes=int(min(vmem, 128 * 1024 * 1024) // 2),
        ),
    )(logits, idx2d)

    out_flat = out.reshape(-1)
    return out_flat if padded == M else out_flat[:M]


# ----------------------------------------------------------------------------------
# Fallback path: one-hot + MXU matmul on (1, T) lane-dense tiles (only used if the
# dynamic-gather lowering is rejected, e.g. for exotic V).
# ----------------------------------------------------------------------------------
def _onehot_kernel(logits_ref, idx_ref, out_ref):
    V = logits_ref.shape[1]
    T = idx_ref.shape[1]
    z = logits_ref[...]
    z = z - jnp.max(z, axis=-1, keepdims=True)
    e = jnp.exp(z)
    p = e / jnp.sum(e, axis=-1, keepdims=True)                  # (1, V)
    idx = idx_ref[...]                                          # (1, T)
    idx = jnp.where(idx < 0, idx + V, idx)                      # negative wrap
    iota_v = lax.broadcasted_iota(jnp.int32, (V, T), 0)
    onehot_t = (iota_v == idx).astype(jnp.float32)              # (V, T); OOB idx -> zero col
    out_ref[...] = jnp.dot(p, onehot_t, precision=lax.Precision.HIGHEST,
                           preferred_element_type=jnp.float32)


def _forward_onehot(logits, flat):
    V = logits.shape[1]
    M = flat.shape[0]
    # Keep the (V, T) f32 one-hot <= ~2 MiB.
    # TODO(synk): for very large V this degenerates to T=128; switch algorithm if needed.
    t = max(128, min(((2 * 1024 * 1024) // (V * 4)) // 128 * 128, 2048))
    t = min(t, max(128, _round_up(M, 128)))
    padded = _round_up(M, t)
    if padded != M:
        flat = jnp.pad(flat, (0, padded - M))
    idx2d = flat.reshape(1, padded)

    out = pl.pallas_call(
        _onehot_kernel,
        out_shape=jax.ShapeDtypeStruct((1, padded), jnp.float32),
        grid=(padded // t,),
        in_specs=[pl.BlockSpec((1, V), lambda i: (0, 0)),
                  pl.BlockSpec((1, t), lambda i: (0, i))],
        out_specs=pl.BlockSpec((1, t), lambda i: (0, i)),
        compiler_params=pltpu.CompilerParams(
            dimension_semantics=("parallel",),
            vmem_limit_bytes=32 * 1024 * 1024),
    )(logits, idx2d)

    out_flat = out[0]
    return out_flat if padded == M else out_flat[:M]


# ----------------------------------------------------------------------------------
# Public wrapper.
# ----------------------------------------------------------------------------------
_IMPL = None   # "gather" | "onehot", chosen once at first call and cached


def smooth_histogram_forward(zeros_param, x, *, block_rows_cap=None):
    """Forward of smooth_histogram: softmax(zeros_param)[x].

    zeros_param: (n_values,) float parameter.  x: integer array of any shape.
    """
    global _IMPL
    V = zeros_param.shape[0]
    logits = zeros_param.reshape(1, V).astype(jnp.float32)
    orig_shape = x.shape
    flat = x.reshape(-1).astype(jnp.int32)
    if flat.shape[0] == 0:
        return jnp.zeros(orig_shape, jnp.float32)

    if _IMPL is None:
        try:
            out = jax.block_until_ready(_forward_gather(logits, flat, block_rows_cap))
            _IMPL = "gather"
        except Exception:
            # Dynamic-gather lowering rejected on this config; use the exact one-hot/MXU
            # fallback instead.
            _IMPL = "onehot"
            out = _forward_onehot(logits, flat)
    elif _IMPL == "gather":
        out = _forward_gather(logits, flat, block_rows_cap)
    else:
        out = _forward_onehot(logits, flat)
    return out.reshape(orig_shape)


if __name__ == "__main__":
    n_values = 128
    key = jax.random.PRNGKey(0)
    k_param, k_idx1, k_idx2 = jax.random.split(key, 3)

    # nn.Parameter(torch.zeros(n_values)), perturbed so the softmax is non-uniform and
    # the gather is actually exercised (all-zeros would make every output exactly 1/V).
    zeros_param = 0.1 * jax.random.normal(k_param, (n_values,), dtype=jnp.float32)
    ref_probs = jax.nn.softmax(zeros_param)

    # 1) aligned case: M = 4096 -> one dense (32, 128) block, no pad / no slice
    x1 = jax.random.randint(k_idx1, (4, 8, 128), 0, n_values, dtype=jnp.int32)
    # 2) ragged case exercising pad-and-trim: M = 150
    x2 = jax.random.randint(k_idx2, (3, 50), 0, n_values, dtype=jnp.int32)
    # 3) mixed-sign indices (PyTorch-style negative wrapping)
    x3 = x1 - (n_values // 2)

    cases = [(x1, None), (x2, None), (x3, None), (x1, 8)]   # last one forces a 4-step grid
    for x, cap in cases:
        y = jax.block_until_ready(
            smooth_histogram_forward(zeros_param, x, block_rows_cap=cap))
        ref = ref_probs[x]
        assert y.shape == x.shape
        assert jnp.allclose(y, ref, atol=1e-6, rtol=1e-6), float(jnp.max(jnp.abs(y - ref)))

    print("KERNEL_OK")
</pallas_src>

<mosaic_0001>
module attributes {stable_mosaic.version = 11 : i64} {
  func.func @_onehot_kernel(%arg0: i32, %arg1: memref<1x128xf32, #tpu.memory_space<vmem>>, %arg2: memref<1x2048xi32, #tpu.memory_space<vmem>>, %arg3: memref<1x2048xf32, #tpu.memory_space<vmem>>) attributes {dimension_semantics = [#tpu.dimension_semantics<parallel>], iteration_bounds = array<i64: 2>, scalar_prefetch = 0 : i64, scratch_operands = 0 : i64, tpu.core_type = #tpu.core_type<tc>, window_params = [{pipeline_mode = #tpu.pipeline_mode<synchronous>, transform_indices = @transform_0, window_bounds = array<i64: 1, 128>}, {transform_indices = @transform_1, window_bounds = array<i64: 1, 2048>}, {transform_indices = @transform_2, window_bounds = array<i64: 1, 2048>}]} {
    %c0 = arith.constant 0 : index
    %c0_0 = arith.constant 0 : index
    %0 = vector.load %arg1[%c0, %c0_0] : memref<1x128xf32, #tpu.memory_space<vmem>>, vector<1x128xf32>
    %cst = arith.constant dense<0xFF800000> : vector<1xf32>
    %1 = vector.multi_reduction <maximumf>, %0, %cst [1] : vector<1x128xf32> to vector<1xf32>
    %2 = vector.shape_cast %1 : vector<1xf32> to vector<1x1xf32>
    %3 = vector.broadcast %2 : vector<1x1xf32> to vector<1x128xf32>
    %4 = arith.subf %0, %3 : vector<1x128xf32>
    %5 = math.exp %4 : vector<1x128xf32>
    %cst_1 = arith.constant dense<0.000000e+00> : vector<1xf32>
    %6 = vector.multi_reduction <add>, %5, %cst_1 [1] : vector<1x128xf32> to vector<1xf32>
    %7 = vector.shape_cast %6 : vector<1xf32> to vector<1x1xf32>
    %8 = vector.broadcast %7 : vector<1x1xf32> to vector<1x128xf32>
    %9 = arith.divf %5, %8 : vector<1x128xf32>
    %c0_2 = arith.constant 0 : index
    %c0_3 = arith.constant 0 : index
    %10 = vector.load %arg2[%c0_2, %c0_3] : memref<1x2048xi32, #tpu.memory_space<vmem>>, vector<1x2048xi32>
    %c0_i32 = arith.constant 0 : i32
    %11 = vector.broadcast %c0_i32 : i32 to vector<1x2048xi32>
    %12 = arith.cmpi slt, %10, %11 : vector<1x2048xi32>
    %c128_i32 = arith.constant 128 : i32
    %13 = vector.broadcast %c128_i32 : i32 to vector<1x2048xi32>
    %14 = arith.addi %10, %13 : vector<1x2048xi32>
    %15 = arith.select %12, %14, %10 : vector<1x2048xi1>, vector<1x2048xi32>
    %16 = tpu.iota {dimensions = array<i32: 0>} : vector<128x2048xi32>
    %17 = vector.broadcast %15 : vector<1x2048xi32> to vector<128x2048xi32>
    %18 = arith.cmpi eq, %16, %17 : vector<128x2048xi32>
    %19 = arith.extui %18 : vector<128x2048xi1> to vector<128x2048xi32>
    %20 = arith.sitofp %19 : vector<128x2048xi32> to vector<128x2048xf32>
    %cst_4 = arith.constant dense<0.000000e+00> : vector<1x2048xf32>
    %21 = tpu.matmul %9, %20, %cst_4 {dimension_numbers = #tpu.dot_dimension_numbers<[1], [0], [0], [1], [0, 0, 1, 1], [], []>, precision = #tpu.contract_precision<fp32>} : vector<1x128xf32>, vector<128x2048xf32>, vector<1x2048xf32> -> vector<1x2048xf32>
    %c0_5 = arith.constant 0 : index
    %c0_6 = arith.constant 0 : index
    %22 = vector.load %arg3[%c0_5, %c0_6] : memref<1x2048xf32, #tpu.memory_space<vmem>>, vector<1x2048xf32>
    tpu.vector_store %arg3[%c0_5, %c0_6], %21 {strides = array<i32>} : memref<1x2048xf32, #tpu.memory_space<vmem>>, vector<1x2048xf32>,
    return
  }
  func.func @transform_0(%arg0: i32) -> (i32, i32) {
    %c0_i32 = arith.constant 0 : i32
    %c0_i32_0 = arith.constant 0 : i32
    %c0_i32_1 = arith.constant 0 : i32
    return %c0_i32, %c0_i32_0 : i32, i32
  }
  func.func @transform_1(%arg0: i32) -> (i32, i32) {
    %c0_i32 = arith.constant 0 : i32
    %c0_i32_0 = arith.constant 0 : i32
    return %c0_i32, %arg0 : i32, i32
  }
  func.func @transform_2(%arg0: i32) -> (i32, i32) {
    %c0_i32 = arith.constant 0 : i32
    %c0_i32_0 = arith.constant 0 : i32
    return %c0_i32, %arg0 : i32, i32
  }
}

</mosaic_0001>

<bundles_post_ra>
// kernel: tpu_custom_call.1
= control target key start
LH: loop header
LB: loop body
LE: loop exit
PB: predicated region body
PF: predicated region fallthrough
CT: control target
= control target key end

     0   :  { %7 = vsyncpa [#allocation3], 0  ;;  %s15262_s0 = inlined_call_operand.hbm [shape: f32[1,128], index: 0, kind: input, shape index: {}]   ;;  %s15263_s1 = inlined_call_operand.hbm [shape: s32[1,4096], index: 1, kind: input, shape index: {}]   ;;  %s15264_s2 = inlined_call_operand.hbm [shape: f32[1,4096], index: 2, kind: output, shape index: {}]  }
   0x1   :  { %8 = vsyncpa [#allocation6], 0 }
   0x2   :  { %10 = vsyncpa [#allocation6 + $0x1], 0 }
   0x3   :  { %11 = vsyncpa [#allocation4], 0 }
   0x4   :  { %13 = vsyncpa [#allocation4 + $0x1], 0  ;;  %s7872_s9 = smov 0   ;;  %s7874_s10 = smov 0  }
   0x5   :  { %s7876_s11 = smov 0   ;;  %s7878_s12 = smov 0  }
   0x6 LB: > { %s7893_s13 = sadd.s32 4294967295, %s7852_s12   ;;  %s6621_s14 = sadd.s32 4294967294, %s7852_s12   ;;  %s7852_s12 = sphi %s7878_s12, %s15942_s12   ;;  %s7848_s11 = sphi %s7876_s11, %s15941_s11   ;;  %s7844_s10 = sphi %s7874_s10, %s15940_s10   ;;  %s7840_s9 = sphi %s7872_s9, %s15939_s9  }
   0x7   : > { %p60_p0 = scmp.ne.s32.totalorder %s7844_s10, %s7840_s9  ;;  %p61_p1 = scmp.eq.s32.totalorder %s7893_s13, 0 }
   0x8   : > { %p84_p2 = scmp.eq.s32.totalorder %s7893_s13, 1  ;;  %p90_p3 = scmp.eq.s32.totalorder %s6621_s14, 1 }
   0x9   : > { %p7902_p4 = por %p61_p1, %p60_p0  ;;  %p6622_p5 = scmp.ge.s32.totalorder %s7852_s12, 1 }
   0xa   : > { %p7907_p6 = por %p90_p3, %p60_p0  ;;  %p97_p7 = scmp.lt.s32.totalorder %s7852_s12, 3 }
   0xb   : > { %s109_s19 = sshll.u32 %s15262_s0, 4  ;;  %s7854_s21 = smov [#allocation2]   ;;  %s110_s19 = int_to_ptr.hbm [resolvable:$true] %s109_s19 }
   0xc   : > { %p7915_p8 = pnand %p6622_p5, %p97_p7  ;;  %s111_s22 = sshll.u32 %s7854_s21, 4  ;;  %s112_s22 = int_to_ptr.vmem [resolvable:$true] %s111_s22 }
   0xd   : > { %s7925_s23 = sadd.s32 1, %s7852_s12   ;;  %s47_s24 = sadd.s32 1, %s7848_s11 }
   0xe   : > { %p7667_p10 = pneg %p7915_p8  ;;  %s44_s25 = ssub.s32 %s7852_s12, %s7925_s23 }
   0xf   : > { %p45_p12 = scmp.eq.s32.totalorder %s44_s25, 0  ;;  %p54_p13 = scmp.ne.s32.totalorder %s7848_s11, %s7844_s10 }
  0x10   : > { %p7668_p11 = pnand %p7667_p10, %p61_p1  ;;  %p55_p0 = scmp.eq.s32.totalorder %s7852_s12, 0 }
  0x11   : > { %s7934_s26 = scalar_select %p45_p12, %s7848_s11, %s47_s24  }
  0x12   : > { %7670 = dma.hbm_to_vmem [thread:$0]  (!%p7668_p11), %s110_s19, 16, %s112_s22, [#allocation3]  }
  0x13   : > { %p7938_p3 = por %p84_p2, %p54_p13  ;;  %p7680_p5 = scmp.lt.s32.totalorder %s7852_s12, 2 }
  0x14   : > { %s122_s28 = sand.u32 1, %s7848_s11   ;;  %s6626_s29 = sshll.u32 %s7852_s12, 4 }
  0x15   : > { %p56_p7 = por %p55_p0, %p54_p13  ;;  %s6625_s30 = sshll.u32 %s122_s28, 4 }
  0x16   : > { %s130_s5 = scalar_lea.hbm %s15263_s1, %s6626_s29  ;;  %s126_s7 = scalar_lea.vmem [#allocation5], %s6625_s30 }
  0x17   : > { %s132_s6 = sshll.u32 %s130_s5, 4  ;;  %s134_s8 = sshll.u32 %s126_s7, 4  ;;  %s133_s6 = int_to_ptr.hbm [resolvable:$true] %s132_s6  ;;  %s135_s8 = int_to_ptr.vmem [resolvable:$true] %s134_s8 }
  0x18   : > { %p7948_p10 = pnand %p7680_p5, %p56_p7  ;;  %s123_s17 = scalar_lea.sflag [#allocation6], %s122_s28 }
  0x19   : > { %s7752_s18 = sshra.s32 %s133_s6, 4  ;;  %s7759_s24 = scalar_lea.hbm %s15263_s1, 32  ;;  %s7753_s18 = int_to_ptr.hbm [resolvable:$true] %s7752_s18 }
  0x1a   : > { %s7754_s19 = scalar_lea.hbm %s7753_s18, 16  ;;  %p7756_p11 = pneg %p7948_p10 }
  0x1b   : > { %p7755_p2 = scmp.ne.s32.totalorder %s7753_s18, %s7754_s19  ;;  %p7760_p0 = scmp.lt.s32.totalorder %s7753_s18, %s15263_s1 }
  0x1c   : > { %p7761_p5 = scmp.lt.s32.totalorder %s7759_s24, %s7754_s19 }
  0x1d   : > { %p7757_p12 = pnand %p7756_p11, %p7755_p2 }
  0x1e   : > { %p7762_p7 = por %p7761_p5, %p7760_p0 }
  0x1f   : > { %p7758_p13 = pneg %p7757_p12 }
  0x21   : > { %p7763_p9 = pnand %p7762_p7, %p7758_p13 }
  0x23   : > { %7766 = shalt.err (!%p7763_p9)
}
  0x24   : > { %7674 = dma.hbm_to_vmem [thread:$0]  (!%p7948_p10), %s133_s6, 256, %s135_s8, %s123_s17  }
  0x25   : > { %143 = sbr.rel (%p7915_p8) target bundleno = 1216 (0x4c0), region = 28 }
  0x2a   : > { %7827 = dma.done.wait (%p61_p1), [#allocation3], 16  }
  0x2b   : > { %7829 = vsyncadd (%p61_p1), [#allocation3], 4294967280  ;;  %s7969_s28 = sand.u32 1, %s7844_s10  }
  0x2c   : > { %s6629_s30 = sshll.u32 %s7969_s28, 4  ;;  %s151_s3 = scalar_lea.sflag [#allocation6], %s7969_s28 }
  0x2d   : > { %s7975_s4 = scalar_lea.vmem [#allocation5], %s6629_s30 }
  0x2e   : > { %7831 = dma.done.wait (%p7902_p4), %s151_s3, 256  }
  0x2f   : > { %7833 = vsyncadd (%p7902_p4), %s151_s3, 4294967040  ;;  %vm15268_vm0 = vcmask 1040384   ;;  %v7981_v0 = vld [vmem:[#allocation2] sm:$0x1]  ;;  %v204_v2 = vld [vmem:[%s7975_s4] sm:$0xff]  ;;  %v212_v5 = vlaneseq  ;;  %v15271_v16 = vmov 0.0  }
  0x30   : > { %v180_v1 = vsel %vm15268_vm0, %v7981_v0, -inf  ;;  %v208_v3 = vadd.s32 128, %v204_v2  ;;  %vm206_vm1 = vcmp.lt.s32.totalorder %v204_v2, 0  ;;  %v15355_v20 = vmov 1.0   ;;  %s13091_s15 = scalar_lea.vmem [#allocation7], %s6629_s30  ;;  %s7656_s20 = sshll.u32 %s7893_s13, 4 }
  0x31   : > { %181 = vmax.xlane.f32.xlu0 %v180_v1  ;;  %v7991_v7 = vshrl.u32 %v212_v5, 7  ;;  %s6534_s7 = scalar_lea.hbm %s15264_s2, %s7656_s20  ;;  %s6536_s13 = sshll.u32 %s13091_s15, 4  ;;  %s6537_s13 = int_to_ptr.vmem [resolvable:$true] %s6536_s13 }
  0x32   : > { %v7986_v4 = vsel %vm206_vm1, %v208_v3, %v204_v2  ;;  %s6538_s8 = sshll.u32 %s6534_s7, 4  ;;  %s6524_s14 = scalar_lea.sflag [#allocation4], %s7969_s28  ;;  %s6539_s8 = int_to_ptr.hbm [resolvable:$true] %s6538_s8 }
  0x33   : > { %v7989_v6 = vperm.slane %v7986_v4, 0  ;;  %v7994_v8 = vadd.s32 120, %v7991_v7  ;;  %v7997_v9 = vadd.s32 112, %v7991_v7  ;;  %v8000_v10 = vadd.s32 104, %v7991_v7  ;;  %s7796_s17 = sshra.s32 %s6539_s8, 4  ;;  %s7802_s22 = scalar_lea.hbm %s15264_s2, 32  ;;  %s7797_s17 = int_to_ptr.hbm [resolvable:$true] %s7796_s17 }
  0x34   : > { %v8003_v11 = vadd.s32 96, %v7991_v7  ;;  %v8006_v12 = vadd.s32 88, %v7991_v7  ;;  %v8009_v13 = vadd.s32 80, %v7991_v7  ;;  %v8012_v14 = vadd.s32 72, %v7991_v7  ;;  %s7798_s18 = scalar_lea.hbm %s7797_s17, 16  ;;  %p7803_p9 = scmp.lt.s32.totalorder %s7797_s17, %s15264_s2 }
  0x35   : > { %v8015_v15 = vadd.s32 64, %v7991_v7  ;;  %vm485_vm2 = vcmp.eq.s32.totalorder %v7994_v8, %v7989_v6  ;;  %vm469_vm3 = vcmp.eq.s32.totalorder %v7997_v9, %v7989_v6  ;;  %vm453_vm4 = vcmp.eq.s32.totalorder %v8000_v10, %v7989_v6  ;;  %p7799_p1 = scmp.ne.s32.totalorder %s7797_s17, %s7798_s18  ;;  %p7804_p10 = scmp.lt.s32.totalorder %s7802_s22, %s7798_s18 }
  0x36   : > { %vm437_vm5 = vcmp.eq.s32.totalorder %v8003_v11, %v7989_v6  ;;  %v6871_v17 = vsel %vm485_vm2, 1.0, %v15271_v16  ;;  %v6855_v18 = vsel %vm469_vm3, 1.0, %v15271_v16  ;;  %v6839_v19 = vsel %vm453_vm4, 1.0, %v15271_v16  ;;  %6903 = vmatpush.msk.msra.mxu3 %vm485_vm2, %v15355_v20  ;;  %6887 = vmatpush.msk.msra.mxu0 %vm485_vm2, %v15355_v20 }
  0x37   : > { %v6823_v21 = vsel %vm437_vm5, 1.0, %v15271_v16  ;;  %v8049_v22 = vsub.f32 %v6871_v17, %v6871_v17  ;;  %v8051_v23 = vsub.f32 %v6855_v18, %v6855_v18  ;;  %v8053_v24 = vsub.f32 %v6839_v19, %v6839_v19  ;;  %p7800_p4 = pnand %p7799_p1, %p7938_p3  ;;  %p7805_p2 = por %p7804_p10, %p7803_p9 }
  0x38   : > { %v8055_v25 = vsub.f32 %v6823_v21, %v6823_v21  ;;  %6904 = vmatpush.msk.msra.mxu3 %vm469_vm3, %v15355_v20  ;;  %vm421_vm6 = vcmp.eq.s32.totalorder %v8006_v12, %v7989_v6  ;;  %6888 = vmatpush.msk.msra.mxu0 %vm469_vm3, %v15355_v20  ;;  %vm405_vm7 = vcmp.eq.s32.totalorder %v8009_v13, %v7989_v6  ;;  %v8072_v26 = vadd.s32 56, %v7991_v7 }
  0x39   : > { %vm389_vm8 = vcmp.eq.s32.totalorder %v8012_v14, %v7989_v6  ;;  %v1056_v27 = vand.u32 4294901760, %v8049_v22  ;;  %v1062_v28 = vand.u32 4294901760, %v8051_v23  ;;  %1157 = vmatpush.msra.mxu2 %v8049_v22  ;;  %v1068_v29 = vand.u32 4294901760, %v8053_v24  ;;  %p7801_p8 = pneg %p7800_p4 }
  0x3a   : > { %v1074_v30 = vand.u32 4294901760, %v8055_v25  ;;  %v6807_v31 = vsel %vm421_vm6, 1.0, %v15271_v16  ;;  %6905 = vmatpush.msk.msra.mxu3 %vm453_vm4, %v15355_v20  ;;  %v6791_v32 = vsel %vm405_vm7, 1.0, %v15271_v16  ;;  %6889 = vmatpush.msk.msra.mxu0 %vm453_vm4, %v15355_v20  ;;  %v6775_v33 = vsel %vm389_vm8, 1.0, %v15271_v16 }
  0x3b   : > { %vm373_vm9 = vcmp.eq.s32.totalorder %v8015_v15, %v7989_v6  ;;  %v1057_v34 = vsub.f32 %v8049_v22, %v1056_v27  ;;  %v1063_v35 = vsub.f32 %v8051_v23, %v1062_v28  ;;  %v1069_v36 = vsub.f32 %v8053_v24, %v1068_v29  ;;  %1160 = vmatpush.msra.mxu2 %v8051_v23  ;;  %p7806_p11 = pnand %p7805_p2, %p7801_p8 }
  0x3c   : > { %v1075_v37 = vsub.f32 %v8055_v25, %v1074_v30  ;;  %v8114_v38 = vsub.f32 %v6807_v31, %v6807_v31  ;;  %v8116_v39 = vsub.f32 %v6791_v32, %v6791_v32  ;;  %6906 = vmatpush.msk.msra.mxu3 %vm437_vm5, %v15355_v20  ;;  %v8122_v40 = vsub.f32 %v6775_v33, %v6775_v33 }
  0x3d   : > { %6890 = vmatpush.msk.msra.mxu0 %vm437_vm5, %v15355_v20  ;;  %v6759_v41 = vsel %vm373_vm9, 1.0, %v15271_v16  ;;  %v1058_v42 = vand.u32 4294901760, %v1057_v34  ;;  %v1064_v43 = vand.u32 4294901760, %v1063_v35  ;;  %v1070_v44 = vand.u32 4294901760, %v1069_v36  ;;  %1163 = vmatpush.msra.mxu2 %v8053_v24 }
  0x3e   : > { %v1076_v45 = vand.u32 4294901760, %v1075_v37  ;;  %v1080_v46 = vand.u32 4294901760, %v8114_v38  ;;  %v1086_v47 = vand.u32 4294901760, %v8116_v39  ;;  %v1092_v48 = vand.u32 4294901760, %v8122_v40  ;;  %6907 = vmatpush.msk.msra.mxu3 %vm421_vm6, %v15355_v20 }
  0x3f   : > { %v8140_v49 = vsub.f32 %v6759_v41, %v6759_v41  ;;  %6891 = vmatpush.msk.msra.mxu0 %vm421_vm6, %v15355_v20  ;;  %1059 = vmatpush.msra.mxu1 %v1058_v42  ;;  %vm357_vm10 = vcmp.eq.s32.totalorder %v8072_v26, %v7989_v6  ;;  %v8150_v50 = vadd.s32 48, %v7991_v7  ;;  %v8153_v51 = vadd.s32 40, %v7991_v7 }
  0x40   : > { %1166 = vmatpush.msra.mxu2 %v8055_v25  ;;  %v8156_v52 = vadd.s32 32, %v7991_v7  ;;  %v1081_v53 = vsub.f32 %v8114_v38, %v1080_v46  ;;  %v1087_v54 = vsub.f32 %v8116_v39, %v1086_v47  ;;  %v8167_v55 = vsub.f32 %v8122_v40, %v1092_v48  ;;  %6908 = vmatpush.msk.msra.mxu3 %vm405_vm7, %v15355_v20 }
  0x41   : > { %v1098_v56 = vand.u32 4294901760, %v8140_v49  ;;  %6892 = vmatpush.msk.msra.mxu0 %vm405_vm7, %v15355_v20  ;;  %1065 = vmatpush.msra.mxu1 %v1064_v43  ;;  %v6743_v57 = vsel %vm357_vm10, 1.0, %v15271_v16  ;;  %vm15266_vm11 = vcmp.eq.s32.totalorder %v8150_v50, %v7989_v6  ;;  %vm15265_vm12 = vcmp.eq.s32.totalorder %v8153_v51, %v7989_v6 }
  0x42   : > { %1169 = vmatpush.msra.mxu2 %v8114_v38  ;;  %vm15267_vm13 = vcmp.eq.s32.totalorder %v8156_v52, %v7989_v6  ;;  %v1082_v59 = vand.u32 4294901760, %v1081_v53  ;;  %v1088_v60 = vand.u32 4294901760, %v1087_v54  ;;  %v1094_v61 = vand.u32 4294901760, %v8167_v55  ;;  %6909 = vmatpush.msk.msra.mxu3 %vm389_vm8, %v15355_v20 }
  0x43   : > { %6893 = vmatpush.msk.msra.mxu0 %vm389_vm8, %v15355_v20  ;;  %1071 = vmatpush.msra.mxu1 %v1070_v44  ;;  %v8200_v63 = vsub.f32 %v6743_v57, %v6743_v57  ;;  %v6727_v1 = vsel %vm15266_vm11, 1.0, %v15271_v16  ;;  %v6711_v2 = vsel %vm15265_vm12, 1.0, %v15271_v16  ;;  %v1099_v3 = vsub.f32 %v8140_v49, %v1098_v56 }
  0x44   : > { %1172 = vmatpush.msra.mxu2 %v8116_v39  ;;  %6910 = vmatpush.msk.msra.mxu3 %vm373_vm9, %v15355_v20  ;;  %v8219_v5 = vsub.f32 %v6711_v2, %v6711_v2  ;;  %v6695_v17 = vsel %vm15267_vm13, 1.0, %v15271_v16  ;;  %v8234_v31 = vadd.s32 24, %v7991_v7  ;;  %v8247_v34 = vadd.s32 16, %v7991_v7 }
  0x45   : > { %6894 = vmatpush.msk.msra.mxu0 %vm373_vm9, %v15355_v20  ;;  %1077 = vmatpush.msra.mxu1 %v1076_v45  ;;  %v1104_v19 = vand.u32 4294901760, %v8200_v63  ;;  %v8231_v21 = vsub.f32 %v6695_v17, %v6695_v17  ;;  %v8250_v35 = vadd.s32 8, %v7991_v7  ;;  %v8260_v41 = vperm.slane %v7986_v4, 1 }
  0x46   : > { %1175 = vmatpush.msra.mxu2 %v8122_v40  ;;  %v1116_v33 = vand.u32 4294901760, %v8219_v5  ;;  %6911 = vmatpush.msk.msra.mxu3 %vm357_vm10, %v15355_v20  ;;  %vm293_vm14 = vcmp.eq.s32.totalorder %v8234_v31, %v7989_v6  ;;  %vm277_vm15 = vcmp.eq.s32.totalorder %v8247_v34, %v7989_v6  ;;  %v1100_v44 = vand.u32 4294901760, %v1099_v3 }
  0x47   : > { %6895 = vmatpush.msk.msra.mxu0 %vm357_vm10, %v15355_v20  ;;  %1083 = vmatpush.msra.mxu1 %v1082_v59  ;;  %v1105_v36 = vsub.f32 %v8200_v63, %v1104_v19  ;;  %v1122_v37 = vand.u32 4294901760, %v8231_v21  ;;  %v6679_v43 = vsel %vm293_vm14, 1.0, %v15271_v16  ;;  %v6663_v53 = vsel %vm277_vm15, 1.0, %v15271_v16 }
  0x48   : > { %1178 = vmatpush.msra.mxu2 %v8140_v49  ;;  %6912 = vmatpush.msk.msra.mxu3 %vm15266_vm11, %v15355_v20  ;;  %v8280_v45 = vsub.f32 %v6679_v43, %v6679_v43  ;;  %v1117_v55 = vsub.f32 %v8219_v5, %v1116_v33  ;;  %v8293_v57 = vsub.f32 %v6663_v53, %v6663_v53  ;;  %v15580_v25 = vmov 0.0  }
  0x49   : > { %6896 = vmatpush.msk.msra.mxu0 %vm15266_vm11, %v15355_v20  ;;  %1089 = vmatpush.msra.mxu1 %v1088_v60  ;;  %v1106_v54 = vand.u32 4294901760, %v1105_v36  ;;  %vm261_vm1 = vcmp.eq.s32.totalorder %v8250_v35, %v7989_v6  ;;  %vm15277_vm11 = vcmp.eq.s32.totalorder %v7994_v8, %v8260_v41 }
  0x4a   : > { %1181 = vmatpush.msra.mxu2 %v8200_v63  ;;  %6913 = vmatpush.msk.msra.mxu3 %vm15265_vm12, %v15355_v20  ;;  %v15269_v59 = vand.u32 4294901760, %v8280_v45  ;;  %v6647_v60 = vsel %vm261_vm1, 1.0, %v15271_v16  ;;  %v15270_v3 = vand.u32 4294901760, %v8293_v57  ;;  %v15576_v22 = vand.u32 4294901760, %v8293_v57 }
  0x4b   : > { %6897 = vmatpush.msk.msra.mxu0 %vm15265_vm12, %v15355_v20  ;;  %1095 = vmatpush.msra.mxu1 %v1094_v61  ;;  %vm245_vm12 = vcmp.eq.s32.totalorder %v7991_v7, %v7989_v6  ;;  %v8316_v61 = vsub.f32 %v6647_v60, %v6647_v60 }
  0x4c   : > { %6914 = vmatpush.msk.msra.mxu3 %vm15267_vm13, %v15355_v20 }
  0x4d   : > { %6898 = vmatpush.msk.msra.mxu0 %vm15267_vm13, %v15355_v20  ;;  %1101 = vmatpush.msra.mxu1 %v1100_v44  ;;  %vm470_vm13 = vcmp.eq.s32.totalorder %v7997_v9, %v8260_v41  ;;  %v1129_v44 = vsub.f32 %v8280_v45, %v15269_v59  ;;  %v15274_v53 = vand.u32 4294901760, %v8316_v61  ;;  %v15578_v23 = vand.u32 4294901760, %v8316_v61 }
  0x4e   : > { %6915 = vmatpush.msk.msra.mxu3 %vm293_vm14, %v15355_v20 }
  0x4f   : > { %6899 = vmatpush.msk.msra.mxu0 %vm293_vm14, %v15355_v20  ;;  %1107 = vmatpush.msra.mxu1 %v1106_v54 }
  0x50   : > { %6916 = vmatpush.msk.msra.mxu3 %vm277_vm15, %v15355_v20 }
  0x51   : > { %6900 = vmatpush.msk.msra.mxu0 %vm277_vm15, %v15355_v20 }
  0x52   : > { %6917 = vmatpush.msk.msra.mxu3 %vm261_vm1, %v15355_v20 }
  0x53   : > { %6901 = vmatpush.msk.msra.mxu0 %vm261_vm1, %v15355_v20 }
  0x54   : > { %6918 = vmatpush.msk.msra.mxu3 %vm245_vm12, %v15355_v20 }
  0x55   : > { %6902 = vmatpush.msk.msra.mxu0 %vm245_vm12, %v15355_v20 }
  0x57   : > { %1251 = vmatpush.msrb.mxu0 %v1056_v27 }
  0x59   : > { %1255 = vmatpush.msrb.mxu0 %v1062_v28 }
  0x5b   : > { %1259 = vmatpush.msrb.mxu0 %v1068_v29 }
  0x5d   : > { %1263 = vmatpush.msrb.mxu0 %v1074_v30 }
  0x5f   : > { %1267 = vmatpush.msrb.mxu0 %v1080_v46 }
  0x61   : > { %1271 = vmatpush.msrb.mxu0 %v1086_v47 }
  0x63   : > { %1275 = vmatpush.msrb.mxu0 %v1092_v48 }
  0x65   : > { %1279 = vmatpush.msrb.mxu0 %v1098_v56 }
  0x67   : > { %1283 = vmatpush.msrb.mxu0 %v1104_v19 }
  0xa4   : > { %v182_v58 = vpop.xlane.xlu0 %181 }
  0xa5   : > { %v183_v62 = vsub.f32 %v7981_v0, %v182_v58  ;;  %v8213_v0 = vsub.f32 %v6727_v1, %v6727_v1  ;;  %v1123_v58 = vsub.f32 %v8231_v21, %v1122_v37  ;;  %v6631_v1 = vsel %vm245_vm12, 1.0, %v15271_v16 }
  0xa6   : > { %v8332_v17 = vsub.f32 %v6631_v1, %v6631_v1 }
  0xa7   : > { %v184_v18 = vmul.f32 1.442695, %v183_v62  ;;  %v1110_v32 = vand.u32 4294901760, %v8213_v0  ;;  %1184 = vmatpush.msra.mxu2 %v8213_v0  ;;  %v1124_v1 = vand.u32 4294901760, %v1123_v58 }
  0xa8   : > { %v15579_v24 = vand.u32 4294901760, %v8332_v17 }
  0xa9   : > { %7718 = vpow2.f32 %v184_v18  ;;  %v1111_v42 = vsub.f32 %v8213_v0, %v1110_v32  ;;  %1187 = vmatpush.msra.mxu2 %v8219_v5  ;;  %v6872_v18 = vsel %vm15277_vm11, 1.0, %v15271_v16  ;;  %1287 = vmatpush.msrb.mxu0 %v1110_v32 }
  0xaa   : > { %v8350_v43 = vsub.f32 %v6872_v18, %v6872_v18  ;;  %v1135_v18 = vsub.f32 %v8293_v57, %v15270_v3  ;;  %v1130_v3 = vand.u32 4294901760, %v1129_v44 }
  0xab   : > { %v1112_v62 = vand.u32 4294901760, %v1111_v42  ;;  %v1118_v42 = vand.u32 4294901760, %v1117_v55  ;;  %v6856_v55 = vsel %vm470_vm13, 1.0, %v15271_v16  ;;  %1190 = vmatpush.msra.mxu2 %v8231_v21  ;;  %1291 = vmatpush.msrb.mxu0 %v1116_v33 }
  0xac   : > { %v15273_v54 = vand.u32 4294901760, %v8350_v43  ;;  %v8368_v60 = vsub.f32 %v6856_v55, %v6856_v55 }
  0xad   : > { %1113 = vmatpush.msra.mxu1 %v1112_v62  ;;  %1193 = vmatpush.msra.mxu2 %v8280_v45 }
  0xae   : > { %v1398_v58 = vsub.f32 %v8350_v43, %v15273_v54  ;;  %v15275_v62 = vand.u32 4294901760, %v8368_v60  ;;  %v1136_v54 = vand.u32 4294901760, %v1135_v18  ;;  %1295 = vmatpush.msrb.mxu0 %v1122_v37 }
  0xaf   : > { %v8328_v2 = vpop.eup %7718  ;;  %1119 = vmatpush.msra.mxu1 %v1118_v42  ;;  %1196 = vmatpush.msra.mxu2 %v8293_v57 }
  0xb0   : > { %v186_v36 = vsel %vm15268_vm0, %v8328_v2, 0.0  ;;  %vm454_vm0 = vcmp.eq.s32.totalorder %v8000_v10, %v8260_v41  ;;  %v1404_v42 = vsub.f32 %v8368_v60, %v15275_v62 }
  0xb1   : > { %187 = vadd.xlane.f32.xlu0 %v186_v36  ;;  %v15276_v36 = vand.u32 4294901760, %v8332_v17  ;;  %v6840_v59 = vsel %vm454_vm0, 1.0, %v15271_v16  ;;  %v1141_v16 = vsub.f32 %v8316_v61, %v15274_v53  ;;  %1125 = vmatpush.msra.mxu1 %v1124_v1 }
  0xb2   : > { %v8391_v55 = vsub.f32 %v6840_v59, %v6840_v59  ;;  %v1399_v59 = vand.u32 4294901760, %v1398_v58  ;;  %1199 = vmatpush.msra.mxu2 %v8316_v61  ;;  %v1405_v58 = vand.u32 4294901760, %v1404_v42 }
  0xb3   : > { %v1147_v53 = vsub.f32 %v8332_v17, %v15276_v36  ;;  %1131 = vmatpush.msra.mxu1 %v1130_v3  ;;  %v1142_v1 = vand.u32 4294901760, %v1141_v16  ;;  %v15574_v16 = vand.u32 4294901760, %v8280_v45 }
  0xb4   : > { %v1409_v44 = vand.u32 4294901760, %v8391_v55  ;;  %1400 = vmatpush.msrb.mxu3 %v1399_v59  ;;  %1202 = vmatpush.msra.mxu2 %v8332_v17 }
  0xb5   : > { %1137 = vmatpush.msra.mxu1 %v1136_v54  ;;  %v1148_v36 = vand.u32 4294901760, %v1147_v53  ;;  %1299 = vmatpush.msrb.mxu0 %v15574_v16 }
  0xb6   : > { %v1410_v62 = vsub.f32 %v8391_v55, %v1409_v44  ;;  %1406 = vmatpush.msrb.mxu3 %v1405_v58  ;;  %6935 = vmatpush.msk.msrb.mxu2 %vm15277_vm11, %v15355_v20  ;;  %vm438_vm11 = vcmp.eq.s32.totalorder %v8003_v11, %v8260_v41 }
  0xb7   : > { %1143 = vmatpush.msra.mxu1 %v1142_v1  ;;  %1303 = vmatpush.msrb.mxu0 %v15576_v22  ;;  %v6824_v27 = vsel %vm438_vm11, 1.0, %v15580_v25 }
  0xb8   : > { %v1411_v18 = vand.u32 4294901760, %v1410_v62  ;;  %6936 = vmatpush.msk.msrb.mxu2 %vm470_vm13, %v15355_v20  ;;  %v8541_v28 = vsub.f32 %v6824_v27, %v6824_v27 }
  0xb9   : > { %1149 = vmatpush.msra.mxu1 %v1148_v36  ;;  %1307 = vmatpush.msrb.mxu0 %v15578_v23 }
  0xba   : > { %1412 = vmatpush.msrb.mxu3 %v1411_v18  ;;  %6937 = vmatpush.msk.msrb.mxu2 %vm454_vm0, %v15355_v20  ;;  %v1415_v29 = vand.u32 4294901760, %v8541_v28 }
  0xbb   : > { %6919 = vmatpush.msk.msrb.mxu1 %vm485_vm2, %v15355_v20  ;;  %vm15573_vm2 = vcmp.eq.s32.totalorder %v8150_v50, %v7989_v6  ;;  %1311 = vmatpush.msrb.mxu0 %v15579_v24 }
  0xbc   : > { %6938 = vmatpush.msk.msrb.mxu2 %vm438_vm11, %v15355_v20  ;;  %v1416_v39 = vsub.f32 %v8541_v28, %v1415_v29 }
  0xbd   : > { %6920 = vmatpush.msk.msrb.mxu1 %vm469_vm3, %v15355_v20  ;;  %vm15575_vm3 = vcmp.eq.s32.totalorder %v8153_v51, %v7989_v6 }
  0xbe   : > { %v1417_v48 = vand.u32 4294901760, %v1416_v39 }
  0xbf   : > { %6921 = vmatpush.msk.msrb.mxu1 %vm453_vm4, %v15355_v20  ;;  %vm15577_vm4 = vcmp.eq.s32.totalorder %v8156_v52, %v7989_v6 }
  0xc0   : > { %1418 = vmatpush.msrb.mxu3 %v1417_v48 }
  0xc1   : > { %6922 = vmatpush.msk.msrb.mxu1 %vm437_vm5, %v15355_v20  ;;  %vm422_vm5 = vcmp.eq.s32.totalorder %v8006_v12, %v8260_v41 }
  0xc2   : > { %6939 = vmatpush.msk.msrb.mxu2 %vm422_vm5, %v15355_v20  ;;  %v6808_v6 = vsel %vm422_vm5, 1.0, %v15580_v25 }
  0xc3   : > { %6923 = vmatpush.msk.msrb.mxu1 %vm421_vm6, %v15355_v20  ;;  %vm406_vm6 = vcmp.eq.s32.totalorder %v8009_v13, %v8260_v41  ;;  %v8554_v30 = vsub.f32 %v6808_v6, %v6808_v6 }
  0xc4   : > { %6940 = vmatpush.msk.msrb.mxu2 %vm406_vm6, %v15355_v20  ;;  %v6792_v38 = vsel %vm406_vm6, 1.0, %v15580_v25 }
  0xc5   : > { %6924 = vmatpush.msk.msrb.mxu1 %vm405_vm7, %v15355_v20  ;;  %v1421_v40 = vand.u32 4294901760, %v8554_v30  ;;  %vm390_vm7 = vcmp.eq.s32.totalorder %v8012_v14, %v8260_v41  ;;  %v8570_v46 = vsub.f32 %v6792_v38, %v6792_v38 }
  0xc6   : > { %6941 = vmatpush.msk.msrb.mxu2 %vm390_vm7, %v15355_v20  ;;  %v6776_v47 = vsel %vm390_vm7, 1.0, %v15580_v25 }
  0xc7   : > { %6925 = vmatpush.msk.msrb.mxu1 %vm389_vm8, %v15355_v20  ;;  %v1422_v49 = vsub.f32 %v8554_v30, %v1421_v40  ;;  %v1427_v56 = vand.u32 4294901760, %v8570_v46  ;;  %vm374_vm8 = vcmp.eq.s32.totalorder %v8015_v15, %v8260_v41  ;;  %v8590_v63 = vsub.f32 %v6776_v47, %v6776_v47 }
  0xc8   : > { %6942 = vmatpush.msk.msrb.mxu2 %vm374_vm8, %v15355_v20  ;;  %v6760_v0 = vsel %vm374_vm8, 1.0, %v15580_v25 }
  0xc9   : > { %6926 = vmatpush.msk.msrb.mxu1 %vm373_vm9, %v15355_v20  ;;  %v1423_v5 = vand.u32 4294901760, %v1422_v49  ;;  %v1428_v19 = vsub.f32 %v8570_v46, %v1427_v56  ;;  %vm358_vm9 = vcmp.eq.s32.totalorder %v8072_v26, %v8260_v41  ;;  %v8601_v21 = vsub.f32 %v6760_v0, %v6760_v0 }
  0xca   : > { %v1433_v32 = vand.u32 4294901760, %v8590_v63  ;;  %6943 = vmatpush.msk.msrb.mxu2 %vm358_vm9, %v15355_v20  ;;  %v6744_v33 = vsel %vm358_vm9, 1.0, %v15580_v25 }
  0xcb   : > { %6927 = vmatpush.msk.msrb.mxu1 %vm357_vm10, %v15355_v20  ;;  %1424 = vmatpush.msrb.mxu3 %v1423_v5  ;;  %v1429_v37 = vand.u32 4294901760, %v1428_v19  ;;  %v1439_v45 = vand.u32 4294901760, %v8601_v21  ;;  %vm342_vm10 = vcmp.eq.s32.totalorder %v8150_v50, %v8260_v41  ;;  %v8615_v57 = vsub.f32 %v6744_v33, %v6744_v33 }
  0xcc   : > { %v1434_v61 = vsub.f32 %v8590_v63, %v1433_v32  ;;  %6944 = vmatpush.msk.msrb.mxu2 %vm342_vm10, %v15355_v20  ;;  %v6728_v3 = vsel %vm342_vm10, 1.0, %v15580_v25 }
  0xcd   : > { %6928 = vmatpush.msk.msrb.mxu1 %vm15573_vm2, %v15355_v20  ;;  %1430 = vmatpush.msrb.mxu3 %v1429_v37  ;;  %v1440_v17 = vsub.f32 %v8601_v21, %v1439_v45  ;;  %v1445_v53 = vand.u32 4294901760, %v8615_v57  ;;  %v8634_v54 = vsub.f32 %v6728_v3, %v6728_v3  ;;  %vm15279_vm2 = vcmp.eq.s32.totalorder %v8250_v35, %v8260_v41 }
  0xce   : > { %v1435_v36 = vand.u32 4294901760, %v1434_v61  ;;  %v6648_v3 = vsel %vm15279_vm2, 1.0, %v15580_v25 }
  0xcf   : > { %6929 = vmatpush.msk.msrb.mxu1 %vm15575_vm3, %v15355_v20  ;;  %v1441_v59 = vand.u32 4294901760, %v1440_v17  ;;  %v1446_v42 = vsub.f32 %v8615_v57, %v1445_v53  ;;  %v1451_v58 = vand.u32 4294901760, %v8634_v54  ;;  %vm15278_vm3 = vcmp.eq.s32.totalorder %v7991_v7, %v8260_v41 }
  0xd0   : > { %1436 = vmatpush.msrb.mxu3 %v1435_v36  ;;  %v8714_v17 = vsub.f32 %v6648_v3, %v6648_v3 }
  0xd1   : > { %6930 = vmatpush.msk.msrb.mxu1 %vm15577_vm4, %v15355_v20  ;;  %v1447_v16 = vand.u32 4294901760, %v1446_v42  ;;  %v1452_v22 = vsub.f32 %v8634_v54, %v1451_v58 }
  0xd2   : > { %1442 = vmatpush.msrb.mxu3 %v1441_v59  ;;  %v6632_v59 = vsel %vm15278_vm3, 1.0, %v15580_v25  ;;  %v15281_v42 = vand.u32 4294901760, %v8714_v17 }
  0xd3   : > { %6931 = vmatpush.msk.msrb.mxu1 %vm293_vm14, %v15355_v20  ;;  %vm310_vm14 = vcmp.eq.s32.totalorder %v8156_v52, %v8260_v41  ;;  %v1453_v6 = vand.u32 4294901760, %v1452_v22 }
  0xd4   : > { %v6696_v18 = vsel %vm310_vm14, 1.0, %v15580_v25  ;;  %1448 = vmatpush.msrb.mxu3 %v1447_v16  ;;  %v1482_v22 = vsub.f32 %v8714_v17, %v15281_v42 }
  0xd5   : > { %6932 = vmatpush.msk.msrb.mxu1 %vm277_vm15, %v15355_v20  ;;  %vm15282_vm15 = vcmp.eq.s32.totalorder %v8234_v31, %v8260_v41  ;;  %v8665_v23 = vsub.f32 %v6696_v18, %v6696_v18  ;;  %v8728_v18 = vsub.f32 %v6632_v59, %v6632_v59 }
  0xd6   : > { %v6680_v27 = vsel %vm15282_vm15, 1.0, %v15580_v25  ;;  %1454 = vmatpush.msrb.mxu3 %v1453_v6  ;;  %v1483_v6 = vand.u32 4294901760, %v1482_v22 }
  0xd7   : > { %6933 = vmatpush.msk.msrb.mxu1 %vm261_vm1, %v15355_v20  ;;  %v1463_v38 = vand.u32 4294901760, %v8665_v23  ;;  %vm15280_vm1 = vcmp.eq.s32.totalorder %v8247_v34, %v8260_v41  ;;  %v8679_v39 = vsub.f32 %v6680_v27, %v6680_v27  ;;  %v1487_v27 = vand.u32 4294901760, %v8728_v18 }
  0xd8   : > { %v6664_v48 = vsel %vm15280_vm1, 1.0, %v15580_v25 }
  0xd9   : > { %6934 = vmatpush.msk.msrb.mxu1 %vm245_vm12, %v15355_v20  ;;  %vm326_vm12 = vcmp.eq.s32.totalorder %v8153_v51, %v8260_v41  ;;  %v1464_v49 = vsub.f32 %v8665_v23, %v1463_v38  ;;  %v1469_v0 = vand.u32 4294901760, %v8679_v39  ;;  %v8698_v5 = vsub.f32 %v6664_v48, %v6664_v48 }
  0xda   : > { %6945 = vmatpush.msk.msrb.mxu2 %vm326_vm12, %v15355_v20  ;;  %v6712_v62 = vsel %vm326_vm12, 1.0, %v15580_v25 }
  0xdb   : > { %v8654_v1 = vsub.f32 %v6712_v62, %v6712_v62  ;;  %v1465_v33 = vand.u32 4294901760, %v1464_v49  ;;  %v1470_v37 = vsub.f32 %v8679_v39, %v1469_v0  ;;  %v1475_v61 = vand.u32 4294901760, %v8698_v5 }
  0xdc   : > { %6946 = vmatpush.msk.msrb.mxu2 %vm310_vm14, %v15355_v20 }
  0xdd   : > { %v1457_v24 = vand.u32 4294901760, %v8654_v1  ;;  %v1471_v36 = vand.u32 4294901760, %v1470_v37  ;;  %v1476_v62 = vsub.f32 %v8698_v5, %v1475_v61 }
  0xde   : > { %6947 = vmatpush.msk.msrb.mxu2 %vm15282_vm15, %v15355_v20  ;;  %vm15582_vm15 = vcmp.eq.s32.totalorder %v7994_v8, %v8260_v41 }
  0xdf   : > { %v1458_v47 = vsub.f32 %v8654_v1, %v1457_v24  ;;  %v1477_v16 = vand.u32 4294901760, %v1476_v62 }
  0xe0   : > { %6948 = vmatpush.msk.msrb.mxu2 %vm15280_vm1, %v15355_v20 }
  0xe1   : > { %v1459_v19 = vand.u32 4294901760, %v1458_v47  ;;  %v1488_v47 = vsub.f32 %v8728_v18, %v1487_v27 }
  0xe2   : > { %6949 = vmatpush.msk.msrb.mxu2 %vm15279_vm2, %v15355_v20 }
  0xe3   : > { %1460 = vmatpush.msrb.mxu3 %v1459_v19  ;;  %v1489_v48 = vand.u32 4294901760, %v1488_v47 }
  0xe4   : > { %6950 = vmatpush.msk.msrb.mxu2 %vm15278_vm3, %v15355_v20 }
  0xe5   : > { %1466 = vmatpush.msrb.mxu3 %v1465_v33 }
  0xe7   : > { %1472 = vmatpush.msrb.mxu3 %v1471_v36 }
  0xe9   : > { %1478 = vmatpush.msrb.mxu3 %v1477_v16 }
  0xeb   : > { %1484 = vmatpush.msrb.mxu3 %v1483_v6 }
  0xed   : > { %1490 = vmatpush.msrb.mxu3 %v1489_v48 }
 0x124   : > { %v188_v49 = vpop.xlane.xlu0 %187 }
 0x125   : > { %7720 = vrcp.f32 %v188_v49  ;;  %v200_v3 = vand.u32 2147483648, %v188_v49  ;;  %v198_v62 = vand.u32 2147483647, %v188_v49  ;;  %vm194_vm3 = vweird.f32 %v188_v49 }
 0x127   : > { %v201_v16 = vor.u32 1.1754944e-38, %v200_v3  ;;  %vm199_vm1 = vcmp.eq.f32.partialorder %v198_v62, 8.507059e+37 }
 0x12b   : > { %v7721_v19 = vpop.eup %7720 }
 0x12c   : > { %v190_v33 = vmul.f32 %v7721_v19, %v188_v49  ;;  %vm195_vm4 = vweird.f32 %v7721_v19 }
 0x12d   : > { %vm196_vm2 = vmor %vm194_vm3, %vm195_vm4  ;;  %vm15591_vm3 = vcmp.eq.s32.totalorder %v7991_v7, %v8260_v41 }
 0x12e   : > { %v191_v37 = vsub.f32 1.0, %v190_v33 }
 0x130   : > { %v192_v36 = vmul.f32 %v7721_v19, %v191_v37  ;;  %v8785_v37 = vperm.slane %v7986_v4, 2 }
 0x132   : > { %v193_v59 = vadd.f32 %v7721_v19, %v192_v36  ;;  %vm15292_vm4 = vcmp.eq.s32.totalorder %v8150_v50, %v8785_v37 }
 0x134   : > { %v197_v22 = vsel %vm196_vm2, %v7721_v19, %v193_v59  ;;  %v15585_v19 = vand.u32 4294901760, %v8368_v60  ;;  %vm15290_vm2 = vcmp.eq.s32.totalorder %v8072_v26, %v8785_v37 }
 0x135   : > { %v202_v42 = vsel %vm199_vm1, %v201_v16, %v197_v22  ;;  %vm15289_vm1 = vcmp.eq.s32.totalorder %v8015_v15, %v8785_v37  ;;  %v6745_v16 = vsel %vm15290_vm2, 1.0, %v15580_v25 }
 0x136   : > { %v203_v6 = vmul.f32 %v8328_v2, %v202_v42  ;;  %v15584_v2 = vand.u32 4294901760, %v8350_v43  ;;  %v6761_v36 = vsel %vm15289_vm1, 1.0, %v15580_v25 }
 0x137   : > { %v9013_v22 = vsub.f32 %v6761_v36, %v6761_v36 }
 0x138   : > { %v8738_v47 = vand.u32 4294901760, %v203_v6 }
 0x13a   : > { %v8741_v48 = vsub.f32 %v203_v6, %v8738_v47  ;;  %1151 = vmatmul.f32.vlgmr.msra.gmra.mxu1 %v8738_v47 }
 0x13b   : > { %6951 = vmatpush.msk.msra.mxu1 %vm15582_vm15, %v15355_v20 }
 0x13c   : > { %15581 = vst [vmem:[#allocation11_spill] sm:$0xff] %v8741_v48  ;;  %1205 = vmatmul.f32.vlgmr.msra.gmra.mxu2 %v8741_v48  ;;  %v8750_v49 = vand.u32 4294901760, %v8741_v48 }
 0x13d   : > { %6952 = vmatpush.msk.msra.mxu1 %vm470_vm13, %v15355_v20  ;;  %1592 = vmatpush.msra.mxu2 %v15584_v2 }
 0x13e   : > { %15583 = vst [vmem:[#allocation12_spill] sm:$0xff] %v8750_v49  ;;  %1244 = vmatmul.f32.vlgmr.msra.gmra.mxu3 %v8750_v49  ;;  %v1048_v42 = vsub.f32 %v8741_v48, %v8750_v49 }
 0x13f   : > { %6953 = vmatpush.msk.msra.mxu1 %vm454_vm0, %v15355_v20  ;;  %1596 = vmatpush.msra.mxu2 %v15585_v19 }
 0x140   : > { %6967 = vmatpush.msk.msra.mxu3 %vm15582_vm15, %v15355_v20  ;;  %v8771_v33 = vand.u32 4294901760, %v1048_v42 }
 0x141   : > { %6954 = vmatpush.msk.msra.mxu1 %vm438_vm11, %v15355_v20  ;;  %1600 = vmatpush.msra.mxu2 %v1409_v44 }
 0x142   : > { %15586 = vst [vmem:[#allocation13_spill] sm:$0xff] %v8771_v33  ;;  %6968 = vmatpush.msk.msra.mxu3 %vm470_vm13, %v15355_v20  ;;  %1050 = vmatmul.f32.vlgmr.msra.gmra.mxu0 %v8771_v33  ;;  %vm15283_vm13 = vcmp.eq.s32.totalorder %v8000_v10, %v8785_v37 }
 0x143   : > { %1350 = vmatmul.f32.vlgmr.msrb.gmra.mxu1 %v8738_v47  ;;  %1498 = vmatpush.msra.mxu0 %v8350_v43  ;;  %v6841_v44 = vsel %vm15283_vm13, 1.0, %v15580_v25 }
 0x144   : > { %6955 = vmatpush.msk.msra.mxu1 %vm422_vm5, %v15355_v20  ;;  %1604 = vmatpush.msra.mxu2 %v1415_v29 }
 0x145   : > { %6969 = vmatpush.msk.msra.mxu3 %vm454_vm0, %v15355_v20  ;;  %1391 = vmatmul.f32.vlgmr.msrb.gmra.mxu2 %v8771_v33  ;;  %vm487_vm0 = vcmp.eq.s32.totalorder %v7994_v8, %v8785_v37 }
 0x146   : > { %1501 = vmatpush.msra.mxu0 %v8368_v60  ;;  %6956 = vmatpush.msk.msra.mxu1 %vm406_vm6, %v15355_v20  ;;  %v6873_v43 = vsel %vm487_vm0, 1.0, %v15580_v25 }
 0x147   : > { %1608 = vmatpush.msra.mxu2 %v1421_v40  ;;  %6970 = vmatpush.msk.msra.mxu3 %vm438_vm11, %v15355_v20  ;;  %vm471_vm11 = vcmp.eq.s32.totalorder %v7997_v9, %v8785_v37  ;;  %v8850_v60 = vsub.f32 %v6873_v43, %v6873_v43  ;;  %v8899_v40 = vsub.f32 %v6841_v44, %v6841_v44  ;;  %v15302_v44 = vand.u32 4294901760, %v9013_v22 }
 0x148   : > { %1492 = vmatmul.f32.vlgmr.msrb.gmra.mxu3 %v8738_v47  ;;  %1504 = vmatpush.msra.mxu0 %v8391_v55  ;;  %v6857_v55 = vsel %vm471_vm11, 1.0, %v15580_v25 }
 0x149   : > { %6957 = vmatpush.msk.msra.mxu1 %vm390_vm7, %v15355_v20  ;;  %1612 = vmatpush.msra.mxu2 %v1427_v56  ;;  %v1738_v29 = vand.u32 4294901760, %v8850_v60 }
 0x14a   : > { %6971 = vmatpush.msk.msra.mxu3 %vm422_vm5, %v15355_v20  ;;  %1507 = vmatpush.msra.mxu0 %v8541_v28  ;;  %vm15284_vm5 = vcmp.eq.s32.totalorder %v8003_v11, %v8785_v37  ;;  %v8879_v28 = vsub.f32 %v6857_v55, %v6857_v55 }
 0x14b   : > { %6958 = vmatpush.msk.msra.mxu1 %vm374_vm8, %v15355_v20  ;;  %1616 = vmatpush.msra.mxu2 %v1433_v32 }
 0x14c   : > { %6972 = vmatpush.msk.msra.mxu3 %vm406_vm6, %v15355_v20  ;;  %1313 = vmatmul.f32.vlgmr.msrb.gmra.mxu0 %v8738_v47  ;;  %vm423_vm6 = vcmp.eq.s32.totalorder %v8006_v12, %v8785_v37  ;;  %v15314_v56 = vand.u32 4294901760, %v8879_v28 }
 0x14d   : > { %1510 = vmatpush.msra.mxu0 %v8554_v30  ;;  %6959 = vmatpush.msk.msra.mxu1 %vm358_vm9, %v15355_v20  ;;  %v6825_v30 = vsel %vm15284_vm5, 1.0, %v15580_v25 }
 0x14e   : > { %1620 = vmatpush.msra.mxu2 %v1439_v45  ;;  %6973 = vmatpush.msk.msra.mxu3 %vm390_vm7, %v15355_v20  ;;  %vm15285_vm7 = vcmp.eq.s32.totalorder %v8009_v13, %v8785_v37  ;;  %v15312_v45 = vand.u32 4294901760, %v8899_v40 }
 0x14f   : > { %1513 = vmatpush.msra.mxu0 %v8570_v46  ;;  %6960 = vmatpush.msk.msra.mxu1 %vm342_vm10, %v15355_v20  ;;  %v6809_v46 = vsel %vm423_vm6, 1.0, %v15580_v25  ;;  %v6793_v32 = vsel %vm15285_vm7, 1.0, %v15580_v25 }
 0x150   : > { %1624 = vmatpush.msra.mxu2 %v1445_v53  ;;  %6974 = vmatpush.msk.msra.mxu3 %vm374_vm8, %v15355_v20  ;;  %vm15288_vm8 = vcmp.eq.s32.totalorder %v8012_v14, %v8785_v37 }
 0x151   : > { %1516 = vmatpush.msra.mxu0 %v8590_v63  ;;  %6961 = vmatpush.msk.msra.mxu1 %vm326_vm12, %v15355_v20  ;;  %v8919_v63 = vsub.f32 %v6825_v30, %v6825_v30  ;;  %v6777_v53 = vsel %vm15288_vm8, 1.0, %v15580_v25 }
 0x152   : > { %1628 = vmatpush.msra.mxu2 %v1451_v58  ;;  %6975 = vmatpush.msk.msra.mxu3 %vm358_vm9, %v15355_v20  ;;  %vm15587_vm9 = vcmp.eq.s32.totalorder %v8234_v31, %v8260_v41  ;;  %v8984_v3 = vsub.f32 %v6777_v53, %v6777_v53 }
 0x153   : > { %1519 = vmatpush.msra.mxu0 %v8601_v21  ;;  %6962 = vmatpush.msk.msra.mxu1 %vm310_vm14, %v15355_v20  ;;  %v1739_v21 = vsub.f32 %v8850_v60, %v1738_v29  ;;  %v15311_v58 = vand.u32 4294901760, %v8919_v63 }
 0x154   : > { %1632 = vmatpush.msra.mxu2 %v1457_v24  ;;  %6976 = vmatpush.msk.msra.mxu3 %vm342_vm10, %v15355_v20  ;;  %vm15588_vm10 = vcmp.eq.s32.totalorder %v8247_v34, %v8260_v41  ;;  %v8965_v24 = vsub.f32 %v6793_v32, %v6793_v32  ;;  %v15303_v42 = vand.u32 4294901760, %v8984_v3 }
 0x155   : > { %1522 = vmatpush.msra.mxu0 %v8615_v57  ;;  %6963 = vmatpush.msk.msra.mxu1 %vm15587_vm9, %v15355_v20  ;;  %v8942_v57 = vsub.f32 %v6809_v46, %v6809_v46  ;;  %vm15593_vm15 = vmmov %vm15588_vm10 }
 0x156   : > { %1636 = vmatpush.msra.mxu2 %v1463_v38  ;;  %6977 = vmatpush.msk.msra.mxu3 %vm326_vm12, %v15355_v20  ;;  %vm15589_vm12 = vcmp.eq.s32.totalorder %v8250_v35, %v8260_v41  ;;  %v1740_v38 = vand.u32 4294901760, %v1739_v21  ;;  %v15307_v59 = vand.u32 4294901760, %v8965_v24 }
 0x157   : > { %1525 = vmatpush.msra.mxu0 %v8634_v54  ;;  %6964 = vmatpush.msk.msra.mxu1 %vm15588_vm10, %v15355_v20  ;;  %v1745_v54 = vsub.f32 %v8879_v28, %v15314_v56  ;;  %vm15594_vm10 = vmmov %vm15589_vm12 }
 0x158   : > { %1640 = vmatpush.msra.mxu2 %v1469_v0  ;;  %6978 = vmatpush.msk.msra.mxu3 %vm310_vm14, %v15355_v20  ;;  %vm15590_vm14 = vmmov %vm15587_vm9  ;;  %v15308_v0 = vand.u32 4294901760, %v8942_v57  ;;  %vm15295_vm9 = vcmp.eq.s32.totalorder %v8153_v51, %v8785_v37  ;;  %v1769_v43 = vsub.f32 %v8965_v24, %v15307_v59 }
 0x159   : > { %1528 = vmatpush.msra.mxu0 %v8654_v1  ;;  %6965 = vmatpush.msk.msra.mxu1 %vm15589_vm12, %v15355_v20  ;;  %v1751_v1 = vsub.f32 %v8899_v40, %v15312_v45  ;;  %v1746_v62 = vand.u32 4294901760, %v1745_v54  ;;  %vm15299_vm12 = vcmp.eq.s32.totalorder %v8156_v52, %v8785_v37  ;;  %v6713_v55 = vsel %vm15295_vm9, 1.0, %v15580_v25 }
 0x15a   : > { %1644 = vmatpush.msra.mxu2 %v1475_v61  ;;  %6979 = vmatpush.msk.msra.mxu3 %vm15590_vm14, %v15355_v20  ;;  %v15592_v61 = vand.u32 4294901760, %v8714_v17  ;;  %v1763_v2 = vsub.f32 %v8942_v57, %v15308_v0  ;;  %vm15595_vm14 = vmmov %vm15591_vm3  ;;  %v6697_v41 = vsel %vm15299_vm12, 1.0, %v15580_v25  ;;  %v9068_v32 = vsub.f32 %v6713_v55, %v6713_v55 }
 0x15b   : > { %1531 = vmatpush.msra.mxu0 %v8665_v23  ;;  %6966 = vmatpush.msk.msra.mxu1 %vm15591_vm3, %v15355_v20  ;;  %v1757_v23 = vsub.f32 %v8919_v63, %v15311_v58  ;;  %v1752_v6 = vand.u32 4294901760, %v1751_v1  ;;  %vm295_vm3 = vcmp.eq.s32.totalorder %v8234_v31, %v8785_v37  ;;  %v1770_v53 = vand.u32 4294901760, %v1769_v43 }
 0x15c   : > { %1648 = vmatpush.msra.mxu2 %v15592_v61  ;;  %6980 = vmatpush.msk.msra.mxu3 %vm15593_vm15, %v15355_v20  ;;  %v1764_v46 = vand.u32 4294901760, %v1763_v2  ;;  %vm279_vm15 = vcmp.eq.s32.totalorder %v8247_v34, %v8785_v37  ;;  %v6681_v54 = vsel %vm295_vm3, 1.0, %v15580_v25  ;;  %v9086_v1 = vsub.f32 %v6697_v41, %v6697_v41 }
 0x15d   : > { %1585 = vmatmul.f32.vlgmr.msra.gmra.mxu1 %v8750_v49  ;;  %1534 = vmatpush.msra.mxu0 %v8679_v39  ;;  %v6729_v39 = vsel %vm15292_vm4, 1.0, %v15580_v25  ;;  %v1758_v19 = vand.u32 4294901760, %v1757_v23  ;;  %v6665_v61 = vsel %vm279_vm15, 1.0, %v15580_v25  ;;  %v15297_v23 = vand.u32 4294901760, %v9068_v32 }
 0x15e   : > { %1741 = vmatpush.msrb.mxu1 %v1740_v38  ;;  %1652 = vmatpush.msra.mxu2 %v1487_v27  ;;  %v9032_v27 = vsub.f32 %v6745_v16, %v6745_v16  ;;  %v9050_v30 = vsub.f32 %v6729_v39, %v6729_v39  ;;  %v1781_v38 = vsub.f32 %v9013_v22, %v15302_v44  ;;  %v15294_v39 = vand.u32 4294901760, %v9086_v1 }
 0x15f   : > { %6981 = vmatpush.msk.msra.mxu3 %vm15594_vm10, %v15355_v20  ;;  %1654 = vmatmul.f32.vlgmr.msra.gmra.mxu2 %v8738_v47  ;;  %vm263_vm10 = vcmp.eq.s32.totalorder %v8250_v35, %v8785_v37  ;;  %v9101_v16 = vsub.f32 %v6681_v54, %v6681_v54  ;;  %v9125_v43 = vperm.slane %v7986_v4, 3 }
 0x160   : > { %1747 = vmatpush.msrb.mxu1 %v1746_v62  ;;  %1839 = vmatpush.msrb.mxu2 %v8850_v60  ;;  %v15301_v21 = vand.u32 4294901760, %v9032_v27 }
 0x161   : > { %1537 = vmatpush.msra.mxu0 %v8698_v5  ;;  %6982 = vmatpush.msk.msra.mxu3 %vm15595_vm14, %v15355_v20  ;;  %v1775_v5 = vsub.f32 %v8984_v3, %v15303_v42  ;;  %vm247_vm14 = vcmp.eq.s32.totalorder %v7991_v7, %v8785_v37  ;;  %v15293_v41 = vand.u32 4294901760, %v9101_v16 }
 0x162   : > { %1691 = vmatmul.f32.vlgmr.msra.gmra.mxu3 %v8738_v47  ;;  %1753 = vmatpush.msrb.mxu1 %v1752_v6  ;;  %v1787_v62 = vsub.f32 %v9032_v27, %v15301_v21  ;;  %v1782_v6 = vand.u32 4294901760, %v1781_v38  ;;  %v6633_v55 = vsel %vm247_vm14, 1.0, %v15580_v25  ;;  %v1805_v38 = vsub.f32 %v9086_v1, %v15294_v39 }
 0x163   : > { %1842 = vmatpush.msrb.mxu2 %v8879_v28  ;;  %6999 = vmatpush.msk.msrb.mxu3 %vm487_vm0, %v15355_v20  ;;  %v1776_v36 = vand.u32 4294901760, %v1775_v5  ;;  %v1799_v5 = vsub.f32 %v9068_v32, %v15297_v23 }
 0x164   : > { %1540 = vmatpush.msra.mxu0 %v8714_v17  ;;  %1759 = vmatpush.msrb.mxu1 %v1758_v19  ;;  %v15300_v17 = vand.u32 4294901760, %v9050_v30  ;;  %v9122_v19 = vsub.f32 %v6665_v61, %v6665_v61  ;;  %v9159_v61 = vsub.f32 %v6633_v55, %v6633_v55 }
 0x165   : > { %1845 = vmatpush.msrb.mxu2 %v8899_v40  ;;  %7000 = vmatpush.msk.msrb.mxu3 %vm471_vm11, %v15355_v20 }
 0x166   : > { %1543 = vmatpush.msra.mxu0 %v8728_v18  ;;  %1765 = vmatpush.msrb.mxu1 %v1764_v46  ;;  %v6649_v18 = vsel %vm263_vm10, 1.0, %v15580_v25  ;;  %v1793_v2 = vsub.f32 %v9050_v30, %v15300_v17  ;;  %v1788_v46 = vand.u32 4294901760, %v1787_v62  ;;  %v1800_v62 = vand.u32 4294901760, %v1799_v5 }
 0x167   : > { %1546 = vmatmul.f32.vlgmr.msra.gmra.mxu0 %v8741_v48  ;;  %1848 = vmatpush.msrb.mxu2 %v8919_v63 }
 0x168   : > { %6983 = vmatpush.msk.msrb.mxu0 %vm487_vm0, %v15355_v20  ;;  %7001 = vmatpush.msk.msrb.mxu3 %vm15283_vm13, %v15355_v20  ;;  %v1794_v54 = vand.u32 4294901760, %v1793_v2  ;;  %v1806_v2 = vand.u32 4294901760, %v1805_v38 }
 0x169   : > { %1771 = vmatpush.msrb.mxu1 %v1770_v53  ;;  %1851 = vmatpush.msrb.mxu2 %v8942_v57  ;;  %v9144_v53 = vsub.f32 %v6649_v18, %v6649_v18  ;;  %v1811_v18 = vsub.f32 %v9101_v16, %v15293_v41 }
 0x16a   : > { %6984 = vmatpush.msk.msrb.mxu0 %vm471_vm11, %v15355_v20  ;;  %7002 = vmatpush.msk.msrb.mxu3 %vm15284_vm5, %v15355_v20 }
 0x16b   : > { %1777 = vmatpush.msrb.mxu1 %v1776_v36  ;;  %1854 = vmatpush.msrb.mxu2 %v8965_v24  ;;  %v15287_v36 = vand.u32 4294901760, %v9122_v19 }
 0x16c   : > { %6985 = vmatpush.msk.msrb.mxu0 %vm15283_vm13, %v15355_v20  ;;  %7003 = vmatpush.msk.msrb.mxu3 %vm423_vm6, %v15355_v20  ;;  %vm15305_vm13 = vcmp.eq.s32.totalorder %v7994_v8, %v9125_v43 }
 0x16d   : > { %1783 = vmatpush.msrb.mxu1 %v1782_v6  ;;  %1857 = vmatpush.msrb.mxu2 %v8984_v3  ;;  %v15286_v6 = vand.u32 4294901760, %v9144_v53  ;;  %v1817_v55 = vsub.f32 %v9122_v19, %v15287_v36  ;;  %v6874_v5 = vsel %vm15305_vm13, 1.0, %v15580_v25 }
 0x16e   : > { %6986 = vmatpush.msk.msrb.mxu0 %vm15284_vm5, %v15355_v20  ;;  %7004 = vmatpush.msk.msrb.mxu3 %vm15285_vm7, %v15355_v20  ;;  %vm15309_vm5 = vcmp.eq.s32.totalorder %v7997_v9, %v9125_v43  ;;  %v9225_v36 = vsub.f32 %v6874_v5, %v6874_v5 }
 0x16f   : > { %1789 = vmatpush.msrb.mxu1 %v1788_v46  ;;  %1860 = vmatpush.msrb.mxu2 %v9013_v22  ;;  %v15291_v46 = vand.u32 4294901760, %v9159_v61  ;;  %v1823_v38 = vsub.f32 %v9144_v53, %v15286_v6 }
 0x170   : > { %6987 = vmatpush.msk.msrb.mxu0 %vm423_vm6, %v15355_v20  ;;  %7005 = vmatpush.msk.msrb.mxu3 %vm15288_vm8, %v15355_v20 }
 0x171   : > { %1795 = vmatpush.msrb.mxu1 %v1794_v54  ;;  %1863 = vmatpush.msrb.mxu2 %v9032_v27  ;;  %v1812_v54 = vand.u32 4294901760, %v1811_v18  ;;  %v1818_v18 = vand.u32 4294901760, %v1817_v55  ;;  %v1829_v6 = vsub.f32 %v9159_v61, %v15291_v46 }
 0x172   : > { %6988 = vmatpush.msk.msrb.mxu0 %vm15285_vm7, %v15355_v20  ;;  %7006 = vmatpush.msk.msrb.mxu3 %vm15289_vm1, %v15355_v20  ;;  %vm456_vm7 = vcmp.eq.s32.totalorder %v8000_v10, %v9125_v43 }
 0x173   : > { %1801 = vmatpush.msrb.mxu1 %v1800_v62  ;;  %1866 = vmatpush.msrb.mxu2 %v9050_v30  ;;  %v6858_v62 = vsel %vm15309_vm5, 1.0, %v15580_v25  ;;  %v6842_v5 = vsel %vm456_vm7, 1.0, %v15580_v25 }
 0x174   : > { %6989 = vmatpush.msk.msrb.mxu0 %vm15288_vm8, %v15355_v20  ;;  %7007 = vmatpush.msk.msrb.mxu3 %vm15290_vm2, %v15355_v20  ;;  %vm15315_vm8 = vcmp.eq.s32.totalorder %v8003_v11, %v9125_v43  ;;  %v9238_v55 = vsub.f32 %v6858_v62, %v6858_v62 }
 0x175   : > { %1807 = vmatpush.msrb.mxu1 %v1806_v2  ;;  %1869 = vmatpush.msrb.mxu2 %v9068_v32  ;;  %v1824_v2 = vand.u32 4294901760, %v1823_v38  ;;  %v15296_v38 = vand.u32 4294901760, %v9225_v36  ;;  %v6826_v62 = vsel %vm15315_vm8, 1.0, %v15580_v25 }
 0x176   : > { %6990 = vmatpush.msk.msrb.mxu0 %vm15289_vm1, %v15355_v20  ;;  %7008 = vmatpush.msk.msrb.mxu3 %vm15292_vm4, %v15355_v20  ;;  %vm15317_vm1 = vcmp.eq.s32.totalorder %v8006_v12, %v9125_v43  ;;  %v15298_v46 = vand.u32 4294901760, %v9238_v55 }
 0x177   : > { %1813 = vmatpush.msrb.mxu1 %v1812_v54  ;;  %1872 = vmatpush.msrb.mxu2 %v9086_v1  ;;  %v1830_v54 = vand.u32 4294901760, %v1829_v6  ;;  %v6810_v6 = vsel %vm15317_vm1, 1.0, %v15580_v25 }
 0x178   : > { %6991 = vmatpush.msk.msrb.mxu0 %vm15290_vm2, %v15355_v20  ;;  %7009 = vmatpush.msk.msrb.mxu3 %vm15295_vm9, %v15355_v20  ;;  %vm15319_vm2 = vcmp.eq.s32.totalorder %v8009_v13, %v9125_v43  ;;  %v9294_v41 = vsub.f32 %v6810_v6, %v6810_v6 }
 0x179   : > { %1819 = vmatpush.msrb.mxu1 %v1818_v18  ;;  %1875 = vmatpush.msrb.mxu2 %v9101_v16  ;;  %v9268_v18 = vsub.f32 %v6842_v5, %v6842_v5  ;;  %v9286_v5 = vsub.f32 %v6826_v62, %v6826_v62  ;;  %v6794_v39 = vsel %vm15319_vm2, 1.0, %v15580_v25  ;;  %v2086_v62 = vsub.f32 %v9238_v55, %v15298_v46 }
 0x17a   : > { %6992 = vmatpush.msk.msrb.mxu0 %vm15292_vm4, %v15355_v20  ;;  %7010 = vmatpush.msk.msrb.mxu3 %vm15299_vm12, %v15355_v20  ;;  %vm392_vm4 = vcmp.eq.s32.totalorder %v8012_v14, %v9125_v43  ;;  %v9329_v23 = vsub.f32 %v6794_v39, %v6794_v39  ;;  %v15310_v21 = vand.u32 4294901760, %v9294_v41 }
 0x17b   : > { %1825 = vmatpush.msrb.mxu1 %v1824_v2  ;;  %1878 = vmatpush.msrb.mxu2 %v9122_v19  ;;  %v2080_v2 = vsub.f32 %v9225_v36, %v15296_v38  ;;  %v6778_v6 = vsel %vm392_vm4, 1.0, %v15580_v25  ;;  %v15306_v38 = vand.u32 4294901760, %v9286_v5 }
 0x17c   : > { %6993 = vmatpush.msk.msrb.mxu0 %vm15295_vm9, %v15355_v20  ;;  %7011 = vmatpush.msk.msrb.mxu3 %vm295_vm3, %v15355_v20  ;;  %vm376_vm9 = vcmp.eq.s32.totalorder %v8015_v15, %v9125_v43  ;;  %v9354_v44 = vsub.f32 %v6778_v6, %v6778_v6 }
 0x17d   : > { %1831 = vmatpush.msrb.mxu1 %v1830_v54  ;;  %1881 = vmatpush.msrb.mxu2 %v9144_v53  ;;  %v15304_v54 = vand.u32 4294901760, %v9268_v18  ;;  %v6762_v46 = vsel %vm376_vm9, 1.0, %v15580_v25  ;;  %v2081_v17 = vand.u32 4294901760, %v2080_v2  ;;  %v2087_v2 = vand.u32 4294901760, %v2086_v62 }
 0x17e   : > { %6994 = vmatpush.msk.msrb.mxu0 %vm15299_vm12, %v15355_v20  ;;  %7012 = vmatpush.msk.msrb.mxu3 %vm279_vm15, %v15355_v20  ;;  %vm360_vm12 = vcmp.eq.s32.totalorder %v8072_v26, %v9125_v43  ;;  %v9366_v42 = vsub.f32 %v6762_v46, %v6762_v46  ;;  %v15313_v62 = vand.u32 4294901760, %v9329_v23  ;;  %v2104_v46 = vsub.f32 %v9294_v41, %v15310_v21 }
 0x17f   : > { %1833 = vmatmul.f32.vlgmr.msrb.gmra.mxu1 %v8738_v47  ;;  %1884 = vmatpush.msrb.mxu2 %v9159_v61  ;;  %v2092_v39 = vsub.f32 %v9268_v18, %v15304_v54  ;;  %v6746_v6 = vsel %vm360_vm12, 1.0, %v15580_v25  ;;  %v2098_v54 = vsub.f32 %v9286_v5, %v15306_v38  ;;  %v15316_v59 = vand.u32 4294901760, %v9354_v44 }
 0x180   : > { %7015 = vmatpush.msk.msra.mxu1 %vm487_vm0, %v15355_v20  ;;  %6995 = vmatpush.msk.msrb.mxu0 %vm295_vm3, %v15355_v20  ;;  %vm344_vm0 = vcmp.eq.s32.totalorder %v8150_v50, %v9125_v43  ;;  %v9403_v0 = vsub.f32 %v6746_v6, %v6746_v6  ;;  %v15318_v21 = vand.u32 4294901760, %v9366_v42  ;;  %v2105_v45 = vand.u32 4294901760, %v2104_v46 }
 0x181   : > { %7013 = vmatpush.msk.msrb.mxu3 %vm263_vm10, %v15355_v20  ;;  %1887 = vmatmul.f32.vlgmr.msrb.gmra.mxu2 %v8741_v48  ;;  %v6730_v38 = vsel %vm344_vm0, 1.0, %v15580_v25  ;;  %v2099_v6 = vand.u32 4294901760, %v2098_v54  ;;  %v15599_v46 = vand.u32 4294901760, %v8879_v28 }
 0x182   : > { %7016 = vmatpush.msk.msra.mxu1 %vm471_vm11, %v15355_v20  ;;  %7031 = vmatpush.msk.msra.mxu2 %vm15305_vm13, %v15355_v20  ;;  %vm15596_vm11 = vcmp.eq.s32.totalorder %v8000_v10, %v8785_v37  ;;  %vm328_vm13 = vcmp.eq.s32.totalorder %v8153_v51, %v9125_v43  ;;  %v9427_v58 = vsub.f32 %v6730_v38, %v6730_v38 }
 0x183   : > { %6996 = vmatpush.msk.msrb.mxu0 %vm279_vm15, %v15355_v20  ;;  %7014 = vmatpush.msk.msrb.mxu3 %vm247_vm14, %v15355_v20  ;;  %v2116_v38 = vsub.f32 %v9354_v44, %v15316_v59  ;;  %v2122_v60 = vsub.f32 %v9366_v42, %v15318_v21 }
 0x184   : > { %1926 = vmatmul.f32.vlgmr.msrb.gmra.mxu3 %v8750_v49  ;;  %7017 = vmatpush.msk.msra.mxu1 %vm15596_vm11, %v15355_v20  ;;  %vm15597_vm11 = vcmp.eq.s32.totalorder %v8003_v11, %v8785_v37 }
 0x185   : > { %7032 = vmatpush.msk.msra.mxu2 %vm15309_vm5, %v15355_v20  ;;  %2082 = vmatpush.msra.mxu3 %v2081_v17  ;;  %v2093_v17 = vand.u32 4294901760, %v2092_v39  ;;  %vm312_vm5 = vcmp.eq.s32.totalorder %v8156_v52, %v9125_v43  ;;  %v6714_v39 = vsel %vm328_vm13, 1.0, %v15580_v25 }
 0x186   : > { %6997 = vmatpush.msk.msrb.mxu0 %vm263_vm10, %v15355_v20  ;;  %7018 = vmatpush.msk.msra.mxu1 %vm15597_vm11, %v15355_v20  ;;  %vm296_vm11 = vcmp.eq.s32.totalorder %v8234_v31, %v9125_v43  ;;  %v6698_v54 = vsel %vm312_vm5, 1.0, %v15580_v25  ;;  %v9446_v56 = vsub.f32 %v6714_v39, %v6714_v39  ;;  %v15320_v39 = vand.u32 4294901760, %v9427_v58 }
 0x187   : > { %7033 = vmatpush.msk.msra.mxu2 %vm456_vm7, %v15355_v20  ;;  %2088 = vmatpush.msra.mxu3 %v2087_v2  ;;  %v2110_v2 = vsub.f32 %v9329_v23, %v15313_v62  ;;  %v2127_v62 = vand.u32 4294901760, %v9403_v0  ;;  %v9468_v59 = vsub.f32 %v6698_v54, %v6698_v54 }
 0x188   : > { %6998 = vmatpush.msk.msrb.mxu0 %vm247_vm14, %v15355_v20  ;;  %7019 = vmatpush.msk.msra.mxu1 %vm423_vm6, %v15355_v20  ;;  %vm280_vm6 = vcmp.eq.s32.totalorder %v8247_v34, %v9125_v43 }
 0x189   : > { %1732 = vmatmul.f32.vlgmr.msrb.gmra.mxu0 %v8771_v33  ;;  %7034 = vmatpush.msk.msra.mxu2 %vm15315_vm8, %v15355_v20  ;;  %vm15598_vm8 = vcmp.eq.s32.totalorder %v8009_v13, %v8785_v37  ;;  %v6666_v28 = vsel %vm280_vm6, 1.0, %v15580_v25  ;;  %v2128_v54 = vsub.f32 %v9403_v0, %v2127_v62 }
 0x18a   : > { %1933 = vmatpush.msra.mxu0 %v1738_v29  ;;  %2094 = vmatpush.msra.mxu3 %v2093_v17  ;;  %v6682_v29 = vsel %vm296_vm11, 1.0, %v15580_v25  ;;  %v2111_v17 = vand.u32 4294901760, %v2110_v2  ;;  %v2117_v2 = vand.u32 4294901760, %v2116_v38  ;;  %v2134_v38 = vsub.f32 %v9427_v58, %v15320_v39 }
 0x18b   : > { %7020 = vmatpush.msk.msra.mxu1 %vm15598_vm8, %v15355_v20  ;;  %7035 = vmatpush.msk.msra.mxu2 %vm15317_vm1, %v15355_v20  ;;  %vm15600_vm8 = vcmp.eq.s32.totalorder %v8012_v14, %v8785_v37  ;;  %vm264_vm1 = vcmp.eq.s32.totalorder %v8250_v35, %v9125_v43  ;;  %v9490_v21 = vsub.f32 %v6682_v29, %v6682_v29  ;;  %v2145_v29 = vand.u32 4294901760, %v9468_v59 }
 0x18c   : > { %1937 = vmatpush.msra.mxu0 %v15599_v46  ;;  %2100 = vmatpush.msra.mxu3 %v2099_v6  ;;  %v15601_v6 = vand.u32 4294901760, %v8899_v40  ;;  %v15321_v46 = vand.u32 4294901760, %v9446_v56  ;;  %v2123_v40 = vand.u32 4294901760, %v2122_v60  ;;  %v6650_v60 = vsel %vm264_vm1, 1.0, %v15580_v25 }
 0x18d   : > { %7021 = vmatpush.msk.msra.mxu1 %vm15600_vm8, %v15355_v20  ;;  %7036 = vmatpush.msk.msra.mxu2 %vm15319_vm2, %v15355_v20  ;;  %vm15602_vm8 = vcmp.eq.s32.totalorder %v8015_v15, %v8785_v37  ;;  %vm248_vm2 = vcmp.eq.s32.totalorder %v7991_v7, %v9125_v43 }
 0x18e   : > { %1941 = vmatpush.msra.mxu0 %v15601_v6  ;;  %2106 = vmatpush.msra.mxu3 %v2105_v45  ;;  %v15603_v45 = vand.u32 4294901760, %v8919_v63  ;;  %v9508_v6 = vsub.f32 %v6666_v28, %v6666_v28  ;;  %v15605_v63 = vand.u32 4294901760, %v8942_v57  ;;  %v2140_v28 = vsub.f32 %v9446_v56, %v15321_v46 }
 0x18f   : > { %7022 = vmatpush.msk.msra.mxu1 %vm15602_vm8, %v15355_v20  ;;  %7037 = vmatpush.msk.msra.mxu2 %vm392_vm4, %v15355_v20  ;;  %vm15604_vm8 = vcmp.eq.s32.totalorder %v8072_v26, %v8785_v37  ;;  %v6634_v39 = vsel %vm248_vm2, 1.0, %v15580_v25  ;;  %v9540_v57 = vsub.f32 %v6650_v60, %v6650_v60 }
 0x190   : > { %1945 = vmatpush.msra.mxu0 %v15603_v45  ;;  %2112 = vmatpush.msra.mxu3 %v2111_v17  ;;  %v2129_v17 = vand.u32 4294901760, %v2128_v54  ;;  %v2151_v45 = vand.u32 4294901760, %v9490_v21  ;;  %v2135_v54 = vand.u32 4294901760, %v2134_v38  ;;  %v2157_v46 = vand.u32 4294901760, %v9508_v6 }
 0x191   : > { %7023 = vmatpush.msk.msra.mxu1 %vm15604_vm8, %v15355_v20  ;;  %7038 = vmatpush.msk.msra.mxu2 %vm376_vm9, %v15355_v20  ;;  %vm15606_vm8 = vcmp.eq.s32.totalorder %v8150_v50, %v8785_v37  ;;  %v2141_v38 = vand.u32 4294901760, %v2140_v28 }
 0x192   : > { %1949 = vmatpush.msra.mxu0 %v15605_v63  ;;  %2118 = vmatpush.msra.mxu3 %v2117_v2  ;;  %v15607_v2 = vand.u32 4294901760, %v8965_v24  ;;  %v2146_v63 = vsub.f32 %v9468_v59, %v2145_v29  ;;  %v9556_v24 = vsub.f32 %v6634_v39, %v6634_v39  ;;  %v2152_v60 = vsub.f32 %v9490_v21, %v2151_v45 }
 0x193   : > { %7024 = vmatpush.msk.msra.mxu1 %vm15606_vm8, %v15355_v20  ;;  %7039 = vmatpush.msk.msra.mxu2 %vm360_vm12, %v15355_v20  ;;  %vm15608_vm8 = vcmp.eq.s32.totalorder %v8153_v51, %v8785_v37  ;;  %v2163_v39 = vand.u32 4294901760, %v9540_v57  ;;  %v2158_v28 = vsub.f32 %v9508_v6, %v2157_v46 }
 0x194   : > { %1953 = vmatpush.msra.mxu0 %v15607_v2  ;;  %2124 = vmatpush.msra.mxu3 %v2123_v40  ;;  %v15609_v40 = vand.u32 4294901760, %v8984_v3  ;;  %v15611_v3 = vand.u32 4294901760, %v9013_v22  ;;  %v2169_v2 = vand.u32 4294901760, %v9556_v24  ;;  %v15612_v22 = vand.u32 4294901760, %v9032_v27 }
 0x195   : > { %7025 = vmatpush.msk.msra.mxu1 %vm15608_vm8, %v15355_v20  ;;  %7040 = vmatpush.msk.msra.mxu2 %vm344_vm0, %v15355_v20  ;;  %vm15610_vm8 = vcmp.eq.s32.totalorder %v8156_v52, %v8785_v37  ;;  %v2159_v27 = vand.u32 4294901760, %v2158_v28  ;;  %v15617_v37 = vand.u32 4294901760, %v9101_v16  ;;  %v15621_v16 = vand.u32 4294901760, %v9238_v55 }
 0x196   : > { %1957 = vmatpush.msra.mxu0 %v15609_v40  ;;  %2130 = vmatpush.msra.mxu3 %v2129_v17  ;;  %v2147_v17 = vand.u32 4294901760, %v2146_v63  ;;  %v2164_v63 = vsub.f32 %v9540_v57, %v2163_v39  ;;  %v15613_v40 = vand.u32 4294901760, %v9050_v30  ;;  %v15623_v28 = vand.u32 4294901760, %v9144_v53 }
 0x197   : > { %7026 = vmatpush.msk.msra.mxu1 %vm15610_vm8, %v15355_v20  ;;  %7041 = vmatpush.msk.msra.mxu2 %vm328_vm13, %v15355_v20  ;;  %v15629_v53 = vand.u32 4294901760, %v9286_v5 }
 0x198   : > { %1961 = vmatpush.msra.mxu0 %v15611_v3  ;;  %2136 = vmatpush.msra.mxu3 %v2135_v54  ;;  %v2153_v54 = vand.u32 4294901760, %v2152_v60  ;;  %v15614_v60 = vand.u32 4294901760, %v9068_v32  ;;  %v2165_v30 = vand.u32 4294901760, %v2164_v63  ;;  %v15615_v3 = vand.u32 4294901760, %v9086_v1 }
 0x199   : > { %7027 = vmatpush.msk.msra.mxu1 %vm295_vm3, %v15355_v20  ;;  %7042 = vmatpush.msk.msra.mxu2 %vm312_vm5, %v15355_v20  ;;  %vm15616_vm3 = vcmp.eq.s32.totalorder %v7994_v8, %v9125_v43  ;;  %v15619_v1 = vand.u32 4294901760, %v9225_v36  ;;  %v15634_v63 = vand.u32 4294901760, %v9354_v44 }
 0x19a   : > { %1965 = vmatpush.msra.mxu0 %v15612_v22  ;;  %2142 = vmatpush.msra.mxu3 %v2141_v38  ;;  %v2170_v38 = vsub.f32 %v9556_v24, %v2169_v2  ;;  %v15625_v22 = vand.u32 4294901760, %v9268_v18 }
 0x19b   : > { %7028 = vmatpush.msk.msra.mxu1 %vm279_vm15, %v15355_v20  ;;  %7043 = vmatpush.msk.msra.mxu2 %vm296_vm11, %v15355_v20  ;;  %vm15618_vm15 = vcmp.eq.s32.totalorder %v7997_v9, %v9125_v43 }
 0x19c   : > { %1969 = vmatpush.msra.mxu0 %v15613_v40  ;;  %2148 = vmatpush.msra.mxu3 %v2147_v17  ;;  %v2171_v32 = vand.u32 4294901760, %v2170_v38  ;;  %v15620_v17 = vand.u32 4294901760, %v9122_v19  ;;  %v9662_v19 = vperm.slane %v7986_v4, 4  ;;  %vm15626_vm8 = vmmov %vm15618_vm15  ;;  %v15635_v40 = vand.u32 4294901760, %v9366_v42 }
 0x19d   : > { %7029 = vmatpush.msk.msra.mxu1 %vm263_vm10, %v15355_v20  ;;  %7044 = vmatpush.msk.msra.mxu2 %vm280_vm6, %v15355_v20  ;;  %vm15622_vm10 = vmmov %vm15616_vm3  ;;  %v15636_v38 = vand.u32 4294901760, %v9427_v58 }
 0x19e   : > { %1973 = vmatpush.msra.mxu0 %v15614_v60  ;;  %2154 = vmatpush.msra.mxu3 %v2153_v54  ;;  %v15627_v54 = vand.u32 4294901760, %v9159_v61  ;;  %v15631_v61 = vand.u32 4294901760, %v9294_v41 }
 0x19f   : > { %7030 = vmatpush.msk.msra.mxu1 %vm247_vm14, %v15355_v20  ;;  %7045 = vmatpush.msk.msra.mxu2 %vm264_vm1, %v15355_v20  ;;  %vm15624_vm14 = vcmp.eq.s32.totalorder %v8003_v11, %v9125_v43 }
 0x1a0   : > { %1977 = vmatpush.msra.mxu0 %v15615_v3  ;;  %2160 = vmatpush.msra.mxu3 %v2159_v27 }
 0x1a1   : > { %2032 = vmatmul.f32.vlgmr.msra.gmra.mxu1 %v8738_v47  ;;  %7046 = vmatpush.msk.msra.mxu2 %vm248_vm2, %v15355_v20 }
 0x1a2   : > { %7047 = vmatpush.msk.msrb.mxu1 %vm15616_vm3, %v15355_v20  ;;  %1981 = vmatpush.msra.mxu0 %v15617_v37  ;;  %vm15628_vm3 = vcmp.eq.s32.totalorder %v8006_v12, %v9125_v43 }
 0x1a3   : > { %2166 = vmatpush.msra.mxu3 %v2165_v30  ;;  %2073 = vmatmul.f32.vlgmr.msra.gmra.mxu2 %v8771_v33  ;;  %v15637_v30 = vand.u32 4294901760, %v9446_v56 }
 0x1a4   : > { %7048 = vmatpush.msk.msrb.mxu1 %vm15618_vm15, %v15355_v20  ;;  %2274 = vmatpush.msrb.mxu2 %v15619_v1  ;;  %vm15630_vm15 = vcmp.eq.s32.totalorder %v8009_v13, %v9125_v43 }
 0x1a5   : > { %1985 = vmatpush.msra.mxu0 %v15620_v17  ;;  %2172 = vmatpush.msra.mxu3 %v2171_v32 }
 0x1a6   : > { %2174 = vmatmul.f32.vlgmr.msra.gmra.mxu3 %v8738_v47  ;;  %7049 = vmatpush.msk.msrb.mxu1 %vm456_vm7, %v15355_v20 }
 0x1a7   : > { %2278 = vmatpush.msrb.mxu2 %v15621_v16  ;;  %7063 = vmatpush.msk.msrb.mxu3 %vm15622_vm10, %v15355_v20  ;;  %vm489_vm10 = vcmp.eq.s32.totalorder %v7994_v8, %v9662_v19 }
 0x1a8   : > { %1989 = vmatpush.msra.mxu0 %v15623_v28  ;;  %7050 = vmatpush.msk.msrb.mxu1 %vm15624_vm14, %v15355_v20 }
 0x1a9   : > { %2282 = vmatpush.msrb.mxu2 %v15625_v22  ;;  %7064 = vmatpush.msk.msrb.mxu3 %vm15626_vm8, %v15355_v20  ;;  %vm15633_vm8 = vmmov %vm15628_vm3 }
 0x1aa   : > { %1993 = vmatpush.msra.mxu0 %v15627_v54  ;;  %7051 = vmatpush.msk.msrb.mxu1 %vm15628_vm3, %v15355_v20  ;;  %vm15322_vm3 = vcmp.eq.s32.totalorder %v8000_v10, %v9662_v19 }
 0x1ab   : > { %1995 = vmatmul.f32.vlgmr.msra.gmra.mxu0 %v8738_v47  ;;  %2286 = vmatpush.msrb.mxu2 %v15629_v53 }
 0x1ac   : > { %2180 = vmatpush.msrb.mxu0 %v9225_v36  ;;  %7065 = vmatpush.msk.msrb.mxu3 %vm456_vm7, %v15355_v20  ;;  %v15632_v36 = vand.u32 4294901760, %v9329_v23  ;;  %vm473_vm7 = vcmp.eq.s32.totalorder %v7997_v9, %v9662_v19 }
 0x1ad   : > { %7052 = vmatpush.msk.msrb.mxu1 %vm15630_vm15, %v15355_v20  ;;  %2290 = vmatpush.msrb.mxu2 %v15631_v61 }
 0x1ae   : > { %2183 = vmatpush.msrb.mxu0 %v9238_v55  ;;  %7066 = vmatpush.msk.msrb.mxu3 %vm15624_vm14, %v15355_v20  ;;  %v6875_v55 = vsel %vm489_vm10, 1.0, %v15580_v25  ;;  %vm15324_vm14 = vcmp.eq.s32.totalorder %v8003_v11, %v9662_v19 }
 0x1af   : > { %7053 = vmatpush.msk.msrb.mxu1 %vm392_vm4, %v15355_v20  ;;  %2294 = vmatpush.msrb.mxu2 %v15632_v36  ;;  %v9737_v27 = vsub.f32 %v6875_v55, %v6875_v55 }
 0x1b0   : > { %2186 = vmatpush.msrb.mxu0 %v9268_v18  ;;  %7067 = vmatpush.msk.msrb.mxu3 %vm15633_vm8, %v15355_v20  ;;  %v6859_v18 = vsel %vm473_vm7, 1.0, %v15580_v25  ;;  %vm265_vm8 = vcmp.eq.s32.totalorder %v8250_v35, %v9662_v19 }
 0x1b1   : > { %7054 = vmatpush.msk.msrb.mxu1 %vm376_vm9, %v15355_v20  ;;  %2298 = vmatpush.msrb.mxu2 %v15634_v63 }
 0x1b2   : > { %2189 = vmatpush.msrb.mxu0 %v9286_v5  ;;  %7068 = vmatpush.msk.msrb.mxu3 %vm15630_vm15, %v15355_v20  ;;  %v6843_v5 = vsel %vm15322_vm3, 1.0, %v15580_v25  ;;  %vm249_vm15 = vcmp.eq.s32.totalorder %v7991_v7, %v9662_v19 }
 0x1b3   : > { %7055 = vmatpush.msk.msrb.mxu1 %vm360_vm12, %v15355_v20  ;;  %2302 = vmatpush.msrb.mxu2 %v15635_v40  ;;  %v9772_v60 = vsub.f32 %v6843_v5, %v6843_v5 }
 0x1b4   : > { %2192 = vmatpush.msrb.mxu0 %v9294_v41  ;;  %7069 = vmatpush.msk.msrb.mxu3 %vm392_vm4, %v15355_v20  ;;  %v9756_v41 = vsub.f32 %v6859_v18, %v6859_v18  ;;  %vm425_vm4 = vcmp.eq.s32.totalorder %v8006_v12, %v9662_v19 }
 0x1b5   : > { %7056 = vmatpush.msk.msrb.mxu1 %vm344_vm0, %v15355_v20  ;;  %2306 = vmatpush.msrb.mxu2 %v2127_v62  ;;  %v2420_v62 = vand.u32 4294901760, %v9737_v27  ;;  %v15346_v37 = vand.u32 4294901760, %v9772_v60 }
 0x1b6   : > { %2195 = vmatpush.msrb.mxu0 %v9329_v23  ;;  %7070 = vmatpush.msk.msrb.mxu3 %vm376_vm9, %v15355_v20  ;;  %v6827_v23 = vsel %vm15324_vm14, 1.0, %v15580_v25  ;;  %vm15326_vm9 = vcmp.eq.s32.totalorder %v8009_v13, %v9662_v19  ;;  %v15352_v3 = vand.u32 4294901760, %v9756_v41 }
 0x1b7   : > { %7057 = vmatpush.msk.msrb.mxu1 %vm328_vm13, %v15355_v20  ;;  %2310 = vmatpush.msrb.mxu2 %v15636_v38  ;;  %v9801_v32 = vsub.f32 %v6827_v23, %v6827_v23  ;;  %v6795_v1 = vsel %vm15326_vm9, 1.0, %v15580_v25  ;;  %v1152_v22 = vpop.f32.mrf.mxu1 }
 0x1b8   : > { %2198 = vmatpush.msrb.mxu0 %v9354_v44  ;;  %7071 = vmatpush.msk.msrb.mxu3 %vm360_vm12, %v15355_v20  ;;  %v6811_v44 = vsel %vm425_vm4, 1.0, %v15580_v25  ;;  %vm15329_vm12 = vcmp.eq.s32.totalorder %v8012_v14, %v9662_v19  ;;  %v9847_v16 = vsub.f32 %v6795_v1, %v6795_v1 }
 0x1b9   : > { %7058 = vmatpush.msk.msrb.mxu1 %vm312_vm5, %v15355_v20  ;;  %2314 = vmatpush.msrb.mxu2 %v15637_v30  ;;  %v9824_v17 = vsub.f32 %v6811_v44, %v6811_v44 }
 0x1ba   : > { %2201 = vmatpush.msrb.mxu0 %v9366_v42  ;;  %7072 = vmatpush.msk.msrb.mxu3 %vm344_vm0, %v15355_v20  ;;  %v2421_v42 = vsub.f32 %v9737_v27, %v2420_v62  ;;  %vm15333_vm0 = vcmp.eq.s32.totalorder %v8150_v50, %v9662_v19 }
 0x1bb   : > { %7059 = vmatpush.msk.msrb.mxu1 %vm296_vm11, %v15355_v20  ;;  %2318 = vmatpush.msrb.mxu2 %v2145_v29  ;;  %v2427_v29 = vsub.f32 %v9756_v41, %v15352_v3  ;;  %v15344_v53 = vand.u32 4294901760, %v9824_v17 }
 0x1bc   : > { %2204 = vmatpush.msrb.mxu0 %v9403_v0  ;;  %7073 = vmatpush.msk.msrb.mxu3 %vm328_vm13, %v15355_v20  ;;  %v6779_v0 = vsel %vm15329_vm12, 1.0, %v15580_v25  ;;  %vm15330_vm13 = vcmp.eq.s32.totalorder %v8015_v15, %v9662_v19  ;;  %v2422_v28 = vand.u32 4294901760, %v2421_v42 }
 0x1bd   : > { %7060 = vmatpush.msk.msrb.mxu1 %vm280_vm6, %v15355_v20  ;;  %2322 = vmatpush.msrb.mxu2 %v2151_v45  ;;  %v15345_v45 = vand.u32 4294901760, %v9801_v32  ;;  %v9866_v61 = vsub.f32 %v6779_v0, %v6779_v0  ;;  %v6763_v36 = vsel %vm15330_vm13, 1.0, %v15580_v25  ;;  %v2445_v23 = vsub.f32 %v9824_v17, %v15344_v53 }
 0x1be   : > { %2207 = vmatpush.msrb.mxu0 %v9427_v58  ;;  %7074 = vmatpush.msk.msrb.mxu3 %vm312_vm5, %v15355_v20  ;;  %v2433_v58 = vsub.f32 %v9772_v60, %v15346_v37  ;;  %vm15331_vm5 = vcmp.eq.s32.totalorder %v8072_v26, %v9662_v19  ;;  %v9896_v38 = vsub.f32 %v6763_v36, %v6763_v36 }
 0x1bf   : > { %7061 = vmatpush.msk.msrb.mxu1 %vm264_vm1, %v15355_v20  ;;  %2326 = vmatpush.msrb.mxu2 %v2157_v46  ;;  %v1051_v54 = vpop.f32.mrf.mxu0  ;;  %v1206_v55 = vpop.f32.mrf.mxu2  ;;  %v2439_v18 = vsub.f32 %v9801_v32, %v15345_v45  ;;  %v6747_v5 = vsel %vm15331_vm5, 1.0, %v15580_v25  ;;  %v15341_v44 = vand.u32 4294901760, %v9866_v61 }
 0x1c0   : > { %2210 = vmatpush.msrb.mxu0 %v9446_v56  ;;  %7075 = vmatpush.msk.msrb.mxu3 %vm296_vm11, %v15355_v20  ;;  %v1153_v46 = vadd.f32 %v1152_v22, %v1051_v54  ;;  %v2428_v56 = vand.u32 4294901760, %v2427_v29  ;;  %vm15336_vm11 = vcmp.eq.s32.totalorder %v8153_v51, %v9662_v19  ;;  %v15339_v0 = vand.u32 4294901760, %v9896_v38  ;;  %v1351_v36 = vpop.f32.mrf.mxu1 }
 0x1c1   : > { %7062 = vmatpush.msk.msrb.mxu1 %vm248_vm2, %v15355_v20  ;;  %2330 = vmatpush.msrb.mxu2 %v2163_v39  ;;  %v1245_v63 = vpop.f32.mrf.mxu3  ;;  %v15343_v39 = vand.u32 4294901760, %v9847_v16  ;;  %v2440_v42 = vand.u32 4294901760, %v2439_v18  ;;  %v6715_v29 = vsel %vm15336_vm11, 1.0, %v15580_v25  ;;  %v2446_v22 = vand.u32 4294901760, %v2445_v23 }
 0x1c2   : > { %2213 = vmatpush.msrb.mxu0 %v9468_v59  ;;  %7076 = vmatpush.msk.msrb.mxu3 %vm280_vm6, %v15355_v20  ;;  %v1207_v40 = vadd.f32 %v1206_v55, %v1153_v46  ;;  %v2434_v59 = vand.u32 4294901760, %v2433_v58  ;;  %vm15342_vm6 = vcmp.eq.s32.totalorder %v8156_v52, %v9662_v19  ;;  %v9950_v46 = vsub.f32 %v6715_v29, %v6715_v29 }
 0x1c3   : > { %2267 = vmatmul.f32.vlgmr.msrb.gmra.mxu1 %v8750_v49  ;;  %2334 = vmatpush.msrb.mxu2 %v2169_v2  ;;  %v6731_v2 = vsel %vm15333_vm0, 1.0, %v15580_v25  ;;  %v2451_v1 = vsub.f32 %v9847_v16, %v15343_v39  ;;  %v6699_v43 = vsel %vm15342_vm6, 1.0, %v15580_v25 }
 0x1c4   : > { %2423 = vmatpush.msra.mxu1 %v2422_v28  ;;  %2216 = vmatpush.msrb.mxu0 %v9490_v21  ;;  %v1246_v30 = vadd.f32 %v1245_v63, %v1207_v40  ;;  %v9914_v21 = vsub.f32 %v6747_v5, %v6747_v5  ;;  %v9932_v28 = vsub.f32 %v6731_v2, %v6731_v2 }
 0x1c5   : > { %7077 = vmatpush.msk.msrb.mxu3 %vm264_vm1, %v15355_v20  ;;  %2336 = vmatmul.f32.vlgmr.msrb.gmra.mxu2 %v8738_v47  ;;  %vm297_vm1 = vcmp.eq.s32.totalorder %v8234_v31, %v9662_v19 }
 0x1c6   : > { %2429 = vmatpush.msra.mxu1 %v2428_v56  ;;  %2521 = vmatpush.msra.mxu2 %v9737_v27  ;;  %v15338_v58 = vand.u32 4294901760, %v9914_v21  ;;  %v2452_v56 = vand.u32 4294901760, %v2451_v1  ;;  %v6683_v63 = vsel %vm297_vm1, 1.0, %v15580_v25  ;;  %v15335_v40 = vand.u32 4294901760, %v9932_v28 }
 0x1c7   : > { %2219 = vmatpush.msrb.mxu0 %v9508_v6  ;;  %7078 = vmatpush.msk.msrb.mxu3 %vm248_vm2, %v15355_v20  ;;  %v2457_v6 = vsub.f32 %v9866_v61, %v15341_v44  ;;  %vm281_vm2 = vcmp.eq.s32.totalorder %v8247_v34, %v9662_v19  ;;  %v9987_v29 = vsub.f32 %v6683_v63, %v6683_v63 }
 0x1c8   : > { %2373 = vmatmul.f32.vlgmr.msrb.gmra.mxu3 %v8738_v47  ;;  %2435 = vmatpush.msra.mxu1 %v2434_v59  ;;  %v1392_v18 = vpop.f32.mrf.mxu2  ;;  %v9968_v59 = vsub.f32 %v6699_v43, %v6699_v43  ;;  %v2469_v1 = vsub.f32 %v9914_v21, %v15338_v58  ;;  %v2475_v43 = vsub.f32 %v9932_v28, %v15335_v40 }
 0x1c9   : > { %2524 = vmatpush.msra.mxu2 %v9756_v41  ;;  %7095 = vmatpush.msk.msra.mxu3 %vm489_vm10, %v15355_v20  ;;  %v1314_v54 = vpop.f32.mrf.mxu0  ;;  %v2458_v23 = vand.u32 4294901760, %v2457_v6 }
 0x1ca   : > { %2222 = vmatpush.msrb.mxu0 %v9540_v57  ;;  %2441 = vmatpush.msra.mxu1 %v2440_v42  ;;  %v1315_v55 = vadd.f32 %v1314_v54, %v1246_v30  ;;  %v2463_v57 = vsub.f32 %v9896_v38, %v15339_v0  ;;  %v6667_v42 = vsel %vm281_vm2, 1.0, %v15580_v25  ;;  %v15328_v54 = vand.u32 4294901760, %v9968_v59 }
 0x1cb   : > { %2527 = vmatpush.msra.mxu2 %v9772_v60  ;;  %7096 = vmatpush.msk.msra.mxu3 %vm473_vm7, %v15355_v20  ;;  %v1493_v5 = vpop.f32.mrf.mxu3  ;;  %v2470_v63 = vand.u32 4294901760, %v2469_v1 }
 0x1cc   : > { %2225 = vmatpush.msrb.mxu0 %v9556_v24  ;;  %2447 = vmatpush.msra.mxu1 %v2446_v22  ;;  %v9973_v30 = vadd.f32 %v1351_v36, %v1315_v55  ;;  %v9975_v2 = vadd.f32 %v1493_v5, %v1392_v18  ;;  %v15334_v24 = vand.u32 4294901760, %v9950_v46  ;;  %v6651_v22 = vsel %vm265_vm8, 1.0, %v15580_v25 }
 0x1cd   : > { %2228 = vmatmul.f32.vlgmr.msrb.gmra.mxu0 %v8741_v48  ;;  %2530 = vmatpush.msra.mxu2 %v9801_v32  ;;  %v2464_v6 = vand.u32 4294901760, %v2463_v57  ;;  %v10008_v36 = vsub.f32 %v6667_v42, %v6667_v42  ;;  %v10011_v55 = vperm.slane %v7986_v4, 5  ;;  %v15323_v18 = vand.u32 4294901760, %v9987_v29 }
 0x1ce   : > { %7079 = vmatpush.msk.msra.mxu0 %vm489_vm10, %v15355_v20  ;;  %7097 = vmatpush.msk.msra.mxu3 %vm15322_vm3, %v15355_v20  ;;  %v2481_v57 = vsub.f32 %v9950_v46, %v15334_v24  ;;  %v10030_v5 = vsub.f32 %v6651_v22, %v6651_v22  ;;  %v2487_v42 = vsub.f32 %v9968_v59, %v15328_v54 }
 0x1cf   : > { %2453 = vmatpush.msra.mxu1 %v2452_v56  ;;  %2533 = vmatpush.msra.mxu2 %v9824_v17  ;;  %v6635_v56 = vsel %vm249_vm15, 1.0, %v15580_v25  ;;  %v15325_v1 = vand.u32 4294901760, %v10008_v36 }
 0x1d0   : > { %7080 = vmatpush.msk.msra.mxu0 %vm473_vm7, %v15355_v20  ;;  %7098 = vmatpush.msk.msra.mxu3 %vm15324_vm14, %v15355_v20  ;;  %v10045_v22 = vsub.f32 %v6635_v56, %v6635_v56  ;;  %v15327_v56 = vand.u32 4294901760, %v10030_v5 }
 0x1d1   : > { %2459 = vmatpush.msra.mxu1 %v2458_v23  ;;  %2536 = vmatpush.msra.mxu2 %v9847_v16  ;;  %v2476_v23 = vand.u32 4294901760, %v2475_v43  ;;  %v2493_v43 = vsub.f32 %v9987_v29, %v15323_v18 }
 0x1d2   : > { %7081 = vmatpush.msk.msra.mxu0 %vm15322_vm3, %v15355_v20  ;;  %7099 = vmatpush.msk.msra.mxu3 %vm425_vm4, %v15355_v20  ;;  %vm15348_vm3 = vcmp.eq.s32.totalorder %v7994_v8, %v10011_v55  ;;  %v15332_v18 = vand.u32 4294901760, %v10045_v22 }
 0x1d3   : > { %2465 = vmatpush.msra.mxu1 %v2464_v6  ;;  %2539 = vmatpush.msra.mxu2 %v9866_v61  ;;  %v2482_v6 = vand.u32 4294901760, %v2481_v57  ;;  %v2499_v57 = vsub.f32 %v10008_v36, %v15325_v1  ;;  %v2505_v1 = vsub.f32 %v10030_v5, %v15327_v56 }
 0x1d4   : > { %7082 = vmatpush.msk.msra.mxu0 %vm15324_vm14, %v15355_v20  ;;  %7100 = vmatpush.msk.msra.mxu3 %vm15326_vm9, %v15355_v20  ;;  %vm15350_vm14 = vcmp.eq.s32.totalorder %v7997_v9, %v10011_v55  ;;  %v2511_v56 = vsub.f32 %v10045_v22, %v15332_v18 }
 0x1d5   : > { %2471 = vmatpush.msra.mxu1 %v2470_v63  ;;  %2542 = vmatpush.msra.mxu2 %v9896_v38  ;;  %v2488_v63 = vand.u32 4294901760, %v2487_v42  ;;  %v2494_v42 = vand.u32 4294901760, %v2493_v43  ;;  %v2500_v43 = vand.u32 4294901760, %v2499_v57 }
 0x1d6   : > { %7083 = vmatpush.msk.msra.mxu0 %vm425_vm4, %v15355_v20  ;;  %7101 = vmatpush.msk.msra.mxu3 %vm15329_vm12, %v15355_v20 }
 0x1d7   : > { %2477 = vmatpush.msra.mxu1 %v2476_v23  ;;  %2545 = vmatpush.msra.mxu2 %v9914_v21  ;;  %v6876_v23 = vsel %vm15348_vm3, 1.0, %v15580_v25 }
 0x1d8   : > { %7084 = vmatpush.msk.msra.mxu0 %vm15326_vm9, %v15355_v20  ;;  %7102 = vmatpush.msk.msra.mxu3 %vm15330_vm13, %v15355_v20  ;;  %vm15353_vm9 = vcmp.eq.s32.totalorder %v8000_v10, %v10011_v55  ;;  %v10111_v54 = vsub.f32 %v6876_v23, %v6876_v23 }
 0x1d9   : > { %2483 = vmatpush.msra.mxu1 %v2482_v6  ;;  %2548 = vmatpush.msra.mxu2 %v9932_v28  ;;  %v6860_v6 = vsel %vm15350_vm14, 1.0, %v15580_v25  ;;  %v6844_v23 = vsel %vm15353_vm9, 1.0, %v15580_v25 }
 0x1da   : > { %7085 = vmatpush.msk.msra.mxu0 %vm15329_vm12, %v15355_v20  ;;  %7103 = vmatpush.msk.msra.mxu3 %vm15331_vm5, %v15355_v20  ;;  %vm442_vm12 = vcmp.eq.s32.totalorder %v8003_v11, %v10011_v55  ;;  %v10124_v57 = vsub.f32 %v6860_v6, %v6860_v6  ;;  %v1586_v0 = vpop.f32.mrf.mxu1 }
 0x1db   : > { %2489 = vmatpush.msra.mxu1 %v2488_v63  ;;  %2551 = vmatpush.msra.mxu2 %v9950_v46  ;;  %v2506_v63 = vand.u32 4294901760, %v2505_v1  ;;  %v2512_v1 = vand.u32 4294901760, %v2511_v56  ;;  %v6828_v6 = vsel %vm442_vm12, 1.0, %v15580_v25 }
 0x1dc   : > { %7086 = vmatpush.msk.msra.mxu0 %vm15330_vm13, %v15355_v20  ;;  %7104 = vmatpush.msk.msra.mxu3 %vm15333_vm0, %v15355_v20  ;;  %vm15360_vm13 = vcmp.eq.s32.totalorder %v8006_v12, %v10011_v55  ;;  %v15340_v18 = vand.u32 4294901760, %v10124_v57 }
 0x1dd   : > { %2495 = vmatpush.msra.mxu1 %v2494_v42  ;;  %2554 = vmatpush.msra.mxu2 %v9968_v59  ;;  %v15337_v42 = vand.u32 4294901760, %v10111_v54  ;;  %v6812_v56 = vsel %vm15360_vm13, 1.0, %v15580_v25 }
 0x1de   : > { %7087 = vmatpush.msk.msra.mxu0 %vm15331_vm5, %v15355_v20  ;;  %7105 = vmatpush.msk.msra.mxu3 %vm15336_vm11, %v15355_v20  ;;  %vm15361_vm5 = vcmp.eq.s32.totalorder %v8009_v13, %v10011_v55  ;;  %v10180_v24 = vsub.f32 %v6812_v56, %v6812_v56  ;;  %v2768_v56 = vsub.f32 %v10124_v57, %v15340_v18 }
 0x1df   : > { %2501 = vmatpush.msra.mxu1 %v2500_v43  ;;  %2557 = vmatpush.msra.mxu2 %v9987_v29  ;;  %v10154_v43 = vsub.f32 %v6844_v23, %v6844_v23  ;;  %v10172_v23 = vsub.f32 %v6828_v6, %v6828_v6  ;;  %v6796_v40 = vsel %vm15361_vm5, 1.0, %v15580_v25 }
 0x1e0   : > { %7088 = vmatpush.msk.msra.mxu0 %vm15333_vm0, %v15355_v20  ;;  %7106 = vmatpush.msk.msra.mxu3 %vm15342_vm6, %v15355_v20  ;;  %vm394_vm0 = vcmp.eq.s32.totalorder %v8012_v14, %v10011_v55  ;;  %v10216_v44 = vsub.f32 %v6796_v40, %v6796_v40  ;;  %v15351_v40 = vand.u32 4294901760, %v10180_v24 }
 0x1e1   : > { %2507 = vmatpush.msra.mxu1 %v2506_v63  ;;  %2560 = vmatpush.msra.mxu2 %v10008_v36  ;;  %v2762_v63 = vsub.f32 %v10111_v54, %v15337_v42  ;;  %v6780_v58 = vsel %vm394_vm0, 1.0, %v15580_v25  ;;  %v15349_v18 = vand.u32 4294901760, %v10172_v23 }
 0x1e2   : > { %7089 = vmatpush.msk.msra.mxu0 %vm15336_vm11, %v15355_v20  ;;  %7107 = vmatpush.msk.msra.mxu3 %vm297_vm1, %v15355_v20  ;;  %vm378_vm11 = vcmp.eq.s32.totalorder %v8015_v15, %v10011_v55  ;;  %v1655_v45 = vpop.f32.mrf.mxu2  ;;  %v10241_v37 = vsub.f32 %v6780_v58, %v6780_v58 }
 0x1e3   : > { %2513 = vmatpush.msra.mxu1 %v2512_v1  ;;  %2563 = vmatpush.msra.mxu2 %v10030_v5  ;;  %v15347_v1 = vand.u32 4294901760, %v10154_v43 }
 0x1e4   : > { %7090 = vmatpush.msk.msra.mxu0 %vm15342_vm6, %v15355_v20  ;;  %7108 = vmatpush.msk.msra.mxu3 %vm281_vm2, %v15355_v20  ;;  %v1547_v6 = vpop.f32.mrf.mxu0  ;;  %vm362_vm6 = vcmp.eq.s32.totalorder %v8072_v26, %v10011_v55 }
 0x1e5   : > { %2515 = vmatmul.f32.vlgmr.msra.gmra.mxu1 %v8738_v47  ;;  %2566 = vmatpush.msra.mxu2 %v10045_v22  ;;  %v1548_v42 = vadd.f32 %v1547_v6, %v9975_v2  ;;  %v6764_v2 = vsel %vm378_vm11, 1.0, %v15580_v25  ;;  %v2763_v6 = vand.u32 4294901760, %v2762_v63  ;;  %v2774_v53 = vsub.f32 %v10154_v43, %v15347_v1 }
 0x1e6   : > { %7111 = vmatpush.msk.msrb.mxu1 %vm489_vm10, %v15355_v20  ;;  %7091 = vmatpush.msk.msra.mxu0 %vm297_vm1, %v15355_v20  ;;  %vm346_vm10 = vcmp.eq.s32.totalorder %v8150_v50, %v10011_v55  ;;  %v10253_v63 = vsub.f32 %v6764_v2, %v6764_v2  ;;  %v6748_v58 = vsel %vm362_vm6, 1.0, %v15580_v25  ;;  %v2780_v1 = vsub.f32 %v10172_v23, %v15349_v18 }
 0x1e7   : > { %7109 = vmatpush.msk.msra.mxu3 %vm265_vm8, %v15355_v20  ;;  %2569 = vmatmul.f32.vlgmr.msra.gmra.mxu2 %v8741_v48  ;;  %v1587_v39 = vadd.f32 %v1586_v0, %v1548_v42  ;;  %v2769_v0 = vand.u32 4294901760, %v2768_v56  ;;  %v1692_v56 = vpop.f32.mrf.mxu3  ;;  %v2786_v2 = vsub.f32 %v10180_v24, %v15351_v40  ;;  %v6732_v18 = vsel %vm346_vm10, 1.0, %v15580_v25 }
 0x1e8   : > { %7112 = vmatpush.msk.msrb.mxu1 %vm473_vm7, %v15355_v20  ;;  %7127 = vmatpush.msk.msrb.mxu2 %vm15348_vm3, %v15355_v20  ;;  %vm15638_vm7 = vcmp.eq.s32.totalorder %v8000_v10, %v9662_v19  ;;  %vm330_vm3 = vcmp.eq.s32.totalorder %v8153_v51, %v10011_v55  ;;  %v15644_v27 = vand.u32 4294901760, %v10253_v63 }
 0x1e9   : > { %7092 = vmatpush.msk.msra.mxu0 %vm281_vm2, %v15355_v20  ;;  %7110 = vmatpush.msk.msra.mxu3 %vm249_vm15, %v15355_v20  ;;  %v1656_v42 = vadd.f32 %v1655_v45, %v1587_v39  ;;  %v15354_v45 = vand.u32 4294901760, %v10216_v44 }
 0x1ea   : > { %2608 = vmatmul.f32.vlgmr.msra.gmra.mxu3 %v8750_v49  ;;  %7113 = vmatpush.msk.msrb.mxu1 %vm15638_vm7, %v15355_v20  ;;  %vm15639_vm7 = vcmp.eq.s32.totalorder %v8003_v11, %v9662_v19 }
 0x1eb   : > { %7128 = vmatpush.msk.msrb.mxu2 %vm15350_vm14, %v15355_v20  ;;  %2764 = vmatpush.msrb.mxu3 %v2763_v6  ;;  %v1693_v39 = vadd.f32 %v1692_v56, %v1656_v42  ;;  %v2775_v6 = vand.u32 4294901760, %v2774_v53  ;;  %v15359_v42 = vand.u32 4294901760, %v10241_v37  ;;  %v10290_v56 = vsub.f32 %v6748_v58, %v6748_v58 }
 0x1ec   : > { %7093 = vmatpush.msk.msra.mxu0 %vm265_vm8, %v15355_v20  ;;  %7114 = vmatpush.msk.msrb.mxu1 %vm15639_vm7, %v15355_v20  ;;  %vm314_vm14 = vcmp.eq.s32.totalorder %v8156_v52, %v10011_v55  ;;  %v6716_v53 = vsel %vm330_vm3, 1.0, %v15580_v25  ;;  %v2781_v58 = vand.u32 4294901760, %v2780_v1  ;;  %vm298_vm7 = vcmp.eq.s32.totalorder %v8234_v31, %v10011_v55 }
 0x1ed   : > { %7129 = vmatpush.msk.msrb.mxu2 %vm15353_vm9, %v15355_v20  ;;  %2770 = vmatpush.msrb.mxu3 %v2769_v0  ;;  %v6485_v40 = vrot.slane %v1693_v39, 7  ;;  %v2792_v0 = vsub.f32 %v10216_v44, %v15354_v45  ;;  %v10314_v39 = vsub.f32 %v6732_v18, %v6732_v18  ;;  %vm15640_vm9 = vcmask 1040384  }
 0x1ee   : > { %7094 = vmatpush.msk.msra.mxu0 %vm249_vm15, %v15355_v20  ;;  %7115 = vmatpush.msk.msrb.mxu1 %vm425_vm4, %v15355_v20  ;;  %v2787_v1 = vand.u32 4294901760, %v2786_v2  ;;  %v6700_v18 = vsel %vm314_vm14, 1.0, %v15580_v25  ;;  %v2798_v45 = vsub.f32 %v10241_v37, %v15359_v42  ;;  %v10337_v48 = vsub.f32 %v6716_v53, %v6716_v53 }
 0x1ef   : > { %2414 = vmatmul.f32.vlgmr.msra.gmra.mxu0 %v8771_v33  ;;  %7130 = vmatpush.msk.msrb.mxu2 %vm442_vm12, %v15355_v20  ;;  %v10325_v3 = vsel %vm15640_vm9, %v9973_v30, %v6485_v40  ;;  %v2809_v20 = vand.u32 4294901760, %v10290_v56  ;;  %vm282_vm4 = vcmp.eq.s32.totalorder %v8247_v34, %v10011_v55  ;;  %v15642_v30 = vmov 1.0  }
 0x1f0   : > { %15641 = vst [vmem:[#allocation14_spill] sm:$0xff] %v10325_v3  ;;  %2615 = vmatpush.msrb.mxu0 %v2420_v62  ;;  %2776 = vmatpush.msrb.mxu3 %v2775_v6  ;;  %vm15643_vm9 = vcmp.eq.s32.totalorder %v8009_v13, %v9662_v19  ;;  %v2804_v62 = vsub.f32 %v10253_v63, %v15644_v27  ;;  %v6684_v40 = vsel %vm298_vm7, 1.0, %v15580_v25  ;;  %v15645_v2 = vand.u32 4294901760, %v9756_v41 }
 0x1f1   : > { %7116 = vmatpush.msk.msrb.mxu1 %vm15643_vm9, %v15642_v30  ;;  %7131 = vmatpush.msk.msrb.mxu2 %vm15360_vm13, %v15642_v30  ;;  %v2793_v6 = vand.u32 4294901760, %v2792_v0  ;;  %v15362_v53 = vand.u32 4294901760, %v10314_v39  ;;  %v10359_v42 = vsub.f32 %v6700_v18, %v6700_v18  ;;  %vm15646_vm9 = vcmp.eq.s32.totalorder %v8012_v14, %v9662_v19 }
 0x1f2   : > { %2619 = vmatpush.msrb.mxu0 %v15645_v2  ;;  %2782 = vmatpush.msrb.mxu3 %v2781_v58  ;;  %v6668_v41 = vsel %vm282_vm4, 1.0, %v15580_v25  ;;  %vm266_vm13 = vcmp.eq.s32.totalorder %v8250_v35, %v10011_v55  ;;  %v15647_v58 = vand.u32 4294901760, %v9772_v60  ;;  %v2799_v0 = vand.u32 4294901760, %v2798_v45 }
 0x1f3   : > { %7117 = vmatpush.msk.msrb.mxu1 %vm15646_vm9, %v15642_v30  ;;  %7132 = vmatpush.msk.msrb.mxu2 %vm15361_vm5, %v15642_v30  ;;  %v2810_v18 = vsub.f32 %v10290_v56, %v2809_v20  ;;  %v15363_v27 = vand.u32 4294901760, %v10337_v48  ;;  %v10381_v2 = vsub.f32 %v6684_v40, %v6684_v40  ;;  %vm15648_vm9 = vcmp.eq.s32.totalorder %v8015_v15, %v9662_v19 }
 0x1f4   : > { %2623 = vmatpush.msrb.mxu0 %v15647_v58  ;;  %2788 = vmatpush.msrb.mxu3 %v2787_v1  ;;  %v2805_v60 = vand.u32 4294901760, %v2804_v62  ;;  %vm250_vm5 = vcmp.eq.s32.totalorder %v7991_v7, %v10011_v55  ;;  %v15649_v45 = vand.u32 4294901760, %v9801_v32  ;;  %v2816_v1 = vsub.f32 %v10314_v39, %v15362_v53 }
 0x1f5   : > { %7118 = vmatpush.msk.msrb.mxu1 %vm15648_vm9, %v15642_v30  ;;  %7133 = vmatpush.msk.msrb.mxu2 %vm394_vm0, %v15642_v30  ;;  %v2827_v40 = vand.u32 4294901760, %v10359_v42  ;;  %v10399_v58 = vsub.f32 %v6668_v41, %v6668_v41  ;;  %v6652_v62 = vsel %vm266_vm13, 1.0, %v15580_v25  ;;  %vm15650_vm9 = vcmp.eq.s32.totalorder %v8072_v26, %v9662_v19 }
 0x1f6   : > { %2627 = vmatpush.msrb.mxu0 %v15649_v45  ;;  %2794 = vmatpush.msrb.mxu3 %v2793_v6  ;;  %v15651_v32 = vand.u32 4294901760, %v9824_v17  ;;  %v2811_v6 = vand.u32 4294901760, %v2810_v18  ;;  %v2822_v41 = vsub.f32 %v10337_v48, %v15363_v27  ;;  %v2833_v45 = vand.u32 4294901760, %v10381_v2 }
 0x1f7   : > { %7119 = vmatpush.msk.msrb.mxu1 %vm15650_vm9, %v15642_v30  ;;  %7134 = vmatpush.msk.msrb.mxu2 %vm378_vm11, %v15642_v30  ;;  %v6636_v53 = vsel %vm250_vm5, 1.0, %v15580_v25  ;;  %vm15652_vm9 = vcmp.eq.s32.totalorder %v8150_v50, %v9662_v19  ;;  %v10431_v17 = vsub.f32 %v6652_v62, %v6652_v62  ;;  %v2817_v18 = vand.u32 4294901760, %v2816_v1 }
 0x1f8   : > { %2631 = vmatpush.msrb.mxu0 %v15651_v32  ;;  %2800 = vmatpush.msrb.mxu3 %v2799_v0  ;;  %v15653_v0 = vand.u32 4294901760, %v9847_v16  ;;  %v2828_v32 = vsub.f32 %v10359_v42, %v2827_v40  ;;  %v2839_v27 = vand.u32 4294901760, %v10399_v58  ;;  %v10447_v16 = vsub.f32 %v6636_v53, %v6636_v53 }
 0x1f9   : > { %7120 = vmatpush.msk.msrb.mxu1 %vm15652_vm9, %v15642_v30  ;;  %7135 = vmatpush.msk.msrb.mxu2 %vm362_vm6, %v15642_v30  ;;  %vm15654_vm9 = vcmp.eq.s32.totalorder %v8153_v51, %v9662_v19  ;;  %v2823_v1 = vand.u32 4294901760, %v2822_v41  ;;  %v2834_v62 = vsub.f32 %v10381_v2, %v2833_v45  ;;  %v2845_v53 = vand.u32 4294901760, %v10431_v17 }
 0x1fa   : > { %2635 = vmatpush.msrb.mxu0 %v15653_v0  ;;  %2806 = vmatpush.msrb.mxu3 %v2805_v60  ;;  %v15655_v60 = vand.u32 4294901760, %v9866_v61  ;;  %v15657_v61 = vand.u32 4294901760, %v9896_v38  ;;  %v2840_v41 = vsub.f32 %v10399_v58, %v2839_v27  ;;  %v2851_v0 = vand.u32 4294901760, %v10447_v16 }
 0x1fb   : > { %7121 = vmatpush.msk.msrb.mxu1 %vm15654_vm9, %v15642_v30  ;;  %7136 = vmatpush.msk.msrb.mxu2 %vm346_vm10, %v15642_v30  ;;  %vm15656_vm9 = vcmp.eq.s32.totalorder %v8156_v52, %v9662_v19  ;;  %v15658_v38 = vand.u32 4294901760, %v9914_v21  ;;  %v15663_v19 = vand.u32 4294901760, %v9987_v29  ;;  %v15668_v29 = vand.u32 4294901760, %v10124_v57 }
 0x1fc   : > { %2639 = vmatpush.msrb.mxu0 %v15655_v60  ;;  %2812 = vmatpush.msrb.mxu3 %v2811_v6  ;;  %v2829_v6 = vand.u32 4294901760, %v2828_v32  ;;  %v2846_v32 = vsub.f32 %v10431_v17, %v2845_v53  ;;  %v15659_v60 = vand.u32 4294901760, %v9932_v28  ;;  %v2841_v21 = vand.u32 4294901760, %v2840_v41 }
 0x1fd   : > { %7122 = vmatpush.msk.msrb.mxu1 %vm15656_vm9, %v15642_v30  ;;  %7137 = vmatpush.msk.msrb.mxu2 %vm330_vm3, %v15642_v30  ;;  %v15670_v41 = vand.u32 4294901760, %v10030_v5  ;;  %v15675_v5 = vand.u32 4294901760, %v10172_v23 }
 0x1fe   : > { %2643 = vmatpush.msrb.mxu0 %v15657_v61  ;;  %2818 = vmatpush.msrb.mxu3 %v2817_v18  ;;  %v2835_v18 = vand.u32 4294901760, %v2834_v62  ;;  %v15660_v62 = vand.u32 4294901760, %v9950_v46  ;;  %v2847_v28 = vand.u32 4294901760, %v2846_v32  ;;  %v15661_v61 = vand.u32 4294901760, %v9968_v59 }
 0x1ff   : > { %7123 = vmatpush.msk.msrb.mxu1 %vm297_vm1, %v15642_v30  ;;  %7138 = vmatpush.msk.msrb.mxu2 %vm314_vm14, %v15642_v30  ;;  %vm15662_vm1 = vcmp.eq.s32.totalorder %v7994_v8, %v10011_v55  ;;  %v15665_v59 = vand.u32 4294901760, %v10111_v54  ;;  %v15683_v32 = vand.u32 4294901760, %v10253_v63 }
 0x200   : > { %2647 = vmatpush.msrb.mxu0 %v15658_v38  ;;  %2824 = vmatpush.msrb.mxu3 %v2823_v1  ;;  %v2852_v1 = vsub.f32 %v10447_v16, %v2851_v0  ;;  %v15671_v38 = vand.u32 4294901760, %v10154_v43 }
 0x201   : > { %7124 = vmatpush.msk.msrb.mxu1 %vm281_vm2, %v15642_v30  ;;  %7139 = vmatpush.msk.msrb.mxu2 %vm298_vm7, %v15642_v30  ;;  %vm15664_vm2 = vcmp.eq.s32.totalorder %v7997_v9, %v10011_v55 }
 0x202   : > { %2651 = vmatpush.msrb.mxu0 %v15659_v60  ;;  %2830 = vmatpush.msrb.mxu3 %v2829_v6  ;;  %v2853_v46 = vand.u32 4294901760, %v2852_v1  ;;  %v15666_v6 = vand.u32 4294901760, %v10008_v36  ;;  %v10553_v36 = vperm.slane %v7986_v4, 6  ;;  %vm15672_vm9 = vmmov %vm15664_vm2 }
 0x203   : > { %7125 = vmatpush.msk.msrb.mxu1 %vm265_vm8, %v15642_v30  ;;  %7140 = vmatpush.msk.msrb.mxu2 %vm282_vm4, %v15642_v30  ;;  %vm15667_vm8 = vcmp.eq.s32.totalorder %v8000_v10, %v10011_v55 }
 0x204   : > { %2655 = vmatpush.msrb.mxu0 %v15660_v62  ;;  %2836 = vmatpush.msrb.mxu3 %v2835_v18  ;;  %v15673_v18 = vand.u32 4294901760, %v10045_v22  ;;  %v15678_v22 = vand.u32 4294901760, %v10180_v24 }
 0x205   : > { %7126 = vmatpush.msk.msrb.mxu1 %vm249_vm15, %v15642_v30  ;;  %7141 = vmatpush.msk.msrb.mxu2 %vm266_vm13, %v15642_v30  ;;  %vm15669_vm15 = vmmov %vm15662_vm1 }
 0x206   : > { %2659 = vmatpush.msrb.mxu0 %v15661_v61  ;;  %2842 = vmatpush.msrb.mxu3 %v2841_v21 }
 0x207   : > { %2714 = vmatmul.f32.vlgmr.msrb.gmra.mxu1 %v8738_v47  ;;  %7142 = vmatpush.msk.msrb.mxu2 %vm250_vm5, %v15642_v30 }
 0x208   : > { %7143 = vmatpush.msk.msra.mxu1 %vm15662_vm1, %v15642_v30  ;;  %2663 = vmatpush.msrb.mxu0 %v15663_v19  ;;  %vm15674_vm1 = vcmp.eq.s32.totalorder %v8006_v12, %v10011_v55 }
 0x209   : > { %2848 = vmatpush.msrb.mxu3 %v2847_v28  ;;  %2755 = vmatmul.f32.vlgmr.msrb.gmra.mxu2 %v8771_v33  ;;  %v15685_v28 = vand.u32 4294901760, %v10337_v48 }
 0x20a   : > { %7144 = vmatpush.msk.msra.mxu1 %vm15664_vm2, %v15642_v30  ;;  %2956 = vmatpush.msra.mxu2 %v15665_v59  ;;  %vm15676_vm2 = vmmov %vm15667_vm8 }
 0x20b   : > { %2667 = vmatpush.msrb.mxu0 %v15666_v6  ;;  %2854 = vmatpush.msrb.mxu3 %v2853_v46 }
 0x20c   : > { %2856 = vmatmul.f32.vlgmr.msrb.gmra.mxu3 %v8738_v47  ;;  %7145 = vmatpush.msk.msra.mxu1 %vm15667_vm8, %v15642_v30  ;;  %vm15677_vm8 = vcmp.eq.s32.totalorder %v8009_v13, %v10011_v55 }
 0x20d   : > { %2960 = vmatpush.msra.mxu2 %v15668_v29  ;;  %7159 = vmatpush.msk.msra.mxu3 %vm15669_vm15, %v15642_v30  ;;  %vm491_vm15 = vcmp.eq.s32.totalorder %v7994_v8, %v10553_v36 }
 0x20e   : > { %2671 = vmatpush.msrb.mxu0 %v15670_v41  ;;  %7146 = vmatpush.msk.msra.mxu1 %vm442_vm12, %v15642_v30 }
 0x20f   : > { %2964 = vmatpush.msra.mxu2 %v15671_v38  ;;  %7160 = vmatpush.msk.msra.mxu3 %vm15672_vm9, %v15642_v30  ;;  %vm15680_vm9 = vmmov %vm15674_vm1 }
 0x210   : > { %2675 = vmatpush.msrb.mxu0 %v15673_v18  ;;  %7147 = vmatpush.msk.msra.mxu1 %vm15674_vm1, %v15642_v30  ;;  %vm15682_vm1 = vmmov %vm15677_vm8 }
 0x211   : > { %2677 = vmatmul.f32.vlgmr.msrb.gmra.mxu0 %v8738_v47  ;;  %2968 = vmatpush.msra.mxu2 %v15675_v5 }
 0x212   : > { %2862 = vmatpush.msra.mxu0 %v10111_v54  ;;  %7161 = vmatpush.msk.msra.mxu3 %vm15676_vm2, %v15642_v30  ;;  %v15679_v54 = vand.u32 4294901760, %v10216_v44  ;;  %vm15364_vm2 = vcmp.eq.s32.totalorder %v8000_v10, %v10553_v36 }
 0x213   : > { %7148 = vmatpush.msk.msra.mxu1 %vm15677_vm8, %v15642_v30  ;;  %2972 = vmatpush.msra.mxu2 %v15678_v22  ;;  %vm15365_vm8 = vcmp.eq.s32.totalorder %v8003_v11, %v10553_v36 }
 0x214   : > { %2865 = vmatpush.msra.mxu0 %v10124_v57  ;;  %7162 = vmatpush.msk.msra.mxu3 %vm442_vm12, %v15642_v30  ;;  %v6877_v57 = vsel %vm491_vm15, 1.0, %v15580_v25  ;;  %vm475_vm12 = vcmp.eq.s32.totalorder %v7997_v9, %v10553_v36  ;;  %v6829_v1 = vsel %vm15365_vm8, 1.0, %v15580_v25 }
 0x215   : > { %7149 = vmatpush.msk.msra.mxu1 %vm394_vm0, %v15642_v30  ;;  %2976 = vmatpush.msra.mxu2 %v15679_v54  ;;  %v10624_v60 = vsub.f32 %v6877_v57, %v6877_v57  ;;  %v10692_v46 = vsub.f32 %v6829_v1, %v6829_v1 }
 0x216   : > { %2868 = vmatpush.msra.mxu0 %v10154_v43  ;;  %7163 = vmatpush.msk.msra.mxu3 %vm15680_vm9, %v15642_v30  ;;  %v15681_v43 = vand.u32 4294901760, %v10241_v37  ;;  %vm267_vm9 = vcmp.eq.s32.totalorder %v8250_v35, %v10553_v36 }
 0x217   : > { %7150 = vmatpush.msk.msra.mxu1 %vm378_vm11, %v15642_v30 }
 0x218   : > { %2980 = vmatpush.msra.mxu2 %v15681_v43  ;;  %2871 = vmatpush.msra.mxu0 %v10172_v23  ;;  %v6861_v23 = vsel %vm475_vm12, 1.0, %v15580_v25 }
 0x219   : > { %7164 = vmatpush.msk.msra.mxu3 %vm15682_vm1, %v15642_v30  ;;  %7151 = vmatpush.msk.msra.mxu1 %vm362_vm6, %v15642_v30  ;;  %v10652_v21 = vsub.f32 %v6861_v23, %v6861_v23  ;;  %vm251_vm1 = vcmp.eq.s32.totalorder %v7991_v7, %v10553_v36 }
 0x21a   : > { %2984 = vmatpush.msra.mxu2 %v15683_v32  ;;  %2874 = vmatpush.msra.mxu0 %v10180_v24  ;;  %v6845_v24 = vsel %vm15364_vm2, 1.0, %v15580_v25 }
 0x21b   : > { %7165 = vmatpush.msk.msra.mxu3 %vm394_vm0, %v15642_v30  ;;  %7152 = vmatpush.msk.msra.mxu1 %vm346_vm10, %v15642_v30  ;;  %vm427_vm0 = vcmp.eq.s32.totalorder %v8006_v12, %v10553_v36  ;;  %v10672_v62 = vsub.f32 %v6845_v24, %v6845_v24  ;;  %v15395_v61 = vand.u32 4294901760, %v10652_v21 }
 0x21c   : > { %2988 = vmatpush.msra.mxu2 %v2809_v20  ;;  %2877 = vmatpush.msra.mxu0 %v10216_v44  ;;  %v15684_v20 = vand.u32 4294901760, %v10314_v39  ;;  %v3102_v44 = vand.u32 4294901760, %v10624_v60 }
 0x21d   : > { %7166 = vmatpush.msk.msra.mxu3 %vm378_vm11, %v15642_v30  ;;  %7153 = vmatpush.msk.msra.mxu1 %vm330_vm3, %v15642_v30  ;;  %vm15366_vm11 = vcmp.eq.s32.totalorder %v8009_v13, %v10553_v36  ;;  %v15393_v59 = vand.u32 4294901760, %v10672_v62 }
 0x21e   : > { %2992 = vmatpush.msra.mxu2 %v15684_v20  ;;  %2880 = vmatpush.msra.mxu0 %v10241_v37  ;;  %v6813_v37 = vsel %vm427_vm0, 1.0, %v15580_v25  ;;  %v6797_v19 = vsel %vm15366_vm11, 1.0, %v15580_v25 }
 0x21f   : > { %7167 = vmatpush.msk.msra.mxu3 %vm362_vm6, %v15642_v30  ;;  %7154 = vmatpush.msk.msra.mxu1 %vm314_vm14, %v15642_v30  ;;  %vm15369_vm6 = vcmp.eq.s32.totalorder %v8012_v14, %v10553_v36  ;;  %v10715_v6 = vsub.f32 %v6813_v37, %v6813_v37  ;;  %v10738_v29 = vsub.f32 %v6797_v19, %v6797_v19 }
 0x220   : > { %2996 = vmatpush.msra.mxu2 %v15685_v28  ;;  %2883 = vmatpush.msra.mxu0 %v10253_v63  ;;  %v3103_v63 = vsub.f32 %v10624_v60, %v3102_v44  ;;  %v3115_v41 = vsub.f32 %v10672_v62, %v15393_v59 }
 0x221   : > { %7168 = vmatpush.msk.msra.mxu3 %vm346_vm10, %v15642_v30  ;;  %7155 = vmatpush.msk.msra.mxu1 %vm298_vm7, %v15642_v30  ;;  %v15389_v38 = vand.u32 4294901760, %v10715_v6  ;;  %vm15373_vm10 = vcmp.eq.s32.totalorder %v8150_v50, %v10553_v36  ;;  %v15388_v22 = vand.u32 4294901760, %v10738_v29 }
 0x222   : > { %3000 = vmatpush.msra.mxu2 %v2827_v40  ;;  %2886 = vmatpush.msra.mxu0 %v10290_v56  ;;  %v6781_v56 = vsel %vm15369_vm6, 1.0, %v15580_v25  ;;  %v3109_v40 = vsub.f32 %v10652_v21, %v15395_v61  ;;  %v3116_v54 = vand.u32 4294901760, %v3115_v41 }
 0x223   : > { %7169 = vmatpush.msk.msra.mxu3 %vm330_vm3, %v15642_v30  ;;  %7156 = vmatpush.msk.msra.mxu1 %vm282_vm4, %v15642_v30  ;;  %vm15370_vm3 = vcmp.eq.s32.totalorder %v8015_v15, %v10553_v36  ;;  %v10757_v18 = vsub.f32 %v6781_v56, %v6781_v56  ;;  %v3127_v57 = vsub.f32 %v10715_v6, %v15389_v38 }
 0x224   : > { %3004 = vmatpush.msra.mxu2 %v2833_v45  ;;  %2889 = vmatpush.msra.mxu0 %v10314_v39  ;;  %v15392_v45 = vand.u32 4294901760, %v10692_v46  ;;  %v3104_v39 = vand.u32 4294901760, %v3103_v63  ;;  %v3133_v23 = vsub.f32 %v10738_v29, %v15388_v22 }
 0x225   : > { %7170 = vmatpush.msk.msra.mxu3 %vm314_vm14, %v15642_v30  ;;  %7157 = vmatpush.msk.msra.mxu1 %vm266_vm13, %v15642_v30  ;;  %vm15371_vm14 = vcmp.eq.s32.totalorder %v8072_v26, %v10553_v36  ;;  %v15384_v43 = vand.u32 4294901760, %v10757_v18  ;;  %v3128_v28 = vand.u32 4294901760, %v3127_v57 }
 0x226   : > { %3008 = vmatpush.msra.mxu2 %v2839_v27  ;;  %2892 = vmatpush.msra.mxu0 %v10337_v48  ;;  %v6765_v27 = vsel %vm15370_vm3, 1.0, %v15580_v25  ;;  %v3110_v48 = vand.u32 4294901760, %v3109_v40  ;;  %v3121_v5 = vsub.f32 %v10692_v46, %v15392_v45  ;;  %v3134_v19 = vand.u32 4294901760, %v3133_v23 }
 0x227   : > { %7171 = vmatpush.msk.msra.mxu3 %vm298_vm7, %v15642_v30  ;;  %7158 = vmatpush.msk.msra.mxu1 %vm250_vm5, %v15642_v30  ;;  %vm15376_vm7 = vcmp.eq.s32.totalorder %v8153_v51, %v10553_v36 }
 0x228   : > { %3012 = vmatpush.msra.mxu2 %v2845_v53  ;;  %2895 = vmatpush.msra.mxu0 %v10359_v42  ;;  %v6749_v53 = vsel %vm15371_vm14, 1.0, %v15580_v25  ;;  %v10787_v42 = vsub.f32 %v6765_v27, %v6765_v27  ;;  %v3122_v32 = vand.u32 4294901760, %v3121_v5  ;;  %v6717_v24 = vsel %vm15376_vm7, 1.0, %v15580_v25 }
 0x229   : > { %7172 = vmatpush.msk.msra.mxu3 %vm282_vm4, %v15642_v30  ;;  %2949 = vmatmul.f32.vlgmr.msra.gmra.mxu1 %v8750_v49  ;;  %vm15380_vm4 = vcmp.eq.s32.totalorder %v8156_v52, %v10553_v36  ;;  %v10841_v63 = vsub.f32 %v6717_v24, %v6717_v24  ;;  %v10898_v24 = vperm.slane %v7986_v4, 7 }
 0x22a   : > { %3016 = vmatpush.msra.mxu2 %v2851_v0  ;;  %3105 = vmatpush.msrb.mxu1 %v3104_v39  ;;  %v6733_v0 = vsel %vm15373_vm10, 1.0, %v15580_v25  ;;  %v15383_v20 = vand.u32 4294901760, %v10787_v42  ;;  %v6701_v55 = vsel %vm15380_vm4, 1.0, %v15580_v25 }
 0x22b   : > { %2898 = vmatpush.msra.mxu0 %v10381_v2  ;;  %7173 = vmatpush.msk.msra.mxu3 %vm266_vm13, %v15642_v30  ;;  %v10805_v2 = vsub.f32 %v6749_v53, %v6749_v53  ;;  %v10823_v1 = vsub.f32 %v6733_v0, %v6733_v0  ;;  %vm299_vm13 = vcmp.eq.s32.totalorder %v8234_v31, %v10553_v36  ;;  %v15378_v53 = vand.u32 4294901760, %v10841_v63 }
 0x22c   : > { %3018 = vmatmul.f32.vlgmr.msra.gmra.mxu2 %v8738_v47  ;;  %3111 = vmatpush.msrb.mxu1 %v3110_v48  ;;  %v6685_v56 = vsel %vm299_vm13, 1.0, %v15580_v25  ;;  %v3145_v40 = vsub.f32 %v10787_v42, %v15383_v20  ;;  %v10859_v39 = vsub.f32 %v6701_v55, %v6701_v55  ;;  %v15686_v48 = vld [vmem:[#allocation11_spill] sm:$0xff] }
 0x22d   : > { %3203 = vmatpush.msrb.mxu2 %v10624_v60  ;;  %2901 = vmatpush.msra.mxu0 %v10399_v58  ;;  %v3139_v58 = vsub.f32 %v10757_v18, %v15384_v43  ;;  %v15382_v37 = vand.u32 4294901760, %v10805_v2 }
 0x22e   : > { %7174 = vmatpush.msk.msra.mxu3 %vm250_vm5, %v15642_v30  ;;  %3117 = vmatpush.msrb.mxu1 %v3116_v54  ;;  %vm283_vm5 = vcmp.eq.s32.totalorder %v8247_v34, %v10553_v36  ;;  %v10874_v54 = vsub.f32 %v6685_v56, %v6685_v56  ;;  %v3146_v57 = vand.u32 4294901760, %v3145_v40 }
 0x22f   : > { %3055 = vmatmul.f32.vlgmr.msra.gmra.mxu3 %v8738_v47  ;;  %3206 = vmatpush.msrb.mxu2 %v10652_v21  ;;  %v3140_v41 = vand.u32 4294901760, %v3139_v58  ;;  %v6669_v27 = vsel %vm283_vm5, 1.0, %v15580_v25  ;;  %v3151_v5 = vsub.f32 %v10805_v2, %v15382_v37  ;;  %v3163_v58 = vsub.f32 %v10841_v63, %v15378_v53 }
 0x230   : > { %7191 = vmatpush.msk.msrb.mxu3 %vm491_vm15, %v15642_v30  ;;  %2904 = vmatpush.msra.mxu0 %v10431_v17  ;;  %v15381_v17 = vand.u32 4294901760, %v10823_v1  ;;  %v10895_v23 = vsub.f32 %v6669_v27, %v6669_v27  ;;  %v15374_v55 = vand.u32 4294901760, %v10874_v54 }
 0x231   : > { %3123 = vmatpush.msrb.mxu1 %v3122_v32  ;;  %3209 = vmatpush.msrb.mxu2 %v10672_v62  ;;  %v15375_v32 = vand.u32 4294901760, %v10859_v39  ;;  %v3152_v4 = vand.u32 4294901760, %v3151_v5  ;;  %v3164_v5 = vand.u32 4294901760, %v3163_v58 }
 0x232   : > { %7192 = vmatpush.msk.msrb.mxu3 %vm475_vm12, %v15642_v30  ;;  %2907 = vmatpush.msra.mxu0 %v10447_v16  ;;  %v6653_v16 = vsel %vm267_vm9, 1.0, %v15580_v25  ;;  %v3157_v0 = vsub.f32 %v10823_v1, %v15381_v17 }
 0x233   : > { %3129 = vmatpush.msrb.mxu1 %v3128_v28  ;;  %2910 = vmatmul.f32.vlgmr.msra.gmra.mxu0 %v15686_v48  ;;  %v6637_v28 = vsel %vm251_vm1, 1.0, %v15580_v25  ;;  %v3169_v40 = vsub.f32 %v10859_v39, %v15375_v32 }
 0x234   : > { %3212 = vmatpush.msrb.mxu2 %v10692_v46  ;;  %7175 = vmatpush.msk.msrb.mxu0 %vm491_vm15, %v15642_v30  ;;  %v3158_v56 = vand.u32 4294901760, %v3157_v0  ;;  %v10932_v27 = vsub.f32 %v6637_v28, %v6637_v28 }
 0x235   : > { %7193 = vmatpush.msk.msrb.mxu3 %vm15364_vm2, %v15642_v30  ;;  %3135 = vmatpush.msrb.mxu1 %v3134_v19  ;;  %v10917_v19 = vsub.f32 %v6653_v16, %v6653_v16  ;;  %v3175_v16 = vsub.f32 %v10874_v54, %v15374_v55  ;;  %v3170_v0 = vand.u32 4294901760, %v3169_v40 }
 0x236   : > { %3215 = vmatpush.msrb.mxu2 %v10715_v6  ;;  %7176 = vmatpush.msk.msrb.mxu0 %vm475_vm12, %v15642_v30 }
 0x237   : > { %7194 = vmatpush.msk.msrb.mxu3 %vm15365_vm8, %v15642_v30  ;;  %3141 = vmatpush.msrb.mxu1 %v3140_v41  ;;  %v15368_v41 = vand.u32 4294901760, %v10895_v23 }
 0x238   : > { %3218 = vmatpush.msrb.mxu2 %v10738_v29  ;;  %7177 = vmatpush.msk.msrb.mxu0 %vm15364_vm2, %v15642_v30  ;;  %vm15386_vm2 = vcmp.eq.s32.totalorder %v7994_v8, %v10898_v24 }
 0x239   : > { %7195 = vmatpush.msk.msrb.mxu3 %vm427_vm0, %v15642_v30  ;;  %3147 = vmatpush.msrb.mxu1 %v3146_v57  ;;  %v15367_v57 = vand.u32 4294901760, %v10917_v19  ;;  %v3181_v28 = vsub.f32 %v10895_v23, %v15368_v41  ;;  %v6878_v58 = vsel %vm15386_vm2, 1.0, %v15580_v25 }
 0x23a   : > { %3221 = vmatpush.msrb.mxu2 %v10757_v18  ;;  %7178 = vmatpush.msk.msrb.mxu0 %vm15365_vm8, %v15642_v30  ;;  %vm15390_vm8 = vcmp.eq.s32.totalorder %v7997_v9, %v10898_v24  ;;  %v10998_v41 = vsub.f32 %v6878_v58, %v6878_v58 }
 0x23b   : > { %7196 = vmatpush.msk.msrb.mxu3 %vm15366_vm11, %v15642_v30  ;;  %3153 = vmatpush.msrb.mxu1 %v3152_v4  ;;  %v15372_v4 = vand.u32 4294901760, %v10932_v27  ;;  %v3187_v40 = vsub.f32 %v10917_v19, %v15367_v57 }
 0x23c   : > { %3224 = vmatpush.msrb.mxu2 %v10787_v42  ;;  %7179 = vmatpush.msk.msrb.mxu0 %vm427_vm0, %v15642_v30 }
 0x23d   : > { %7197 = vmatpush.msk.msrb.mxu3 %vm15369_vm6, %v15642_v30  ;;  %3159 = vmatpush.msrb.mxu1 %v3158_v56  ;;  %v3176_v56 = vand.u32 4294901760, %v3175_v16  ;;  %v3182_v16 = vand.u32 4294901760, %v3181_v28  ;;  %v3193_v57 = vsub.f32 %v10932_v27, %v15372_v4 }
 0x23e   : > { %3227 = vmatpush.msrb.mxu2 %v10805_v2  ;;  %7180 = vmatpush.msk.msrb.mxu0 %vm15366_vm11, %v15642_v30  ;;  %vm460_vm11 = vcmp.eq.s32.totalorder %v8000_v10, %v10898_v24 }
 0x23f   : > { %7198 = vmatpush.msk.msrb.mxu3 %vm15370_vm3, %v15642_v30  ;;  %3165 = vmatpush.msrb.mxu1 %v3164_v5  ;;  %v6862_v5 = vsel %vm15390_vm8, 1.0, %v15580_v25  ;;  %v6846_v58 = vsel %vm460_vm11, 1.0, %v15580_v25 }
 0x240   : > { %3230 = vmatpush.msrb.mxu2 %v10823_v1  ;;  %7181 = vmatpush.msk.msrb.mxu0 %vm15369_vm6, %v15642_v30  ;;  %vm15396_vm6 = vcmp.eq.s32.totalorder %v8003_v11, %v10898_v24  ;;  %v11011_v28 = vsub.f32 %v6862_v5, %v6862_v5 }
 0x241   : > { %7199 = vmatpush.msk.msrb.mxu3 %vm15371_vm14, %v15642_v30  ;;  %3171 = vmatpush.msrb.mxu1 %v3170_v0  ;;  %v3188_v0 = vand.u32 4294901760, %v3187_v40  ;;  %v15377_v40 = vand.u32 4294901760, %v10998_v41  ;;  %v6830_v5 = vsel %vm15396_vm6, 1.0, %v15580_v25 }
 0x242   : > { %3233 = vmatpush.msrb.mxu2 %v10841_v63  ;;  %7182 = vmatpush.msk.msrb.mxu0 %vm15370_vm3, %v15642_v30  ;;  %vm15398_vm3 = vcmp.eq.s32.totalorder %v8006_v12, %v10898_v24  ;;  %v15379_v4 = vand.u32 4294901760, %v11011_v28 }
 0x243   : > { %7200 = vmatpush.msk.msrb.mxu3 %vm15373_vm10, %v15642_v30  ;;  %3177 = vmatpush.msrb.mxu1 %v3176_v56  ;;  %v3194_v56 = vand.u32 4294901760, %v3193_v57  ;;  %v6814_v57 = vsel %vm15398_vm3, 1.0, %v15580_v25 }
 0x244   : > { %3236 = vmatpush.msrb.mxu2 %v10859_v39  ;;  %7183 = vmatpush.msk.msrb.mxu0 %vm15371_vm14, %v15642_v30  ;;  %vm15400_vm14 = vcmp.eq.s32.totalorder %v8009_v13, %v10898_v24  ;;  %v11067_v55 = vsub.f32 %v6814_v57, %v6814_v57 }
 0x245   : > { %7201 = vmatpush.msk.msrb.mxu3 %vm15376_vm7, %v15642_v30  ;;  %3183 = vmatpush.msrb.mxu1 %v3182_v16  ;;  %v11041_v16 = vsub.f32 %v6846_v58, %v6846_v58  ;;  %v11059_v58 = vsub.f32 %v6830_v5, %v6830_v5  ;;  %v6798_v32 = vsel %vm15400_vm14, 1.0, %v15580_v25  ;;  %v3450_v5 = vsub.f32 %v11011_v28, %v15379_v4 }
 0x246   : > { %3239 = vmatpush.msrb.mxu2 %v10874_v54  ;;  %7184 = vmatpush.msk.msrb.mxu0 %vm15373_vm10, %v15642_v30  ;;  %vm396_vm10 = vcmp.eq.s32.totalorder %v8012_v14, %v10898_v24  ;;  %v11102_v53 = vsub.f32 %v6798_v32, %v6798_v32  ;;  %v15391_v37 = vand.u32 4294901760, %v11067_v55 }
 0x247   : > { %7202 = vmatpush.msk.msrb.mxu3 %vm15380_vm4, %v15642_v30  ;;  %3189 = vmatpush.msrb.mxu1 %v3188_v0  ;;  %v3444_v0 = vsub.f32 %v10998_v41, %v15377_v40  ;;  %v6782_v57 = vsel %vm396_vm10, 1.0, %v15580_v25  ;;  %v15387_v40 = vand.u32 4294901760, %v11059_v58 }
 0x248   : > { %3242 = vmatpush.msrb.mxu2 %v10895_v23  ;;  %7185 = vmatpush.msk.msrb.mxu0 %vm15376_vm7, %v15642_v30  ;;  %vm380_vm7 = vcmp.eq.s32.totalorder %v8015_v15, %v10898_v24  ;;  %v11127_v20 = vsub.f32 %v6782_v57, %v6782_v57 }
 0x249   : > { %7203 = vmatpush.msk.msrb.mxu3 %vm299_vm13, %v15642_v30  ;;  %3195 = vmatpush.msrb.mxu1 %v3194_v56  ;;  %v15385_v56 = vand.u32 4294901760, %v11041_v16  ;;  %v6766_v4 = vsel %vm380_vm7, 1.0, %v15580_v25  ;;  %v3445_v17 = vand.u32 4294901760, %v3444_v0  ;;  %v3451_v0 = vand.u32 4294901760, %v3450_v5 }
 0x24a   : > { %3245 = vmatpush.msrb.mxu2 %v10917_v19  ;;  %7186 = vmatpush.msk.msrb.mxu0 %vm15380_vm4, %v15642_v30  ;;  %vm364_vm4 = vcmp.eq.s32.totalorder %v8072_v26, %v10898_v24  ;;  %v11139_v43 = vsub.f32 %v6766_v4, %v6766_v4  ;;  %v15394_v5 = vand.u32 4294901760, %v11102_v53  ;;  %v3468_v4 = vsub.f32 %v11067_v55, %v15391_v37 }
 0x24b   : > { %7204 = vmatpush.msk.msrb.mxu3 %vm283_vm5, %v15642_v30  ;;  %3197 = vmatmul.f32.vlgmr.msrb.gmra.mxu1 %v8738_v47  ;;  %v3456_v32 = vsub.f32 %v11041_v16, %v15385_v56  ;;  %v6750_v57 = vsel %vm364_vm4, 1.0, %v15580_v25  ;;  %v3462_v56 = vsub.f32 %v11059_v58, %v15387_v40  ;;  %v15397_v22 = vand.u32 4294901760, %v11127_v20 }
 0x24c   : > { %3248 = vmatpush.msrb.mxu2 %v10932_v27  ;;  %7207 = vmatpush.msk.msra.mxu1 %vm491_vm15, %v15642_v30  ;;  %vm348_vm15 = vcmp.eq.s32.totalorder %v8150_v50, %v10898_v24  ;;  %v11176_v38 = vsub.f32 %v6750_v57, %v6750_v57  ;;  %v15399_v37 = vand.u32 4294901760, %v11139_v43  ;;  %v3469_v59 = vand.u32 4294901760, %v3468_v4 }
 0x24d   : > { %7187 = vmatpush.msk.msrb.mxu0 %vm299_vm13, %v15642_v30  ;;  %7205 = vmatpush.msk.msrb.mxu3 %vm267_vm9, %v15642_v30  ;;  %v6734_v40 = vsel %vm348_vm15, 1.0, %v15580_v25  ;;  %v3463_v57 = vand.u32 4294901760, %v3462_v56  ;;  %v15690_v4 = vand.u32 4294901760, %v10652_v21 }
 0x24e   : > { %3251 = vmatmul.f32.vlgmr.msrb.gmra.mxu2 %v15686_v48  ;;  %7208 = vmatpush.msk.msra.mxu1 %vm475_vm12, %v15642_v30  ;;  %vm15687_vm12 = vcmp.eq.s32.totalorder %v8000_v10, %v10553_v36  ;;  %v11200_v45 = vsub.f32 %v6734_v40, %v6734_v40  ;;  %v3480_v40 = vsub.f32 %v11127_v20, %v15397_v22 }
 0x24f   : > { %7223 = vmatpush.msk.msra.mxu2 %vm15386_vm2, %v15642_v30  ;;  %7188 = vmatpush.msk.msrb.mxu0 %vm283_vm5, %v15642_v30  ;;  %vm332_vm2 = vcmp.eq.s32.totalorder %v8153_v51, %v10898_v24  ;;  %v3486_v60 = vsub.f32 %v11139_v43, %v15399_v37 }
 0x250   : > { %7206 = vmatpush.msk.msrb.mxu3 %vm251_vm1, %v15642_v30  ;;  %7209 = vmatpush.msk.msra.mxu1 %vm15687_vm12, %v15642_v30  ;;  %vm15688_vm12 = vcmp.eq.s32.totalorder %v8003_v11, %v10553_v36 }
 0x251   : > { %3290 = vmatmul.f32.vlgmr.msrb.gmra.mxu3 %v8750_v49  ;;  %7224 = vmatpush.msk.msra.mxu2 %vm15390_vm8, %v15642_v30  ;;  %vm316_vm8 = vcmp.eq.s32.totalorder %v8156_v52, %v10898_v24 }
 0x252   : > { %3446 = vmatpush.msra.mxu3 %v3445_v17  ;;  %7189 = vmatpush.msk.msrb.mxu0 %vm267_vm9, %v15642_v30  ;;  %v3457_v17 = vand.u32 4294901760, %v3456_v32  ;;  %v6718_v32 = vsel %vm332_vm2, 1.0, %v15580_v25  ;;  %v6702_v56 = vsel %vm316_vm8, 1.0, %v15580_v25 }
 0x253   : > { %7210 = vmatpush.msk.msra.mxu1 %vm15688_vm12, %v15642_v30  ;;  %7225 = vmatpush.msk.msra.mxu2 %vm460_vm11, %v15642_v30  ;;  %vm300_vm12 = vcmp.eq.s32.totalorder %v8234_v31, %v10898_v24  ;;  %v11219_v61 = vsub.f32 %v6718_v32, %v6718_v32  ;;  %v15401_v32 = vand.u32 4294901760, %v11200_v45  ;;  %v11241_v22 = vsub.f32 %v6702_v56, %v6702_v56 }
 0x254   : > { %3452 = vmatpush.msra.mxu3 %v3451_v0  ;;  %7190 = vmatpush.msk.msrb.mxu0 %vm251_vm1, %v15642_v30  ;;  %v3474_v0 = vsub.f32 %v11102_v53, %v15394_v5  ;;  %v3491_v5 = vand.u32 4294901760, %v11176_v38 }
 0x255   : > { %7211 = vmatpush.msk.msra.mxu1 %vm427_vm0, %v15642_v30  ;;  %3096 = vmatmul.f32.vlgmr.msrb.gmra.mxu0 %v8771_v33  ;;  %vm284_vm0 = vcmp.eq.s32.totalorder %v8247_v34, %v10898_v24 }
 0x256   : > { %7226 = vmatpush.msk.msra.mxu2 %vm15396_vm6, %v15642_v30  ;;  %3297 = vmatpush.msra.mxu0 %v3102_v44  ;;  %vm15689_vm6 = vcmp.eq.s32.totalorder %v8009_v13, %v10553_v36  ;;  %v6686_v44 = vsel %vm300_vm12, 1.0, %v15580_v25  ;;  %v6670_v21 = vsel %vm284_vm0, 1.0, %v15580_v25  ;;  %v3492_v56 = vsub.f32 %v11176_v38, %v3491_v5 }
 0x257   : > { %3458 = vmatpush.msra.mxu3 %v3457_v17  ;;  %7212 = vmatpush.msk.msra.mxu1 %vm15689_vm6, %v15642_v30  ;;  %v3475_v17 = vand.u32 4294901760, %v3474_v0  ;;  %vm15691_vm6 = vcmp.eq.s32.totalorder %v8012_v14, %v10553_v36  ;;  %v3481_v0 = vand.u32 4294901760, %v3480_v40  ;;  %v11263_v37 = vsub.f32 %v6686_v44, %v6686_v44 }
 0x258   : > { %7227 = vmatpush.msk.msra.mxu2 %vm15398_vm3, %v15642_v30  ;;  %3301 = vmatpush.msra.mxu0 %v15690_v4  ;;  %vm268_vm3 = vcmp.eq.s32.totalorder %v8250_v35, %v10898_v24  ;;  %v15402_v4 = vand.u32 4294901760, %v11219_v61  ;;  %v3498_v40 = vsub.f32 %v11200_v45, %v15401_v32  ;;  %v3509_v44 = vand.u32 4294901760, %v11241_v22 }
 0x259   : > { %3464 = vmatpush.msra.mxu3 %v3463_v57  ;;  %7213 = vmatpush.msk.msra.mxu1 %vm15691_vm6, %v15642_v30  ;;  %v15692_v57 = vand.u32 4294901760, %v10672_v62  ;;  %vm15693_vm6 = vcmp.eq.s32.totalorder %v8015_v15, %v10553_v36  ;;  %v3487_v62 = vand.u32 4294901760, %v3486_v60  ;;  %v6654_v60 = vsel %vm268_vm3, 1.0, %v15580_v25 }
 0x25a   : > { %7228 = vmatpush.msk.msra.mxu2 %vm15400_vm14, %v15642_v30  ;;  %vm252_vm14 = vcmp.eq.s32.totalorder %v7991_v7, %v10898_v24 }
 0x25b   : > { %3305 = vmatpush.msra.mxu0 %v15692_v57  ;;  %3470 = vmatpush.msra.mxu3 %v3469_v59  ;;  %v15694_v59 = vand.u32 4294901760, %v10692_v46  ;;  %v11281_v57 = vsub.f32 %v6670_v21, %v6670_v21  ;;  %v15696_v46 = vand.u32 4294901760, %v10715_v6  ;;  %v3504_v21 = vsub.f32 %v11219_v61, %v15402_v4 }
 0x25c   : > { %7214 = vmatpush.msk.msra.mxu1 %vm15693_vm6, %v15642_v30  ;;  %7229 = vmatpush.msk.msra.mxu2 %vm396_vm10, %v15642_v30  ;;  %vm15695_vm6 = vcmp.eq.s32.totalorder %v8072_v26, %v10553_v36  ;;  %v6638_v32 = vsel %vm252_vm14, 1.0, %v15580_v25  ;;  %v11313_v6 = vsub.f32 %v6654_v60, %v6654_v60 }
 0x25d   : > { %3309 = vmatpush.msra.mxu0 %v15694_v59  ;;  %3476 = vmatpush.msra.mxu3 %v3475_v17  ;;  %v3493_v17 = vand.u32 4294901760, %v3492_v56  ;;  %v3515_v59 = vand.u32 4294901760, %v11263_v37  ;;  %v3499_v56 = vand.u32 4294901760, %v3498_v40  ;;  %v3521_v4 = vand.u32 4294901760, %v11281_v57 }
 0x25e   : > { %7215 = vmatpush.msk.msra.mxu1 %vm15695_vm6, %v15642_v30  ;;  %7230 = vmatpush.msk.msra.mxu2 %vm380_vm7, %v15642_v30  ;;  %vm15697_vm6 = vcmp.eq.s32.totalorder %v8150_v50, %v10553_v36  ;;  %v3505_v40 = vand.u32 4294901760, %v3504_v21 }
 0x25f   : > { %3313 = vmatpush.msra.mxu0 %v15696_v46  ;;  %3482 = vmatpush.msra.mxu3 %v3481_v0  ;;  %v15698_v0 = vand.u32 4294901760, %v10738_v29  ;;  %v3510_v46 = vsub.f32 %v11241_v22, %v3509_v44  ;;  %v11329_v29 = vsub.f32 %v6638_v32, %v6638_v32  ;;  %v3516_v60 = vsub.f32 %v11263_v37, %v3515_v59 }
 0x260   : > { %7216 = vmatpush.msk.msra.mxu1 %vm15697_vm6, %v15642_v30  ;;  %7231 = vmatpush.msk.msra.mxu2 %vm364_vm4, %v15642_v30  ;;  %vm15699_vm6 = vcmp.eq.s32.totalorder %v8153_v51, %v10553_v36  ;;  %v3527_v32 = vand.u32 4294901760, %v11313_v6  ;;  %v3522_v21 = vsub.f32 %v11281_v57, %v3521_v4 }
 0x261   : > { %3317 = vmatpush.msra.mxu0 %v15698_v0  ;;  %3488 = vmatpush.msra.mxu3 %v3487_v62  ;;  %v15700_v62 = vand.u32 4294901760, %v10757_v18  ;;  %v15702_v18 = vand.u32 4294901760, %v10787_v42  ;;  %v3533_v42 = vand.u32 4294901760, %v11329_v29  ;;  %v15703_v0 = vand.u32 4294901760, %v10805_v2 }
 0x262   : > { %7217 = vmatpush.msk.msra.mxu1 %vm15699_vm6, %v15642_v30  ;;  %7232 = vmatpush.msk.msra.mxu2 %vm348_vm15, %v15642_v30  ;;  %vm15701_vm6 = vcmp.eq.s32.totalorder %v8156_v52, %v10553_v36  ;;  %v3523_v2 = vand.u32 4294901760, %v3522_v21  ;;  %v15708_v21 = vand.u32 4294901760, %v10874_v54  ;;  %v15713_v54 = vand.u32 4294901760, %v11011_v28 }
 0x263   : > { %3321 = vmatpush.msra.mxu0 %v15700_v62  ;;  %3494 = vmatpush.msra.mxu3 %v3493_v17  ;;  %v3511_v17 = vand.u32 4294901760, %v3510_v46  ;;  %v3528_v46 = vsub.f32 %v11313_v6, %v3527_v32  ;;  %v15704_v62 = vand.u32 4294901760, %v10823_v1  ;;  %v205_v1 = vld [vmem:[%s7975_s4 + $0x8] sm:$0xff] }
 0x264   : > { %7218 = vmatpush.msk.msra.mxu1 %vm15701_vm6, %v15642_v30  ;;  %7233 = vmatpush.msk.msra.mxu2 %vm332_vm2, %v15642_v30  ;;  %v209_v36 = vadd.s32 128, %v205_v1  ;;  %vm15716_vm6 = vcmp.eq.s32.totalorder %v8003_v11, %v10898_v24 }
 0x265   : > { %3325 = vmatpush.msra.mxu0 %v15702_v18  ;;  %3500 = vmatpush.msra.mxu3 %v3499_v56  ;;  %v3517_v56 = vand.u32 4294901760, %v3516_v60  ;;  %v15705_v60 = vand.u32 4294901760, %v10841_v63  ;;  %v3529_v18 = vand.u32 4294901760, %v3528_v46 }
 0x266   : > { %7219 = vmatpush.msk.msra.mxu1 %vm299_vm13, %v15642_v30  ;;  %7234 = vmatpush.msk.msra.mxu2 %vm316_vm8, %v15642_v30  ;;  %vm15707_vm13 = vcmp.eq.s32.totalorder %v7994_v8, %v10898_v24 }
 0x267   : > { %3329 = vmatpush.msra.mxu0 %v15703_v0  ;;  %3506 = vmatpush.msra.mxu3 %v3505_v40  ;;  %v3534_v40 = vsub.f32 %v11329_v29, %v3533_v42  ;;  %v15711_v0 = vand.u32 4294901760, %v10895_v23  ;;  %v15715_v23 = vand.u32 4294901760, %v10917_v19  ;;  %v15721_v19 = vand.u32 4294901760, %v11059_v58 }
 0x268   : > { %7220 = vmatpush.msk.msra.mxu1 %vm283_vm5, %v15642_v30  ;;  %7235 = vmatpush.msk.msra.mxu2 %vm300_vm12, %v15642_v30  ;;  %vm207_vm5 = vcmp.lt.s32.totalorder %v205_v1, 0 }
 0x269   : > { %3333 = vmatpush.msra.mxu0 %v15704_v62  ;;  %3512 = vmatpush.msra.mxu3 %v3511_v17  ;;  %v15706_v17 = vand.u32 4294901760, %v10859_v39  ;;  %v3535_v63 = vand.u32 4294901760, %v3534_v40  ;;  %v15710_v39 = vand.u32 4294901760, %v10998_v41  ;;  %v15717_v62 = vand.u32 4294901760, %v11041_v16 }
 0x26a   : > { %7221 = vmatpush.msk.msra.mxu1 %vm267_vm9, %v15642_v30  ;;  %7236 = vmatpush.msk.msra.mxu2 %vm284_vm0, %v15642_v30  ;;  %vm15709_vm9 = vcmp.eq.s32.totalorder %v7997_v9, %v10898_v24  ;;  %v15728_v40 = vand.u32 4294901760, %v11139_v43 }
 0x26b   : > { %3337 = vmatpush.msra.mxu0 %v15705_v60  ;;  %3518 = vmatpush.msra.mxu3 %v3517_v56  ;;  %v11418_v56 = vsel %vm207_vm5, %v209_v36, %v205_v1  ;;  %vm15720_vm5 = vcmp.eq.s32.totalorder %v8006_v12, %v10898_v24 }
 0x26c   : > { %7222 = vmatpush.msk.msra.mxu1 %vm251_vm1, %v15642_v30  ;;  %7237 = vmatpush.msk.msra.mxu2 %vm268_vm3, %v15642_v30  ;;  %15712 = vst [vmem:[#allocation15_spill] sm:$0xff] %v11418_v56  ;;  %vm15714_vm1 = vmmov %vm15707_vm13  ;;  %v11438_v46 = vperm.slane %v11418_v56, 0 }
 0x26d   : > { %3341 = vmatpush.msra.mxu0 %v15706_v17  ;;  %3524 = vmatpush.msra.mxu3 %v3523_v2  ;;  %v15719_v2 = vand.u32 4294901760, %v10932_v27  ;;  %v15723_v27 = vand.u32 4294901760, %v11067_v55 }
 0x26e   : > { %3396 = vmatmul.f32.vlgmr.msra.gmra.mxu1 %v8738_v47  ;;  %7238 = vmatpush.msk.msra.mxu2 %vm252_vm14, %v15642_v30 }
 0x26f   : > { %7239 = vmatpush.msk.msrb.mxu1 %vm15707_vm13, %v15642_v30  ;;  %3345 = vmatpush.msra.mxu0 %v15708_v21  ;;  %vm15718_vm13 = vmmov %vm15709_vm9 }
 0x270   : > { %3530 = vmatpush.msra.mxu3 %v3529_v18  ;;  %3437 = vmatmul.f32.vlgmr.msra.gmra.mxu2 %v8771_v33 }
 0x271   : > { %7240 = vmatpush.msk.msrb.mxu1 %vm15709_vm9, %v15642_v30  ;;  %3638 = vmatpush.msrb.mxu2 %v15710_v39  ;;  %vm15722_vm9 = vcmp.eq.s32.totalorder %v8009_v13, %v10898_v24 }
 0x272   : > { %3349 = vmatpush.msra.mxu0 %v15711_v0  ;;  %3536 = vmatpush.msra.mxu3 %v3535_v63  ;;  %v15730_v63 = vand.u32 4294901760, %v11219_v61 }
 0x273   : > { %3538 = vmatmul.f32.vlgmr.msra.gmra.mxu3 %v8738_v47  ;;  %7241 = vmatpush.msk.msrb.mxu1 %vm460_vm11, %v15642_v30 }
 0x274   : > { %3642 = vmatpush.msrb.mxu2 %v15713_v54  ;;  %7255 = vmatpush.msk.msrb.mxu3 %vm15714_vm1, %v15642_v30  ;;  %vm493_vm1 = vcmp.eq.s32.totalorder %v7994_v8, %v11438_v46 }
 0x275   : > { %3353 = vmatpush.msra.mxu0 %v15715_v23  ;;  %7242 = vmatpush.msk.msrb.mxu1 %vm15716_vm6, %v15642_v30 }
 0x276   : > { %3646 = vmatpush.msrb.mxu2 %v15717_v62  ;;  %7256 = vmatpush.msk.msrb.mxu3 %vm15718_vm13, %v15642_v30  ;;  %vm477_vm13 = vcmp.eq.s32.totalorder %v7997_v9, %v11438_v46 }
 0x277   : > { %3357 = vmatpush.msra.mxu0 %v15719_v2  ;;  %7243 = vmatpush.msk.msrb.mxu1 %vm15720_vm5, %v15642_v30 }
 0x278   : > { %3359 = vmatmul.f32.vlgmr.msra.gmra.mxu0 %v8738_v47  ;;  %3650 = vmatpush.msrb.mxu2 %v15721_v19 }
 0x279   : > { %3544 = vmatpush.msrb.mxu0 %v10998_v41  ;;  %7257 = vmatpush.msk.msrb.mxu3 %vm460_vm11, %v15642_v30  ;;  %v15724_v41 = vand.u32 4294901760, %v11102_v53  ;;  %vm15725_vm11 = vmmov %vm15720_vm5 }
 0x27a   : > { %7244 = vmatpush.msk.msrb.mxu1 %vm15722_vm9, %v15642_v30  ;;  %3654 = vmatpush.msrb.mxu2 %v15723_v27  ;;  %vm15727_vm5 = vmmov %vm15722_vm9  ;;  %vm15403_vm9 = vcmp.eq.s32.totalorder %v8000_v10, %v11438_v46 }
 0x27b   : > { %3547 = vmatpush.msrb.mxu0 %v11011_v28  ;;  %7258 = vmatpush.msk.msrb.mxu3 %vm15716_vm6, %v15642_v30  ;;  %v6879_v28 = vsel %vm493_vm1, 1.0, %v15580_v25  ;;  %vm15404_vm6 = vcmp.eq.s32.totalorder %v8003_v11, %v11438_v46 }
 0x27c   : > { %7245 = vmatpush.msk.msrb.mxu1 %vm396_vm10, %v15642_v30  ;;  %3658 = vmatpush.msrb.mxu2 %v15724_v41  ;;  %v11509_v60 = vsub.f32 %v6879_v28, %v6879_v28  ;;  %v6831_v18 = vsel %vm15404_vm6, 1.0, %v15580_v25 }
 0x27d   : > { %3550 = vmatpush.msrb.mxu0 %v11041_v16  ;;  %7259 = vmatpush.msk.msrb.mxu3 %vm15725_vm11, %v15642_v30  ;;  %v15726_v16 = vand.u32 4294901760, %v11127_v20  ;;  %v11577_v21 = vsub.f32 %v6831_v18, %v6831_v18  ;;  %vm269_vm11 = vcmp.eq.s32.totalorder %v8250_v35, %v11438_v46 }
 0x27e   : > { %7246 = vmatpush.msk.msrb.mxu1 %vm380_vm7, %v15642_v30 }
 0x27f   : > { %3662 = vmatpush.msrb.mxu2 %v15726_v16  ;;  %3553 = vmatpush.msrb.mxu0 %v11059_v58  ;;  %v6863_v58 = vsel %vm477_vm13, 1.0, %v15580_v25 }
 0x280   : > { %7260 = vmatpush.msk.msrb.mxu3 %vm15727_vm5, %v15642_v30  ;;  %7247 = vmatpush.msk.msrb.mxu1 %vm364_vm4, %v15642_v30  ;;  %v11537_v1 = vsub.f32 %v6863_v58, %v6863_v58  ;;  %vm253_vm5 = vcmp.eq.s32.totalorder %v7991_v7, %v11438_v46 }
 0x281   : > { %3666 = vmatpush.msrb.mxu2 %v15728_v40  ;;  %3556 = vmatpush.msrb.mxu0 %v11067_v55  ;;  %v6847_v55 = vsel %vm15403_vm9, 1.0, %v15580_v25 }
 0x282   : > { %7261 = vmatpush.msk.msrb.mxu3 %vm396_vm10, %v15642_v30  ;;  %7248 = vmatpush.msk.msrb.mxu1 %vm348_vm15, %v15642_v30  ;;  %vm429_vm10 = vcmp.eq.s32.totalorder %v8006_v12, %v11438_v46  ;;  %v11557_v17 = vsub.f32 %v6847_v55, %v6847_v55  ;;  %v15433_v36 = vand.u32 4294901760, %v11537_v1 }
 0x283   : > { %3670 = vmatpush.msrb.mxu2 %v3491_v5  ;;  %3559 = vmatpush.msrb.mxu0 %v11102_v53  ;;  %v15729_v5 = vand.u32 4294901760, %v11200_v45  ;;  %v3784_v53 = vand.u32 4294901760, %v11509_v60 }
 0x284   : > { %7262 = vmatpush.msk.msrb.mxu3 %vm380_vm7, %v15642_v30  ;;  %7249 = vmatpush.msk.msrb.mxu1 %vm332_vm2, %v15642_v30  ;;  %vm15406_vm7 = vcmp.eq.s32.totalorder %v8009_v13, %v11438_v46  ;;  %v15432_v0 = vand.u32 4294901760, %v11557_v17 }
 0x285   : > { %3674 = vmatpush.msrb.mxu2 %v15729_v5  ;;  %3562 = vmatpush.msrb.mxu0 %v11127_v20  ;;  %v6815_v20 = vsel %vm429_vm10, 1.0, %v15580_v25  ;;  %v6799_v39 = vsel %vm15406_vm7, 1.0, %v15580_v25 }
 0x286   : > { %7263 = vmatpush.msk.msrb.mxu3 %vm364_vm4, %v15642_v30  ;;  %7250 = vmatpush.msk.msrb.mxu1 %vm316_vm8, %v15642_v30  ;;  %vm15409_vm4 = vcmp.eq.s32.totalorder %v8012_v14, %v11438_v46  ;;  %v11600_v54 = vsub.f32 %v6815_v20, %v6815_v20  ;;  %v11623_v23 = vsub.f32 %v6799_v39, %v6799_v39 }
 0x287   : > { %3678 = vmatpush.msrb.mxu2 %v15730_v63  ;;  %3565 = vmatpush.msrb.mxu0 %v11139_v43  ;;  %v3785_v43 = vsub.f32 %v11509_v60, %v3784_v53  ;;  %v3797_v62 = vsub.f32 %v11557_v17, %v15432_v0 }
 0x288   : > { %7264 = vmatpush.msk.msrb.mxu3 %vm348_vm15, %v15642_v30  ;;  %7251 = vmatpush.msk.msrb.mxu1 %vm300_vm12, %v15642_v30  ;;  %v15428_v2 = vand.u32 4294901760, %v11600_v54  ;;  %vm15413_vm15 = vcmp.eq.s32.totalorder %v8150_v50, %v11438_v46  ;;  %v15424_v41 = vand.u32 4294901760, %v11623_v23 }
 0x289   : > { %3682 = vmatpush.msrb.mxu2 %v3509_v44  ;;  %3568 = vmatpush.msrb.mxu0 %v11176_v38  ;;  %v6783_v38 = vsel %vm15409_vm4, 1.0, %v15580_v25  ;;  %v3791_v44 = vsub.f32 %v11537_v1, %v15433_v36  ;;  %v3798_v28 = vand.u32 4294901760, %v3797_v62 }
 0x28a   : > { %7265 = vmatpush.msk.msrb.mxu3 %vm332_vm2, %v15642_v30  ;;  %7252 = vmatpush.msk.msrb.mxu1 %vm284_vm0, %v15642_v30  ;;  %vm15410_vm2 = vcmp.eq.s32.totalorder %v8015_v15, %v11438_v46  ;;  %v11642_v19 = vsub.f32 %v6783_v38, %v6783_v38  ;;  %v3809_v16 = vsub.f32 %v11600_v54, %v15428_v2 }
 0x28b   : > { %3686 = vmatpush.msrb.mxu2 %v3515_v59  ;;  %3571 = vmatpush.msrb.mxu0 %v11200_v45  ;;  %v15429_v59 = vand.u32 4294901760, %v11577_v21  ;;  %v3786_v45 = vand.u32 4294901760, %v3785_v43  ;;  %v3815_v55 = vsub.f32 %v11623_v23, %v15424_v41 }
 0x28c   : > { %7266 = vmatpush.msk.msrb.mxu3 %vm316_vm8, %v15642_v30  ;;  %7253 = vmatpush.msk.msrb.mxu1 %vm268_vm3, %v15642_v30  ;;  %vm15411_vm8 = vcmp.eq.s32.totalorder %v8072_v26, %v11438_v46  ;;  %v15423_v40 = vand.u32 4294901760, %v11642_v19  ;;  %v3810_v20 = vand.u32 4294901760, %v3809_v16 }
 0x28d   : > { %3690 = vmatpush.msrb.mxu2 %v3521_v4  ;;  %3574 = vmatpush.msrb.mxu0 %v11219_v61  ;;  %v6767_v4 = vsel %vm15410_vm2, 1.0, %v15580_v25  ;;  %v3792_v61 = vand.u32 4294901760, %v3791_v44  ;;  %v3803_v27 = vsub.f32 %v11577_v21, %v15429_v59  ;;  %v3816_v38 = vand.u32 4294901760, %v3815_v55 }
 0x28e   : > { %7267 = vmatpush.msk.msrb.mxu3 %vm300_vm12, %v15642_v30  ;;  %7254 = vmatpush.msk.msrb.mxu1 %vm252_vm14, %v15642_v30  ;;  %vm15416_vm12 = vcmp.eq.s32.totalorder %v8153_v51, %v11438_v46 }
 0x28f   : > { %3694 = vmatpush.msrb.mxu2 %v3527_v32  ;;  %3577 = vmatpush.msrb.mxu0 %v11241_v22  ;;  %v6751_v32 = vsel %vm15411_vm8, 1.0, %v15580_v25  ;;  %v11672_v22 = vsub.f32 %v6767_v4, %v6767_v4  ;;  %v3804_v58 = vand.u32 4294901760, %v3803_v27  ;;  %v6719_v5 = vsel %vm15416_vm12, 1.0, %v15580_v25 }
 0x290   : > { %7268 = vmatpush.msk.msrb.mxu3 %vm284_vm0, %v15642_v30  ;;  %3631 = vmatmul.f32.vlgmr.msrb.gmra.mxu1 %v8750_v49  ;;  %vm15420_vm0 = vcmp.eq.s32.totalorder %v8156_v52, %v11438_v46  ;;  %v11726_v39 = vsub.f32 %v6719_v5, %v6719_v5  ;;  %v11783_v5 = vperm.slane %v11418_v56, 1 }
 0x291   : > { %3698 = vmatpush.msrb.mxu2 %v3533_v42  ;;  %3787 = vmatpush.msra.mxu1 %v3786_v45  ;;  %v6735_v42 = vsel %vm15413_vm15, 1.0, %v15580_v25  ;;  %v15422_v18 = vand.u32 4294901760, %v11672_v22  ;;  %v6703_v24 = vsel %vm15420_vm0, 1.0, %v15580_v25 }
 0x292   : > { %3580 = vmatpush.msrb.mxu0 %v11263_v37  ;;  %7269 = vmatpush.msk.msrb.mxu3 %vm268_vm3, %v15642_v30  ;;  %v11690_v37 = vsub.f32 %v6751_v32, %v6751_v32  ;;  %v11708_v63 = vsub.f32 %v6735_v42, %v6735_v42  ;;  %vm301_vm3 = vcmp.eq.s32.totalorder %v8234_v31, %v11438_v46  ;;  %v15415_v32 = vand.u32 4294901760, %v11726_v39 }
 0x293   : > { %3700 = vmatmul.f32.vlgmr.msrb.gmra.mxu2 %v8738_v47  ;;  %3793 = vmatpush.msra.mxu1 %v3792_v61  ;;  %v6687_v44 = vsel %vm301_vm3, 1.0, %v15580_v25  ;;  %v3827_v45 = vsub.f32 %v11672_v22, %v15422_v18  ;;  %v11744_v62 = vsub.f32 %v6703_v24, %v6703_v24 }
 0x294   : > { %3885 = vmatpush.msra.mxu2 %v11509_v60  ;;  %3583 = vmatpush.msrb.mxu0 %v11281_v57  ;;  %v3821_v57 = vsub.f32 %v11642_v19, %v15423_v40  ;;  %v15421_v43 = vand.u32 4294901760, %v11690_v37  ;;  %v3845_v24 = vsub.f32 %v11726_v39, %v15415_v32 }
 0x295   : > { %7270 = vmatpush.msk.msrb.mxu3 %vm252_vm14, %v15642_v30  ;;  %3799 = vmatpush.msra.mxu1 %v3798_v28  ;;  %vm285_vm14 = vcmp.eq.s32.totalorder %v8247_v34, %v11438_v46  ;;  %v11759_v28 = vsub.f32 %v6687_v44, %v6687_v44  ;;  %v3828_v16 = vand.u32 4294901760, %v3827_v45 }
 0x296   : > { %3737 = vmatmul.f32.vlgmr.msrb.gmra.mxu3 %v8738_v47  ;;  %3888 = vmatpush.msra.mxu2 %v11537_v1  ;;  %v3822_v4 = vand.u32 4294901760, %v3821_v57  ;;  %v6671_v61 = vsel %vm285_vm14, 1.0, %v15580_v25  ;;  %v3833_v27 = vsub.f32 %v11690_v37, %v15421_v43 }
 0x297   : > { %7287 = vmatpush.msk.msra.mxu3 %vm493_vm1, %v15642_v30  ;;  %3586 = vmatpush.msrb.mxu0 %v11313_v6  ;;  %v15418_v6 = vand.u32 4294901760, %v11708_v63  ;;  %v11780_v55 = vsub.f32 %v6671_v61, %v6671_v61 }
 0x298   : > { %3805 = vmatpush.msra.mxu1 %v3804_v58  ;;  %3891 = vmatpush.msra.mxu2 %v11557_v17  ;;  %v15414_v58 = vand.u32 4294901760, %v11744_v62  ;;  %v3834_v57 = vand.u32 4294901760, %v3833_v27 }
 0x299   : > { %7288 = vmatpush.msk.msra.mxu3 %vm477_vm13, %v15642_v30  ;;  %3589 = vmatpush.msrb.mxu0 %v11329_v29  ;;  %v6655_v29 = vsel %vm269_vm11, 1.0, %v15580_v25  ;;  %v3839_v42 = vsub.f32 %v11708_v63, %v15418_v6  ;;  %v15405_v61 = vand.u32 4294901760, %v11780_v55 }
 0x29a   : > { %3811 = vmatpush.msra.mxu1 %v3810_v20  ;;  %3592 = vmatmul.f32.vlgmr.msrb.gmra.mxu0 %v15686_v48  ;;  %v6639_v20 = vsel %vm253_vm5, 1.0, %v15580_v25  ;;  %v11802_v44 = vsub.f32 %v6655_v29, %v6655_v29  ;;  %v3846_v29 = vand.u32 4294901760, %v3845_v24 }
 0x29b   : > { %3894 = vmatpush.msra.mxu2 %v11577_v21  ;;  %7271 = vmatpush.msk.msra.mxu0 %vm493_vm1, %v15642_v30  ;;  %v3840_v45 = vand.u32 4294901760, %v3839_v42  ;;  %v11817_v27 = vsub.f32 %v6639_v20, %v6639_v20 }
 0x29c   : > { %7289 = vmatpush.msk.msra.mxu3 %vm15403_vm9, %v15642_v30  ;;  %3817 = vmatpush.msra.mxu1 %v3816_v38  ;;  %v15408_v38 = vand.u32 4294901760, %v11759_v28  ;;  %v15407_v42 = vand.u32 4294901760, %v11802_v44 }
 0x29d   : > { %3897 = vmatpush.msra.mxu2 %v11600_v54  ;;  %7272 = vmatpush.msk.msra.mxu0 %vm477_vm13, %v15642_v30  ;;  %v15412_v24 = vand.u32 4294901760, %v11817_v27 }
 0x29e   : > { %7290 = vmatpush.msk.msra.mxu3 %vm15404_vm6, %v15642_v30  ;;  %3823 = vmatpush.msra.mxu1 %v3822_v4  ;;  %v3851_v4 = vsub.f32 %v11744_v62, %v15414_v58 }
 0x29f   : > { %3900 = vmatpush.msra.mxu2 %v11623_v23  ;;  %7273 = vmatpush.msk.msra.mxu0 %vm15403_vm9, %v15642_v30  ;;  %vm15426_vm9 = vcmp.eq.s32.totalorder %v7994_v8, %v11783_v5 }
 0x2a0   : > { %7291 = vmatpush.msk.msra.mxu3 %vm429_vm10, %v15642_v30  ;;  %3829 = vmatpush.msra.mxu1 %v3828_v16  ;;  %v3857_v16 = vsub.f32 %v11759_v28, %v15408_v38  ;;  %v3852_v20 = vand.u32 4294901760, %v3851_v4 }
 0x2a1   : > { %3903 = vmatpush.msra.mxu2 %v11642_v19  ;;  %7274 = vmatpush.msk.msra.mxu0 %vm15404_vm6, %v15642_v30  ;;  %vm15430_vm6 = vcmp.eq.s32.totalorder %v7997_v9, %v11783_v5 }
 0x2a2   : > { %7292 = vmatpush.msk.msra.mxu3 %vm15406_vm7, %v15642_v30  ;;  %3835 = vmatpush.msra.mxu1 %v3834_v57  ;;  %v3863_v57 = vsub.f32 %v11780_v55, %v15405_v61  ;;  %v3858_v4 = vand.u32 4294901760, %v3857_v16  ;;  %v3869_v61 = vsub.f32 %v11802_v44, %v15407_v42  ;;  %v3875_v42 = vsub.f32 %v11817_v27, %v15412_v24 }
 0x2a3   : > { %3906 = vmatpush.msra.mxu2 %v11672_v22  ;;  %7275 = vmatpush.msk.msra.mxu0 %vm429_vm10, %v15642_v30 }
 0x2a4   : > { %7293 = vmatpush.msk.msra.mxu3 %vm15409_vm4, %v15642_v30  ;;  %3841 = vmatpush.msra.mxu1 %v3840_v45  ;;  %v6880_v45 = vsel %vm15426_vm9, 1.0, %v15580_v25  ;;  %v3864_v16 = vand.u32 4294901760, %v3863_v57 }
 0x2a5   : > { %3909 = vmatpush.msra.mxu2 %v11690_v37  ;;  %7276 = vmatpush.msk.msra.mxu0 %vm15406_vm7, %v15642_v30  ;;  %vm462_vm7 = vcmp.eq.s32.totalorder %v8000_v10, %v11783_v5  ;;  %v11883_v38 = vsub.f32 %v6880_v45, %v6880_v45 }
 0x2a6   : > { %7294 = vmatpush.msk.msra.mxu3 %vm15410_vm2, %v15642_v30  ;;  %3847 = vmatpush.msra.mxu1 %v3846_v29  ;;  %v6864_v29 = vsel %vm15430_vm6, 1.0, %v15580_v25  ;;  %v6848_v45 = vsel %vm462_vm7, 1.0, %v15580_v25 }
 0x2a7   : > { %3912 = vmatpush.msra.mxu2 %v11708_v63  ;;  %7277 = vmatpush.msk.msra.mxu0 %vm15409_vm4, %v15642_v30  ;;  %vm15435_vm4 = vcmp.eq.s32.totalorder %v8003_v11, %v11783_v5  ;;  %v11896_v57 = vsub.f32 %v6864_v29, %v6864_v29 }
 0x2a8   : > { %7295 = vmatpush.msk.msra.mxu3 %vm15411_vm8, %v15642_v30  ;;  %3853 = vmatpush.msra.mxu1 %v3852_v20  ;;  %v3870_v20 = vand.u32 4294901760, %v3869_v61  ;;  %v3876_v61 = vand.u32 4294901760, %v3875_v42  ;;  %v6832_v29 = vsel %vm15435_vm4, 1.0, %v15580_v25 }
 0x2a9   : > { %3915 = vmatpush.msra.mxu2 %v11726_v39  ;;  %7278 = vmatpush.msk.msra.mxu0 %vm15410_vm2, %v15642_v30  ;;  %vm15437_vm2 = vcmp.eq.s32.totalorder %v8006_v12, %v11783_v5  ;;  %v15419_v24 = vand.u32 4294901760, %v11896_v57 }
 0x2aa   : > { %7296 = vmatpush.msk.msra.mxu3 %vm15413_vm15, %v15642_v30  ;;  %3859 = vmatpush.msra.mxu1 %v3858_v4  ;;  %v15417_v4 = vand.u32 4294901760, %v11883_v38  ;;  %v6816_v42 = vsel %vm15437_vm2, 1.0, %v15580_v25 }
 0x2ab   : > { %3918 = vmatpush.msra.mxu2 %v11744_v62  ;;  %7279 = vmatpush.msk.msra.mxu0 %vm15411_vm8, %v15642_v30  ;;  %vm15438_vm8 = vcmp.eq.s32.totalorder %v8009_v13, %v11783_v5  ;;  %v11952_v58 = vsub.f32 %v6816_v42, %v6816_v42 }
 0x2ac   : > { %7297 = vmatpush.msk.msra.mxu3 %vm15416_vm12, %v15642_v30  ;;  %3865 = vmatpush.msra.mxu1 %v3864_v16  ;;  %v11926_v16 = vsub.f32 %v6848_v45, %v6848_v45  ;;  %v11944_v45 = vsub.f32 %v6832_v29, %v6832_v29  ;;  %v6800_v32 = vsel %vm15438_vm8, 1.0, %v15580_v25  ;;  %v4132_v29 = vsub.f32 %v11896_v57, %v15419_v24 }
 0x2ad   : > { %3921 = vmatpush.msra.mxu2 %v11759_v28  ;;  %7280 = vmatpush.msk.msra.mxu0 %vm15413_vm15, %v15642_v30  ;;  %vm398_vm15 = vcmp.eq.s32.totalorder %v8012_v14, %v11783_v5  ;;  %v11987_v6 = vsub.f32 %v6800_v32, %v6800_v32  ;;  %v15431_v18 = vand.u32 4294901760, %v11952_v58 }
 0x2ae   : > { %7298 = vmatpush.msk.msra.mxu3 %vm15420_vm0, %v15642_v30  ;;  %3871 = vmatpush.msra.mxu1 %v3870_v20  ;;  %v4126_v20 = vsub.f32 %v11883_v38, %v15417_v4  ;;  %v6784_v42 = vsel %vm398_vm15, 1.0, %v15580_v25  ;;  %v15427_v4 = vand.u32 4294901760, %v11944_v45 }
 0x2af   : > { %3924 = vmatpush.msra.mxu2 %v11780_v55  ;;  %7281 = vmatpush.msk.msra.mxu0 %vm15416_vm12, %v15642_v30  ;;  %vm382_vm12 = vcmp.eq.s32.totalorder %v8015_v15, %v11783_v5  ;;  %v12012_v40 = vsub.f32 %v6784_v42, %v6784_v42 }
 0x2b0   : > { %7299 = vmatpush.msk.msra.mxu3 %vm301_vm3, %v15642_v30  ;;  %3877 = vmatpush.msra.mxu1 %v3876_v61  ;;  %v15425_v61 = vand.u32 4294901760, %v11926_v16  ;;  %v6768_v24 = vsel %vm382_vm12, 1.0, %v15580_v25  ;;  %v4127_v43 = vand.u32 4294901760, %v4126_v20  ;;  %v4133_v20 = vand.u32 4294901760, %v4132_v29 }
 0x2b1   : > { %3927 = vmatpush.msra.mxu2 %v11802_v44  ;;  %7282 = vmatpush.msk.msra.mxu0 %vm15420_vm0, %v15642_v30  ;;  %vm366_vm0 = vcmp.eq.s32.totalorder %v8072_v26, %v11783_v5  ;;  %v12024_v41 = vsub.f32 %v6768_v24, %v6768_v24  ;;  %v15434_v29 = vand.u32 4294901760, %v11987_v6  ;;  %v4150_v24 = vsub.f32 %v11952_v58, %v15431_v18 }
 0x2b2   : > { %7300 = vmatpush.msk.msra.mxu3 %vm285_vm14, %v15642_v30  ;;  %3879 = vmatmul.f32.vlgmr.msra.gmra.mxu1 %v8738_v47  ;;  %v4138_v32 = vsub.f32 %v11926_v16, %v15425_v61  ;;  %v6752_v42 = vsel %vm366_vm0, 1.0, %v15580_v25  ;;  %v4144_v61 = vsub.f32 %v11944_v45, %v15427_v4  ;;  %v15436_v2 = vand.u32 4294901760, %v12012_v40 }
 0x2b3   : > { %3930 = vmatpush.msra.mxu2 %v11817_v27  ;;  %7303 = vmatpush.msk.msrb.mxu1 %vm493_vm1, %v15642_v30  ;;  %vm350_vm1 = vcmp.eq.s32.totalorder %v8150_v50, %v11783_v5  ;;  %v12061_v59 = vsub.f32 %v6752_v42, %v6752_v42  ;;  %v4151_v36 = vand.u32 4294901760, %v4150_v24  ;;  %v15734_v60 = vand.u32 4294901760, %v12024_v41 }
 0x2b4   : > { %7283 = vmatpush.msk.msra.mxu0 %vm301_vm3, %v15642_v30  ;;  %7301 = vmatpush.msk.msra.mxu3 %vm269_vm11, %v15642_v30  ;;  %v6736_v4 = vsel %vm350_vm1, 1.0, %v15580_v25  ;;  %v4145_v42 = vand.u32 4294901760, %v4144_v61 }
 0x2b5   : > { %3933 = vmatmul.f32.vlgmr.msra.gmra.mxu2 %v15686_v48  ;;  %7304 = vmatpush.msk.msrb.mxu1 %vm477_vm13, %v15642_v30  ;;  %vm15731_vm13 = vcmp.eq.s32.totalorder %v8000_v10, %v11438_v46  ;;  %v12085_v0 = vsub.f32 %v6736_v4, %v6736_v4  ;;  %v4162_v4 = vsub.f32 %v12012_v40, %v15436_v2 }
 0x2b6   : > { %7319 = vmatpush.msk.msrb.mxu2 %vm15426_vm9, %v15642_v30  ;;  %7284 = vmatpush.msk.msra.mxu0 %vm285_vm14, %v15642_v30  ;;  %vm334_vm9 = vcmp.eq.s32.totalorder %v8153_v51, %v11783_v5 }
 0x2b7   : > { %7302 = vmatpush.msk.msra.mxu3 %vm253_vm5, %v15642_v30  ;;  %7305 = vmatpush.msk.msrb.mxu1 %vm15731_vm13, %v15642_v30  ;;  %vm15732_vm13 = vcmp.eq.s32.totalorder %v8003_v11, %v11438_v46 }
 0x2b8   : > { %3972 = vmatmul.f32.vlgmr.msra.gmra.mxu3 %v8750_v49  ;;  %7320 = vmatpush.msk.msrb.mxu2 %vm15430_vm6, %v15642_v30  ;;  %vm318_vm6 = vcmp.eq.s32.totalorder %v8156_v52, %v11783_v5 }
 0x2b9   : > { %4128 = vmatpush.msrb.mxu3 %v4127_v43  ;;  %7285 = vmatpush.msk.msra.mxu0 %vm269_vm11, %v15642_v30  ;;  %v4139_v43 = vand.u32 4294901760, %v4138_v32  ;;  %v6720_v32 = vsel %vm334_vm9, 1.0, %v15580_v25  ;;  %v6704_v61 = vsel %vm318_vm6, 1.0, %v15580_v25 }
 0x2ba   : > { %7306 = vmatpush.msk.msrb.mxu1 %vm15732_vm13, %v15642_v30  ;;  %7321 = vmatpush.msk.msrb.mxu2 %vm462_vm7, %v15642_v30  ;;  %vm302_vm13 = vcmp.eq.s32.totalorder %v8234_v31, %v11783_v5  ;;  %v12104_v18 = vsub.f32 %v6720_v32, %v6720_v32 }
 0x2bb   : > { %4134 = vmatpush.msrb.mxu3 %v4133_v20  ;;  %7286 = vmatpush.msk.msra.mxu0 %vm253_vm5, %v15642_v30  ;;  %v4156_v20 = vsub.f32 %v11987_v6, %v15434_v29  ;;  %v6688_v24 = vsel %vm302_vm13, 1.0, %v15580_v25  ;;  %v12126_v29 = vsub.f32 %v6704_v61, %v6704_v61  ;;  %v15738_v61 = vand.u32 4294901760, %v12061_v59 }
 0x2bc   : > { %7307 = vmatpush.msk.msrb.mxu1 %vm429_vm10, %v15642_v30  ;;  %3778 = vmatmul.f32.vlgmr.msra.gmra.mxu0 %v8771_v33  ;;  %vm286_vm10 = vcmp.eq.s32.totalorder %v8247_v34, %v11783_v5  ;;  %v12148_v2 = vsub.f32 %v6688_v24, %v6688_v24 }
 0x2bd   : > { %7322 = vmatpush.msk.msrb.mxu2 %vm15435_vm4, %v15642_v30  ;;  %3979 = vmatpush.msrb.mxu0 %v3784_v53  ;;  %vm15733_vm4 = vcmp.eq.s32.totalorder %v8009_v13, %v11438_v46  ;;  %v4168_v53 = vsub.f32 %v12024_v41, %v15734_v60  ;;  %v4157_v32 = vand.u32 4294901760, %v4156_v20  ;;  %v4163_v20 = vand.u32 4294901760, %v4162_v4 }
 0x2be   : > { %4140 = vmatpush.msrb.mxu3 %v4139_v43  ;;  %7308 = vmatpush.msk.msrb.mxu1 %vm15733_vm4, %v15642_v30  ;;  %v15735_v43 = vand.u32 4294901760, %v11537_v1  ;;  %vm15736_vm4 = vcmp.eq.s32.totalorder %v8012_v14, %v11438_v46  ;;  %v6672_v1 = vsel %vm286_vm10, 1.0, %v15580_v25  ;;  %v4174_v60 = vsub.f32 %v12061_v59, %v15738_v61 }
 0x2bf   : > { %7323 = vmatpush.msk.msrb.mxu2 %vm15437_vm2, %v15642_v30  ;;  %vm270_vm2 = vcmp.eq.s32.totalorder %v8250_v35, %v11783_v5  ;;  %v15741_v4 = vand.u32 4294901760, %v12085_v0  ;;  %v12166_v61 = vsub.f32 %v6672_v1, %v6672_v1 }
 0x2c0   : > { %3983 = vmatpush.msrb.mxu0 %v15735_v43  ;;  %4146 = vmatpush.msrb.mxu3 %v4145_v42  ;;  %v15737_v42 = vand.u32 4294901760, %v11557_v17  ;;  %v15439_v43 = vand.u32 4294901760, %v12104_v18  ;;  %v4169_v17 = vand.u32 4294901760, %v4168_v53  ;;  %v6656_v53 = vsel %vm270_vm2, 1.0, %v15580_v25 }
 0x2c1   : > { %7309 = vmatpush.msk.msrb.mxu1 %vm15736_vm4, %v15642_v30  ;;  %7324 = vmatpush.msk.msrb.mxu2 %vm15438_vm8, %v15642_v30  ;;  %vm15739_vm4 = vcmp.eq.s32.totalorder %v8015_v15, %v11438_v46  ;;  %vm254_vm8 = vcmp.eq.s32.totalorder %v7991_v7, %v11783_v5  ;;  %v4180_v24 = vsub.f32 %v12085_v0, %v15741_v4 }
 0x2c2   : > { %3987 = vmatpush.msrb.mxu0 %v15737_v42  ;;  %4152 = vmatpush.msrb.mxu3 %v4151_v36  ;;  %v15740_v36 = vand.u32 4294901760, %v11577_v21  ;;  %v4191_v42 = vand.u32 4294901760, %v12126_v29  ;;  %v15743_v21 = vand.u32 4294901760, %v11600_v54  ;;  %v4186_v1 = vsub.f32 %v12104_v18, %v15439_v43 }
 0x2c3   : > { %7310 = vmatpush.msk.msrb.mxu1 %vm15739_vm4, %v15642_v30  ;;  %7325 = vmatpush.msk.msrb.mxu2 %vm398_vm15, %v15642_v30  ;;  %vm15742_vm4 = vcmp.eq.s32.totalorder %v8072_v26, %v11438_v46  ;;  %v6640_v4 = vsel %vm254_vm8, 1.0, %v15580_v25  ;;  %v12198_v54 = vsub.f32 %v6656_v53, %v6656_v53  ;;  %v4203_v43 = vand.u32 4294901760, %v12166_v61 }
 0x2c4   : > { %3991 = vmatpush.msrb.mxu0 %v15740_v36  ;;  %4158 = vmatpush.msrb.mxu3 %v4157_v32  ;;  %v4175_v32 = vand.u32 4294901760, %v4174_v60  ;;  %v4197_v36 = vand.u32 4294901760, %v12148_v2  ;;  %v4181_v60 = vand.u32 4294901760, %v4180_v24  ;;  %v4187_v24 = vand.u32 4294901760, %v4186_v1 }
 0x2c5   : > { %7311 = vmatpush.msk.msrb.mxu1 %vm15742_vm4, %v15642_v30  ;;  %7326 = vmatpush.msk.msrb.mxu2 %vm382_vm12, %v15642_v30  ;;  %vm15744_vm4 = vcmp.eq.s32.totalorder %v8150_v50, %v11438_v46  ;;  %v4204_v1 = vsub.f32 %v12166_v61, %v4203_v43 }
 0x2c6   : > { %3995 = vmatpush.msrb.mxu0 %v15743_v21  ;;  %4164 = vmatpush.msrb.mxu3 %v4163_v20  ;;  %v15745_v20 = vand.u32 4294901760, %v11623_v23  ;;  %v4192_v21 = vsub.f32 %v12126_v29, %v4191_v42  ;;  %v12214_v23 = vsub.f32 %v6640_v4, %v6640_v4  ;;  %v4198_v53 = vsub.f32 %v12148_v2, %v4197_v36 }
 0x2c7   : > { %7312 = vmatpush.msk.msrb.mxu1 %vm15744_vm4, %v15642_v30  ;;  %7327 = vmatpush.msk.msrb.mxu2 %vm366_vm0, %v15642_v30  ;;  %vm15746_vm4 = vcmp.eq.s32.totalorder %v8153_v51, %v11438_v46  ;;  %v4209_v4 = vand.u32 4294901760, %v12198_v54 }
 0x2c8   : > { %3999 = vmatpush.msrb.mxu0 %v15745_v20  ;;  %4170 = vmatpush.msrb.mxu3 %v4169_v17  ;;  %v15747_v17 = vand.u32 4294901760, %v11642_v19  ;;  %v15749_v19 = vand.u32 4294901760, %v11672_v22  ;;  %v15441_v20 = vand.u32 4294901760, %v12214_v23  ;;  %v15750_v22 = vand.u32 4294901760, %v11690_v37 }
 0x2c9   : > { %7313 = vmatpush.msk.msrb.mxu1 %vm15746_vm4, %v15642_v30  ;;  %7328 = vmatpush.msk.msrb.mxu2 %vm350_vm1, %v15642_v30  ;;  %vm15748_vm4 = vcmp.eq.s32.totalorder %v8156_v52, %v11438_v46  ;;  %v4205_v37 = vand.u32 4294901760, %v4204_v1  ;;  %v15755_v46 = vand.u32 4294901760, %v11759_v28  ;;  %v12302_v1 = vpop.f32.mrf.mxu1  ;;  %v12311_v28 = vpop.f32.mrf.mxu3 }
 0x2ca   : > { %4003 = vmatpush.msrb.mxu0 %v15747_v17  ;;  %4176 = vmatpush.msrb.mxu3 %v4175_v32  ;;  %v4193_v32 = vand.u32 4294901760, %v4192_v21  ;;  %v4210_v21 = vsub.f32 %v12198_v54, %v4209_v4  ;;  %v15751_v17 = vand.u32 4294901760, %v11708_v63 }
 0x2cb   : > { %7314 = vmatpush.msk.msrb.mxu1 %vm15748_vm4, %v15642_v30  ;;  %7329 = vmatpush.msk.msrb.mxu2 %vm334_vm9, %v15642_v30 }
 0x2cc   : > { %4007 = vmatpush.msrb.mxu0 %v15749_v19  ;;  %4182 = vmatpush.msrb.mxu3 %v4181_v60  ;;  %v4199_v60 = vand.u32 4294901760, %v4198_v53  ;;  %v15752_v53 = vand.u32 4294901760, %v11726_v39  ;;  %v4211_v63 = vand.u32 4294901760, %v4210_v21  ;;  %v15753_v19 = vand.u32 4294901760, %v11744_v62 }
 0x2cd   : > { %7315 = vmatpush.msk.msrb.mxu1 %vm301_vm3, %v15642_v30  ;;  %7330 = vmatpush.msk.msrb.mxu2 %vm318_vm6, %v15642_v30  ;;  %vm15754_vm3 = vcmp.eq.s32.totalorder %v7994_v8, %v11783_v5  ;;  %v15757_v62 = vand.u32 4294901760, %v11883_v38  ;;  %v15761_v21 = vand.u32 4294901760, %v11802_v44 }
 0x2ce   : > { %4011 = vmatpush.msrb.mxu0 %v15750_v22  ;;  %4188 = vmatpush.msrb.mxu3 %v4187_v24  ;;  %v4216_v24 = vsub.f32 %v12214_v23, %v15441_v20  ;;  %v15758_v22 = vand.u32 4294901760, %v11780_v55  ;;  %v12319_v55 = vpop.f32.mrf.mxu2 }
 0x2cf   : > { %7316 = vmatpush.msk.msrb.mxu1 %vm285_vm14, %v15642_v30  ;;  %7331 = vmatpush.msk.msrb.mxu2 %vm302_vm13, %v15642_v30  ;;  %vm15756_vm14 = vcmp.eq.s32.totalorder %v7997_v9, %v11783_v5 }
 0x2d0   : > { %4015 = vmatpush.msrb.mxu0 %v15751_v17  ;;  %4194 = vmatpush.msrb.mxu3 %v4193_v32  ;;  %v4217_v39 = vand.u32 4294901760, %v4216_v24  ;;  %v12293_v32 = vpop.f32.mrf.mxu0  ;;  %v12328_v17 = vperm.slane %v11418_v56, 2  ;;  %vm15764_vm4 = vmmov %vm15756_vm14  ;;  %v15765_v24 = vand.u32 4294901760, %v11817_v27 }
 0x2d1   : > { %7317 = vmatpush.msk.msrb.mxu1 %vm269_vm11, %v15642_v30  ;;  %7332 = vmatpush.msk.msrb.mxu2 %vm286_vm10, %v15642_v30  ;;  %vm15760_vm11 = vmmov %vm15754_vm3  ;;  %v12352_v27 = vpop.f32.mrf.mxu1 }
 0x2d2   : > { %4019 = vmatpush.msrb.mxu0 %v15752_v53  ;;  %4200 = vmatpush.msrb.mxu3 %v4199_v60  ;;  %v15759_v60 = vand.u32 4294901760, %v11896_v57  ;;  %v15767_v53 = vand.u32 4294901760, %v11944_v45 }
 0x2d3   : > { %7318 = vmatpush.msk.msrb.mxu1 %vm253_vm5, %v15642_v30  ;;  %7333 = vmatpush.msk.msrb.mxu2 %vm270_vm2, %v15642_v30  ;;  %vm15762_vm5 = vcmp.eq.s32.totalorder %v8003_v11, %v11783_v5 }
 0x2d4   : > { %4023 = vmatpush.msrb.mxu0 %v15753_v19  ;;  %4206 = vmatpush.msrb.mxu3 %v4205_v37  ;;  %v15763_v37 = vand.u32 4294901760, %v11926_v16  ;;  %v15770_v19 = vand.u32 4294901760, %v11987_v6 }
 0x2d5   : > { %4078 = vmatmul.f32.vlgmr.msrb.gmra.mxu1 %v8738_v47  ;;  %7334 = vmatpush.msk.msrb.mxu2 %vm254_vm8, %v15642_v30 }
 0x2d6   : > { %7335 = vmatpush.msk.msra.mxu1 %vm15754_vm3, %v15642_v30  ;;  %4027 = vmatpush.msrb.mxu0 %v15755_v46  ;;  %vm15766_vm3 = vcmp.eq.s32.totalorder %v8006_v12, %v11783_v5 }
 0x2d7   : > { %4212 = vmatpush.msrb.mxu3 %v4211_v63  ;;  %4119 = vmatmul.f32.vlgmr.msrb.gmra.mxu2 %v8771_v33  ;;  %v15769_v63 = vand.u32 4294901760, %v11952_v58 }
 0x2d8   : > { %7336 = vmatpush.msk.msra.mxu1 %vm15756_vm14, %v15642_v30  ;;  %4320 = vmatpush.msra.mxu2 %v15757_v62  ;;  %v12342_v44 = vpop.f32.mrf.mxu0  ;;  %vm15768_vm14 = vcmp.eq.s32.totalorder %v8009_v13, %v11783_v5  ;;  %v15774_v62 = vand.u32 4294901760, %v12024_v41 }
 0x2d9   : > { %4031 = vmatpush.msrb.mxu0 %v15758_v22  ;;  %4218 = vmatpush.msrb.mxu3 %v4217_v39  ;;  %v12375_v39 = vpop.f32.mrf.mxu2 }
 0x2da   : > { %4220 = vmatmul.f32.vlgmr.msrb.gmra.mxu3 %v8738_v47  ;;  %7337 = vmatpush.msk.msra.mxu1 %vm462_vm7, %v15642_v30 }
 0x2db   : > { %4324 = vmatpush.msra.mxu2 %v15759_v60  ;;  %7351 = vmatpush.msk.msra.mxu3 %vm15760_vm11, %v15642_v30  ;;  %vm495_vm11 = vcmp.eq.s32.totalorder %v7994_v8, %v12328_v17  ;;  %v12422_v60 = vpop.f32.mrf.mxu1 }
 0x2dc   : > { %4035 = vmatpush.msrb.mxu0 %v15761_v21  ;;  %7338 = vmatpush.msk.msra.mxu1 %vm15762_vm5, %v15642_v30  ;;  %v15775_v21 = vand.u32 4294901760, %v12061_v59 }
 0x2dd   : > { %4328 = vmatpush.msra.mxu2 %v15763_v37  ;;  %7352 = vmatpush.msk.msra.mxu3 %vm15764_vm4, %v15642_v30  ;;  %vm479_vm4 = vcmp.eq.s32.totalorder %v7997_v9, %v12328_v17 }
 0x2de   : > { %4039 = vmatpush.msrb.mxu0 %v15765_v24  ;;  %7339 = vmatpush.msk.msra.mxu1 %vm15766_vm3, %v15642_v30 }
 0x2df   : > { %4041 = vmatmul.f32.vlgmr.msrb.gmra.mxu0 %v8738_v47  ;;  %4332 = vmatpush.msra.mxu2 %v15767_v53  ;;  %v15777_v53 = vand.u32 4294901760, %v12085_v0 }
 0x2e0   : > { %4226 = vmatpush.msra.mxu0 %v11883_v38  ;;  %7353 = vmatpush.msk.msra.mxu3 %vm462_vm7, %v15642_v30  ;;  %v12367_v38 = vpop.f32.mrf.mxu3  ;;  %vm15771_vm7 = vmmov %vm15766_vm3  ;;  %v12401_v46 = vpop.f32.mrf.mxu0 }
 0x2e1   : > { %7340 = vmatpush.msk.msra.mxu1 %vm15768_vm14, %v15642_v30  ;;  %4336 = vmatpush.msra.mxu2 %v15769_v63  ;;  %vm15773_vm3 = vmmov %vm15768_vm14  ;;  %vm15455_vm14 = vcmp.eq.s32.totalorder %v8000_v10, %v12328_v17 }
 0x2e2   : > { %4229 = vmatpush.msra.mxu0 %v11896_v57  ;;  %7354 = vmatpush.msk.msra.mxu3 %vm15762_vm5, %v15642_v30  ;;  %v6881_v57 = vsel %vm495_vm11, 1.0, %v15580_v25  ;;  %vm15456_vm5 = vcmp.eq.s32.totalorder %v8003_v11, %v12328_v17 }
 0x2e3   : > { %7341 = vmatpush.msk.msra.mxu1 %vm398_vm15, %v15642_v30  ;;  %4340 = vmatpush.msra.mxu2 %v15770_v19  ;;  %v12409_v22 = vsub.f32 %v6881_v57, %v6881_v57  ;;  %v6833_v63 = vsel %vm15456_vm5, 1.0, %v15580_v25  ;;  %v12456_v19 = vpop.f32.mrf.mxu2 }
 0x2e4   : > { %4232 = vmatpush.msra.mxu0 %v11926_v16  ;;  %7355 = vmatpush.msk.msra.mxu3 %vm15771_vm7, %v15642_v30  ;;  %v15772_v16 = vand.u32 4294901760, %v12012_v40  ;;  %vm15477_vm7 = vcmp.eq.s32.totalorder %v8250_v35, %v12328_v17 }
 0x2e5   : > { %7342 = vmatpush.msk.msra.mxu1 %vm382_vm12, %v15642_v30 }
 0x2e6   : > { %4344 = vmatpush.msra.mxu2 %v15772_v16  ;;  %4235 = vmatpush.msra.mxu0 %v11944_v45  ;;  %v6865_v45 = vsel %vm479_vm4, 1.0, %v15580_v25  ;;  %v15779_v16 = vand.u32 4294901760, %v12104_v18 }
 0x2e7   : > { %7356 = vmatpush.msk.msra.mxu3 %vm15773_vm3, %v15642_v30  ;;  %7343 = vmatpush.msk.msra.mxu1 %vm366_vm0, %v15642_v30  ;;  %v12439_v37 = vsub.f32 %v6865_v45, %v6865_v45  ;;  %v12483_v45 = vsub.f32 %v6833_v63, %v6833_v63  ;;  %vm15458_vm3 = vcmp.eq.s32.totalorder %v7991_v7, %v12328_v17 }
 0x2e8   : > { %4348 = vmatpush.msra.mxu2 %v15774_v62  ;;  %4238 = vmatpush.msra.mxu0 %v11952_v58  ;;  %v6849_v58 = vsel %vm15455_vm14, 1.0, %v15580_v25  ;;  %v12443_v24 = vpop.f32.mrf.mxu3 }
 0x2e9   : > { %7357 = vmatpush.msk.msra.mxu3 %vm398_vm15, %v15642_v30  ;;  %7344 = vmatpush.msk.msra.mxu1 %vm350_vm1, %v15642_v30  ;;  %15776 = vst [vmem:[#allocation16_spill] sm:$0xff] %v12439_v37  ;;  %vm15457_vm15 = vcmp.eq.s32.totalorder %v8006_v12, %v12328_v17  ;;  %v12463_v57 = vsub.f32 %v6849_v58, %v6849_v58  ;;  %v15442_v62 = vand.u32 4294901760, %v12439_v37 }
 0x2ea   : > { %4352 = vmatpush.msra.mxu2 %v15775_v21  ;;  %4241 = vmatpush.msra.mxu0 %v11987_v6  ;;  %v15440_v6 = vand.u32 4294901760, %v12409_v22  ;;  %15780 = vst [vmem:[#allocation18_spill] sm:$0xff] %v12483_v45  ;;  %v12487_v21 = vpop.f32.mrf.mxu0 }
 0x2eb   : > { %7358 = vmatpush.msk.msra.mxu3 %vm382_vm12, %v15642_v30  ;;  %7345 = vmatpush.msk.msra.mxu1 %vm334_vm9, %v15642_v30  ;;  %15778 = vst [vmem:[#allocation17_spill] sm:$0xff] %v12463_v57  ;;  %vm15459_vm12 = vcmp.eq.s32.totalorder %v8009_v13, %v12328_v17  ;;  %v12545_v20 = vpop.f32.mrf.mxu2 }
 0x2ec   : > { %4356 = vmatpush.msra.mxu2 %v15777_v53  ;;  %4244 = vmatpush.msra.mxu0 %v12012_v40  ;;  %v6817_v40 = vsel %vm15457_vm15, 1.0, %v15580_v25  ;;  %v6801_v58 = vsel %vm15459_vm12, 1.0, %v15580_v25  ;;  %v15443_v53 = vand.u32 4294901760, %v12463_v57 }
 0x2ed   : > { %7359 = vmatpush.msk.msra.mxu3 %vm366_vm0, %v15642_v30  ;;  %7346 = vmatpush.msk.msra.mxu1 %vm318_vm6, %v15642_v30  ;;  %vm15460_vm0 = vcmp.eq.s32.totalorder %v8012_v14, %v12328_v17  ;;  %v12508_v63 = vsub.f32 %v6817_v40, %v6817_v40  ;;  %v12533_v40 = vsub.f32 %v6801_v58, %v6801_v58 }
 0x2ee   : > { %4360 = vmatpush.msra.mxu2 %v15779_v16  ;;  %4247 = vmatpush.msra.mxu0 %v12024_v41  ;;  %v4467_v41 = vsub.f32 %v12409_v22, %v15440_v6  ;;  %v4473_v16 = vsub.f32 %v12439_v37, %v15442_v62  ;;  %v4479_v58 = vsub.f32 %v12463_v57, %v15443_v53 }
 0x2ef   : > { %7360 = vmatpush.msk.msra.mxu3 %vm350_vm1, %v15642_v30  ;;  %7347 = vmatpush.msk.msra.mxu1 %vm302_vm13, %v15642_v30  ;;  %vm15464_vm1 = vcmp.eq.s32.totalorder %v8150_v50, %v12328_v17 }
 0x2f0   : > { %4364 = vmatpush.msra.mxu2 %v4191_v42  ;;  %4250 = vmatpush.msra.mxu0 %v12061_v59  ;;  %v12510_v42 = vpop.f32.mrf.mxu1  ;;  %v6785_v59 = vsel %vm15460_vm0, 1.0, %v15580_v25  ;;  %v12535_v6 = vpop.f32.mrf.mxu3 }
 0x2f1   : > { %7361 = vmatpush.msk.msra.mxu3 %vm334_vm9, %v15642_v30  ;;  %7348 = vmatpush.msk.msra.mxu1 %vm286_vm10, %v15642_v30  ;;  %vm15461_vm9 = vcmp.eq.s32.totalorder %v8015_v15, %v12328_v17 }
 0x2f2   : > { %4368 = vmatpush.msra.mxu2 %v4197_v36  ;;  %4253 = vmatpush.msra.mxu0 %v12085_v0  ;;  %v15446_v36 = vand.u32 4294901760, %v12483_v45  ;;  %v4468_v0 = vand.u32 4294901760, %v4467_v41  ;;  %v6769_v41 = vsel %vm15461_vm9, 1.0, %v15580_v25  ;;  %v12583_v62 = vpop.f32.mrf.mxu0 }
 0x2f3   : > { %7362 = vmatpush.msk.msra.mxu3 %vm318_vm6, %v15642_v30  ;;  %7349 = vmatpush.msk.msra.mxu1 %vm270_vm2, %v15642_v30  ;;  %vm367_vm6 = vcmp.eq.s32.totalorder %v8072_v26, %v12328_v17  ;;  %v12588_v33 = vsub.f32 %v6769_v41, %v6769_v41 }
 0x2f4   : > { %4372 = vmatpush.msra.mxu2 %v4203_v43  ;;  %4256 = vmatpush.msra.mxu0 %v12104_v18  ;;  %v12556_v43 = vsub.f32 %v6785_v59, %v6785_v59  ;;  %v4474_v18 = vand.u32 4294901760, %v4473_v16  ;;  %v4485_v59 = vsub.f32 %v12483_v45, %v15446_v36  ;;  %v4480_v16 = vand.u32 4294901760, %v4479_v58 }
 0x2f5   : > { %7363 = vmatpush.msk.msra.mxu3 %vm302_vm13, %v15642_v30  ;;  %7350 = vmatpush.msk.msra.mxu1 %vm254_vm8, %v15642_v30  ;;  %vm15466_vm13 = vcmp.eq.s32.totalorder %v8153_v51, %v12328_v17  ;;  %v15782_v36 = vand.u32 4294901760, %v12508_v63  ;;  %v15784_v58 = vand.u32 4294901760, %v12533_v40 }
 0x2f6   : > { %4376 = vmatpush.msra.mxu2 %v4209_v4  ;;  %4259 = vmatpush.msra.mxu0 %v12126_v29  ;;  %v6753_v4 = vsel %vm367_vm6, 1.0, %v15580_v25  ;;  %v15781_v29 = vand.u32 4294901760, %v12214_v23 }
 0x2f7   : > { %7364 = vmatpush.msk.msra.mxu3 %vm286_vm10, %v15642_v30  ;;  %4313 = vmatmul.f32.vlgmr.msra.gmra.mxu1 %v8750_v49  ;;  %v4491_v53 = vsub.f32 %v12508_v63, %v15782_v36  ;;  %vm319_vm10 = vcmp.eq.s32.totalorder %v8156_v52, %v12328_v17  ;;  %v2176_v36 = vadd.f32 %v12367_v38, %v12375_v39  ;;  %v15449_v38 = vand.u32 4294901760, %v12588_v33 }
 0x2f8   : > { %4380 = vmatpush.msra.mxu2 %v15781_v29  ;;  %4469 = vmatpush.msrb.mxu1 %v4468_v0  ;;  %v6737_v29 = vsel %vm15464_vm1, 1.0, %v15580_v25  ;;  %v12601_v41 = vpop.f32.mrf.mxu1  ;;  %v4486_v0 = vand.u32 4294901760, %v4485_v59  ;;  %v4497_v3 = vsub.f32 %v12533_v40, %v15784_v58  ;;  %v1835_v49 = vadd.f32 %v12302_v1, %v12293_v32  ;;  %v2756_v59 = vpop.f32.mrf.mxu2 }
 0x2f9   : > { %4262 = vmatpush.msra.mxu0 %v12148_v2  ;;  %15783 = vst [vmem:[#allocation19_spill] sm:$0xff] %v12601_v41  ;;  %7365 = vmatpush.msk.msra.mxu3 %vm270_vm2, %v15642_v30  ;;  %v12608_v2 = vsub.f32 %v6753_v4, %v6753_v4  ;;  %v6721_v4 = vsel %vm15466_vm13, 1.0, %v15580_v25  ;;  %v12624_v41 = vpop.f32.mrf.mxu3  ;;  %v12632_v39 = vsub.f32 %v6737_v29, %v6737_v29  ;;  %v4492_v32 = vand.u32 4294901760, %v4491_v53 }
 0x2fa   : > { %4382 = vmatmul.f32.vlgmr.msra.gmra.mxu2 %v8738_v47  ;;  %4475 = vmatpush.msrb.mxu1 %v4474_v18  ;;  %vm15470_vm2 = vcmp.eq.s32.totalorder %v8234_v31, %v12328_v17  ;;  %v2230_v18 = vadd.f32 %v12401_v46, %v2176_v36  ;;  %v6705_v5 = vsel %vm319_vm10, 1.0, %v15580_v25  ;;  %v4498_v53 = vand.u32 4294901760, %v4497_v3  ;;  %v2911_v36 = vpop.f32.mrf.mxu0 }
 0x2fb   : > { %4567 = vmatpush.msrb.mxu2 %v12409_v22  ;;  %4265 = vmatpush.msra.mxu0 %v12166_v61  ;;  %v15785_v61 = vand.u32 4294901760, %v12556_v43  ;;  %v6689_v29 = vsel %vm15470_vm2, 1.0, %v15580_v25  ;;  %v4509_v58 = vsub.f32 %v12588_v33, %v15449_v38  ;;  %v12669_v3 = vsub.f32 %v6705_v5, %v6705_v5 }
 0x2fc   : > { %7366 = vmatpush.msk.msra.mxu3 %vm254_vm8, %v15642_v30  ;;  %4481 = vmatpush.msrb.mxu1 %v4480_v16  ;;  %v12651_v16 = vsub.f32 %v6721_v4, %v6721_v4  ;;  %vm15478_vm8 = vcmp.eq.s32.totalorder %v8247_v34, %v12328_v17  ;;  %v2269_v4 = vadd.f32 %v12422_v60, %v2230_v18  ;;  %v15786_v5 = vand.u32 4294901760, %v12608_v2 }
 0x2fd   : > { %4419 = vmatmul.f32.vlgmr.msra.gmra.mxu3 %v8738_v47  ;;  %v4503_v1 = vsub.f32 %v12556_v43, %v15785_v61  ;;  %4570 = vmatpush.msrb.mxu2 %v12439_v37  ;;  %v6673_v38 = vsel %vm15478_vm8, 1.0, %v15580_v25  ;;  %v12693_v60 = vperm.slane %v11418_v56, 3  ;;  %v6657_v18 = vsel %vm15477_vm7, 1.0, %v15580_v25 }
 0x2fe   : > { %7383 = vmatpush.msk.msrb.mxu3 %vm495_vm11, %v15642_v30  ;;  %4268 = vmatpush.msra.mxu0 %v12198_v54  ;;  %v15485_v54 = vand.u32 4294901760, %v12632_v39 }
 0x2ff   : > { %4487 = vmatpush.msrb.mxu1 %v4486_v0  ;;  %4573 = vmatpush.msrb.mxu2 %v12463_v57  ;;  %v1889_v0 = vadd.f32 %v12319_v55, %v1835_v49  ;;  %v4504_v61 = vand.u32 4294901760, %v4503_v1  ;;  %v4515_v49 = vsub.f32 %v12608_v2, %v15786_v5  ;;  %v4510_v1 = vand.u32 4294901760, %v4509_v58 }
 0x300   : > { %7384 = vmatpush.msk.msrb.mxu3 %vm479_vm4, %v15642_v30  ;;  %4271 = vmatpush.msra.mxu0 %v12214_v23  ;;  %v12680_v46 = vpop.f32.mrf.mxu1  ;;  %v12688_v23 = vsub.f32 %v6689_v29, %v6689_v29  ;;  %v4521_v29 = vsub.f32 %v12632_v39, %v15485_v54  ;;  %v15483_v5 = vand.u32 4294901760, %v12669_v3  ;;  %v12714_v55 = vsub.f32 %v6673_v38, %v6673_v38  ;;  %v12720_v37 = vpop.f32.mrf.mxu2 }
 0x301   : > { %4493 = vmatpush.msrb.mxu1 %v4492_v32  ;;  %4274 = vmatmul.f32.vlgmr.msra.gmra.mxu0 %v15686_v48  ;;  %v12707_v32 = vpop.f32.mrf.mxu3  ;;  %v1928_v56 = vadd.f32 %v12311_v28, %v1889_v0  ;;  %v2517_v57 = vadd.f32 %v12510_v42, %v12487_v21  ;;  %v6641_v28 = vsel %vm15458_vm3, 1.0, %v15580_v25  ;;  %v15787_v21 = vand.u32 4294901760, %v12651_v16 }
 0x302   : > { %4576 = vmatpush.msrb.mxu2 %v12483_v45  ;;  %7367 = vmatpush.msk.msrb.mxu0 %vm495_vm11, %v15642_v30  ;;  %v2338_v45 = vadd.f32 %v12456_v19, %v2269_v4  ;;  %v4516_v19 = vand.u32 4294901760, %v4515_v49  ;;  %v15482_v38 = vand.u32 4294901760, %v12688_v23  ;;  %v2858_v0 = vadd.f32 %v12624_v41, %v2756_v59  ;;  %v3097_v4 = vpop.f32.mrf.mxu0 }
 0x303   : > { %7385 = vmatpush.msk.msrb.mxu3 %vm15455_vm14, %v15642_v30  ;;  %4499 = vmatpush.msrb.mxu1 %v4498_v53  ;;  %v4527_v42 = vsub.f32 %v12651_v16, %v15787_v21  ;;  %v12739_v53 = vsub.f32 %v6657_v18, %v6657_v18  ;;  %v1997_v58 = vadd.f32 %v12342_v44, %v1928_v56  ;;  %v15473_v44 = vand.u32 4294901760, %v12714_v55 }
 0x304   : > { %4579 = vmatpush.msrb.mxu2 %v12508_v63  ;;  %7368 = vmatpush.msk.msrb.mxu0 %vm479_vm4, %v15642_v30  ;;  %v4533_v56 = vsub.f32 %v12669_v3, %v15483_v5  ;;  %v12756_v41 = vsub.f32 %v6641_v28, %v6641_v28  ;;  %v2375_v59 = vadd.f32 %v12443_v24, %v2338_v45  ;;  %vm15463_vm3 = vcmask 1042434  }
 0x305   : > { %7386 = vmatpush.msk.msrb.mxu3 %vm15456_vm5, %v15642_v30  ;;  %4505 = vmatpush.msrb.mxu1 %v4504_v61  ;;  %v4522_v61 = vand.u32 4294901760, %v4521_v29  ;;  %v2571_v49 = vadd.f32 %v12545_v20, %v2517_v57  ;;  %v2912_v18 = vadd.f32 %v2911_v36, %v2858_v0  ;;  %v4528_v29 = vand.u32 4294901760, %v4527_v42 }
 0x306   : > { %4582 = vmatpush.msrb.mxu2 %v12533_v40  ;;  %7369 = vmatpush.msk.msrb.mxu0 %vm15455_vm14, %v15642_v30  ;;  %v4539_v20 = vsub.f32 %v12688_v23, %v15482_v38  ;;  %v15468_v24 = vand.u32 4294901760, %v12739_v53  ;;  %vm15476_vm14 = vcmp.eq.s32.totalorder %v7994_v8, %v12693_v60  ;;  %v2034_v57 = vadd.f32 %v12352_v27, %v1997_v58 }
 0x307   : > { %7387 = vmatpush.msk.msrb.mxu3 %vm15457_vm15, %v15642_v30  ;;  %4511 = vmatpush.msrb.mxu1 %v4510_v1  ;;  %v4534_v28 = vand.u32 4294901760, %v4533_v56  ;;  %v4545_v27 = vsub.f32 %v12714_v55, %v15473_v44  ;;  %v2610_v21 = vadd.f32 %v12535_v6, %v2571_v49  ;;  %v2951_v42 = vadd.f32 %v12680_v46, %v2912_v18 }
 0x308   : > { %4585 = vmatpush.msrb.mxu2 %v12556_v43  ;;  %7370 = vmatpush.msk.msrb.mxu0 %vm15456_vm5, %v15642_v30  ;;  %v3198_v1 = vpop.f32.mrf.mxu1  ;;  %vm15475_vm5 = vcmp.eq.s32.totalorder %v7997_v9, %v12693_v60  ;;  %v3252_v58 = vpop.f32.mrf.mxu2  ;;  %v6882_v0 = vsel %vm15476_vm14, 1.0, %v15580_v25  ;;  %v6487_v6 = vrot.slane %v2375_v59, 5  ;;  %v4540_v46 = vand.u32 4294901760, %v4539_v20 }
 0x309   : > { %7388 = vmatpush.msk.msrb.mxu3 %vm15459_vm12, %v15642_v30  ;;  %4517 = vmatpush.msrb.mxu1 %v4516_v19  ;;  %v3199_v45 = vadd.f32 %v3198_v1, %v3097_v4  ;;  %v3291_v36 = vpop.f32.mrf.mxu3  ;;  %v15462_v19 = vand.u32 4294901760, %v12756_v41  ;;  %v4551_v4 = vsub.f32 %v12739_v53, %v15468_v24  ;;  %v6866_v59 = vsel %vm15475_vm5, 1.0, %v15580_v25 }
 0x30a   : > { %4588 = vmatpush.msrb.mxu2 %v12588_v33  ;;  %7371 = vmatpush.msk.msrb.mxu0 %vm15457_vm15, %v15642_v30  ;;  %vm15479_vm15 = vcmp.eq.s32.totalorder %v8000_v10, %v12693_v60  ;;  %v12830_v18 = vsub.f32 %v6882_v0, %v6882_v0  ;;  %v3020_v20 = vadd.f32 %v12720_v37, %v2951_v42 }
 0x30b   : > { %7389 = vmatpush.msk.msrb.mxu3 %vm15460_vm0, %v15642_v30  ;;  %4523 = vmatpush.msrb.mxu1 %v4522_v61  ;;  %v2679_v61 = vadd.f32 %v12583_v62, %v2610_v21  ;;  %v3253_v56 = vadd.f32 %v3252_v58, %v3199_v45  ;;  %v4546_v62 = vand.u32 4294901760, %v4545_v27  ;;  %v4557_v49 = vsub.f32 %v12756_v41, %v15462_v19  ;;  %v3360_v45 = vpop.f32.mrf.mxu0  ;;  %v15788_v58 = vld [vmem:[#allocation19_spill] sm:$0xff] }
 0x30c   : > { %4591 = vmatpush.msrb.mxu2 %v12608_v2  ;;  %7372 = vmatpush.msk.msrb.mxu0 %vm15459_vm12, %v15642_v30  ;;  %vm448_vm12 = vcmp.eq.s32.totalorder %v8003_v11, %v12693_v60  ;;  %v6850_v1 = vsel %vm15479_vm15, 1.0, %v15580_v25  ;;  %v12846_v27 = vsub.f32 %v6866_v59, %v6866_v59  ;;  %v15474_v59 = vand.u32 4294901760, %v12830_v18 }
 0x30d   : > { %7390 = vmatpush.msk.msrb.mxu3 %vm15461_vm9, %v15642_v30  ;;  %4529 = vmatpush.msrb.mxu1 %v4528_v29  ;;  %v6486_v29 = vrot.slane %v2034_v57, 6  ;;  %v6834_v37 = vsel %vm448_vm12, 1.0, %v15580_v25  ;;  %v12863_v42 = vsub.f32 %v6850_v1, %v6850_v1  ;;  %v2716_v0 = vadd.f32 %v15788_v58, %v2679_v61 }
 0x30e   : > { %4594 = vmatpush.msrb.mxu2 %v12632_v39  ;;  %7373 = vmatpush.msk.msrb.mxu0 %vm15460_vm0, %v15642_v30  ;;  %vm432_vm0 = vcmp.eq.s32.totalorder %v8006_v12, %v12693_v60 }
 0x30f   : > { %7391 = vmatpush.msk.msrb.mxu3 %vm367_vm6, %v15642_v30  ;;  %4535 = vmatpush.msrb.mxu1 %v4534_v28  ;;  %v4552_v28 = vand.u32 4294901760, %v4551_v4  ;;  %v6501_v57 = vsel %vm15463_vm3, %v6486_v29, %v6487_v6  ;;  %v4558_v6 = vand.u32 4294901760, %v4557_v49  ;;  %v3057_v29 = vadd.f32 %v12707_v32, %v3020_v20 }
 0x310   : > { %4597 = vmatpush.msrb.mxu2 %v12651_v16  ;;  %7374 = vmatpush.msk.msrb.mxu0 %vm15461_vm9, %v15642_v30  ;;  %vm15465_vm9 = vcmask 1041408   ;;  %v3397_v21 = vpop.f32.mrf.mxu1  ;;  %v3438_v19 = vpop.f32.mrf.mxu2  ;;  %v6818_v61 = vsel %vm432_vm0, 1.0, %v15580_v25  ;;  %vm416_vm3 = vcmp.eq.s32.totalorder %v8009_v13, %v12693_v60  ;;  %v15467_v20 = vand.u32 4294901760, %v12863_v42 }
 0x311   : > { %7392 = vmatpush.msk.msrb.mxu3 %vm15464_vm1, %v15642_v30  ;;  %4541 = vmatpush.msrb.mxu1 %v4540_v46  ;;  %v3292_v46 = vadd.f32 %v3291_v36, %v3253_v56  ;;  %v3539_v4 = vpop.f32.mrf.mxu3  ;;  %v12877_v36 = vsub.f32 %v6834_v37, %v6834_v37  ;;  %v15469_v56 = vand.u32 4294901760, %v12846_v27  ;;  %v6488_v37 = vrot.slane %v2716_v0, 4 }
 0x312   : > { %4600 = vmatpush.msrb.mxu2 %v12669_v3  ;;  %7375 = vmatpush.msk.msrb.mxu0 %vm367_vm6, %v15642_v30  ;;  %v3540_v1 = vadd.f32 %v3539_v4, %v3438_v19  ;;  %v12906_v19 = vsub.f32 %v6818_v61, %v6818_v61 }
 0x313   : > { %7393 = vmatpush.msk.msrb.mxu3 %vm15466_vm13, %v15642_v30  ;;  %4547 = vmatpush.msrb.mxu1 %v4546_v62  ;;  %v3361_v32 = vadd.f32 %v3360_v45, %v3292_v46  ;;  %v15789_v62 = vld [vmem:[#allocation14_spill] sm:$0xff]  ;;  %v4808_v45 = vsub.f32 %v12830_v18, %v15474_v59  ;;  %v15471_v46 = vand.u32 4294901760, %v12877_v36 }
 0x314   : > { %4603 = vmatpush.msrb.mxu2 %v12688_v23  ;;  %7376 = vmatpush.msk.msrb.mxu0 %vm15464_vm1, %v15642_v30  ;;  %vm400_vm1 = vcmp.eq.s32.totalorder %v8012_v14, %v12693_v60  ;;  %v12891_v49 = vsel %vm15465_vm9, %v15789_v62, %v6501_v57  ;;  %vm384_vm9 = vcmp.eq.s32.totalorder %v8015_v15, %v12693_v60  ;;  %v6489_v57 = vrot.slane %v3057_v29, 3 }
 0x315   : > { %7394 = vmatpush.msk.msrb.mxu3 %vm319_vm10, %v15642_v30  ;;  %4553 = vmatpush.msrb.mxu1 %v4552_v28  ;;  %v6802_v28 = vsel %vm416_vm3, 1.0, %v15580_v25  ;;  %v6786_v4 = vsel %vm400_vm1, 1.0, %v15580_v25  ;;  %v12927_v0 = vadd.f32 %v3397_v21, %v3361_v32  ;;  %v4820_v21 = vsub.f32 %v12863_v42, %v15467_v20 }
 0x316   : > { %4606 = vmatpush.msrb.mxu2 %v12714_v55  ;;  %7377 = vmatpush.msk.msrb.mxu0 %vm15466_vm13, %v15642_v30  ;;  %vm15472_vm13 = vcmask 1044484   ;;  %v12945_v32 = vsub.f32 %v6802_v28, %v6802_v28  ;;  %v6770_v62 = vsel %vm384_vm9, 1.0, %v15580_v25  ;;  %v15481_v28 = vand.u32 4294901760, %v12906_v19 }
 0x317   : > { %7395 = vmatpush.msk.msrb.mxu3 %vm15470_vm2, %v15642_v30  ;;  %4559 = vmatpush.msrb.mxu1 %v4558_v6  ;;  %v3593_v58 = vpop.f32.mrf.mxu0  ;;  %v4814_v6 = vsub.f32 %v12846_v27, %v15469_v56  ;;  %v12959_v20 = vsub.f32 %v6786_v4, %v6786_v4  ;;  %v6505_v24 = vsel %vm15472_vm13, %v6488_v37, %v6489_v57  ;;  %v4821_v44 = vand.u32 4294901760, %v4820_v21 }
 0x318   : > { %4609 = vmatpush.msrb.mxu2 %v12739_v53  ;;  %7378 = vmatpush.msk.msrb.mxu0 %vm319_vm10, %v15642_v30  ;;  %v3594_v29 = vadd.f32 %v3593_v58, %v3540_v1  ;;  %v3632_v61 = vpop.f32.mrf.mxu1  ;;  %v4809_v1 = vand.u32 4294901760, %v4808_v45  ;;  %v3701_v56 = vpop.f32.mrf.mxu2  ;;  %v4826_v45 = vsub.f32 %v12877_v36, %v15471_v46  ;;  %v12983_v4 = vsub.f32 %v6770_v62, %v6770_v62  ;;  %v15791_v46 = vld [vmem:[#allocation12_spill] sm:$0xff] }
 0x319   : > { %7396 = vmatpush.msk.msrb.mxu3 %vm15478_vm8, %v15642_v30  ;;  %4561 = vmatmul.f32.vlgmr.msrb.gmra.mxu1 %v8738_v47  ;;  %v4815_v37 = vand.u32 4294901760, %v4814_v6  ;;  %vm15792_vm13 = vcmp.eq.s32.totalorder %v8000_v10, %v12328_v17  ;;  %v3738_v59 = vpop.f32.mrf.mxu3  ;;  %v4832_v6 = vsub.f32 %v12906_v19, %v15481_v28  ;;  %v15486_v62 = vand.u32 4294901760, %v12959_v20 }
 0x31a   : > { %4612 = vmatpush.msrb.mxu2 %v12756_v41  ;;  %7399 = vmatpush.msk.msra.mxu1 %vm495_vm11, %v15642_v30  ;;  %vm368_vm11 = vcmp.eq.s32.totalorder %v8072_v26, %v12693_v60  ;;  %v3633_v58 = vadd.f32 %v3632_v61, %v3594_v29  ;;  %v6490_v61 = vrot.slane %v12927_v0, 2 }
 0x31b   : > { %7379 = vmatpush.msk.msrb.mxu0 %vm15470_vm2, %v15642_v30  ;;  %7397 = vmatpush.msk.msrb.mxu3 %vm15477_vm7, %v15642_v30  ;;  %vm352_vm2 = vcmp.eq.s32.totalorder %v8150_v50, %v12693_v60  ;;  %v6754_v29 = vsel %vm368_vm11, 1.0, %v15580_v25  ;;  %v4833_v38 = vand.u32 4294901760, %v4832_v6  ;;  %v4844_v5 = vsub.f32 %v12959_v20, %v15486_v62 }
 0x31c   : > { %4615 = vmatmul.f32.vlgmr.msrb.gmra.mxu2 %v15686_v48  ;;  %7400 = vmatpush.msk.msra.mxu1 %vm479_vm4, %v15642_v30  ;;  %vm15790_vm4 = vcmp.eq.s32.totalorder %v7991_v7, %v12328_v17  ;;  %v3702_v57 = vadd.f32 %v3701_v56, %v3633_v58  ;;  %v15484_v56 = vand.u32 4294901760, %v12945_v32  ;;  %v6738_v21 = vsel %vm352_vm2, 1.0, %v15580_v25 }
 0x31d   : > { %7415 = vmatpush.msk.msra.mxu2 %vm15476_vm14, %v15642_v30  ;;  %7380 = vmatpush.msk.msrb.mxu0 %vm15478_vm8, %v15642_v30  ;;  %vm320_vm14 = vcmp.eq.s32.totalorder %v8156_v52, %v12693_v60  ;;  %vm15795_vm8 = vcmp.eq.s32.totalorder %v8006_v12, %v12328_v17 }
 0x31e   : > { %7398 = vmatpush.msk.msrb.mxu3 %vm15790_vm4, %v15642_v30  ;;  %7401 = vmatpush.msk.msra.mxu1 %vm15792_vm13, %v15642_v30  ;;  %vm15480_vm4 = vcmp.eq.s32.totalorder %v8153_v51, %v12693_v60  ;;  %v3739_v0 = vadd.f32 %v3738_v59, %v3702_v57  ;;  %vm15793_vm13 = vcmp.eq.s32.totalorder %v8003_v11, %v12328_v17  ;;  %v4827_v59 = vand.u32 4294901760, %v4826_v45 }
 0x31f   : > { %4654 = vmatmul.f32.vlgmr.msrb.gmra.mxu3 %v15791_v46  ;;  %7416 = vmatpush.msk.msra.mxu2 %vm15475_vm5, %v15642_v30  ;;  %vm15490_vm5 = vcmask 1046534   ;;  %v6722_v45 = vsel %vm15480_vm4, 1.0, %v15580_v25  ;;  %vm304_vm4 = vcmp.eq.s32.totalorder %v8234_v31, %v12693_v60 }
 0x320   : > { %4810 = vmatpush.msra.mxu3 %v4809_v1  ;;  %7381 = vmatpush.msk.msrb.mxu0 %vm15477_vm7, %v15642_v30  ;;  %v13018_v1 = vsub.f32 %v6754_v29, %v6754_v29  ;;  %v6491_v58 = vrot.slane %v3739_v0, 1  ;;  %vm15488_vm7 = vcmask 1045508   ;;  %v13042_v29 = vsub.f32 %v6738_v21, %v6738_v21  ;;  %v15796_v0 = vld [vmem:[#allocation13_spill] sm:$0xff] }
 0x321   : > { %7402 = vmatpush.msk.msra.mxu1 %vm15793_vm13, %v15642_v30  ;;  %7417 = vmatpush.msk.msra.mxu2 %vm15479_vm15, %v15642_v30  ;;  %vm15794_vm13 = vcmp.eq.s32.totalorder %v7991_v7, %v12328_v17  ;;  %vm15487_vm15 = vcmask 1043456   ;;  %v6706_v21 = vsel %vm320_vm14, 1.0, %v15580_v25 }
 0x322   : > { %4816 = vmatpush.msra.mxu3 %v4815_v37  ;;  %7382 = vmatpush.msk.msrb.mxu0 %vm15794_vm13, %v15642_v30  ;;  %v4838_v37 = vsub.f32 %v12945_v32, %v15484_v56  ;;  %v6507_v28 = vsel %vm15490_vm5, %v6490_v61, %v6491_v58  ;;  %v15797_v56 = vand.u32 4294901760, %v12409_v22  ;;  %v4855_v57 = vand.u32 4294901760, %v13018_v1 }
 0x323   : > { %7403 = vmatpush.msk.msra.mxu1 %vm15795_vm8, %v15642_v30  ;;  %4460 = vmatmul.f32.vlgmr.msrb.gmra.mxu0 %v15796_v0  ;;  %v6509_v54 = vsel %vm15488_vm7, %v6505_v24, %v6507_v28  ;;  %v13063_v61 = vsub.f32 %v6722_v45, %v6722_v45  ;;  %vm288_vm8 = vcmp.eq.s32.totalorder %v8247_v34, %v12693_v60  ;;  %v6690_v28 = vsel %vm304_vm4, 1.0, %v15580_v25 }
 0x324   : > { %7418 = vmatpush.msk.msra.mxu2 %vm448_vm12, %v15642_v30  ;;  %4661 = vmatpush.msra.mxu0 %v15797_v56  ;;  %vm15798_vm13 = vcmp.eq.s32.totalorder %v8009_v13, %v12328_v17  ;;  %v6511_v22 = vsel %vm15487_vm15, %v12891_v49, %v6509_v54  ;;  %v15800_v56 = vld [vmem:[#allocation16_spill] sm:$0xff]  ;;  %v4839_v58 = vand.u32 4294901760, %v4838_v37  ;;  %v4861_v45 = vand.u32 4294901760, %v13042_v29  ;;  %v15803_v49 = vld [vmem:[#allocation17_spill] sm:$0xff] }
 0x325   : > { %4822 = vmatpush.msra.mxu3 %v4821_v44  ;;  %7404 = vmatpush.msk.msra.mxu1 %vm15798_vm13, %v15642_v30  ;;  %v15799_v44 = vand.u32 4294901760, %v12983_v4  ;;  %v15801_v6 = vand.u32 4294901760, %v15800_v56  ;;  %v13087_v62 = vsub.f32 %v6706_v21, %v6706_v21  ;;  %6521 = vst [vmem:[%s13091_s15] sm:$0xff] %v6511_v22  ;;  %vm15802_vm13 = vcmp.eq.s32.totalorder %v8012_v14, %v12328_v17 }
 0x326   : > { %7419 = vmatpush.msk.msra.mxu2 %vm432_vm0, %v15642_v30  ;;  %v6674_v54 = vsel %vm288_vm8, 1.0, %v15580_v25  ;;  %vm272_vm15 = vcmp.eq.s32.totalorder %v8250_v35, %v12693_v60  ;;  %v4845_v37 = vand.u32 4294901760, %v4844_v5  ;;  %v4856_v21 = vsub.f32 %v13018_v1, %v4855_v57  ;;  %v15806_v5 = vld [vmem:[#allocation18_spill] sm:$0xff] }
 0x327   : > { %v4850_v24 = vsub.f32 %v12983_v4, %v15799_v44  ;;  %4665 = vmatpush.msra.mxu0 %v15801_v6  ;;  %4828 = vmatpush.msra.mxu3 %v4827_v59  ;;  %v15804_v59 = vand.u32 4294901760, %v15803_v49  ;;  %v15489_v22 = vand.u32 4294901760, %v13063_v61  ;;  %v13114_v44 = vsub.f32 %v6690_v28, %v6690_v28 }
 0x328   : > { %7405 = vmatpush.msk.msra.mxu1 %vm15802_vm13, %v15642_v30  ;;  %7420 = vmatpush.msk.msra.mxu2 %vm416_vm3, %v15642_v30  ;;  %vm15805_vm13 = vcmp.eq.s32.totalorder %v8015_v15, %v12328_v17  ;;  %vm256_vm7 = vcmp.eq.s32.totalorder %v7991_v7, %v12693_v60  ;;  %v15807_v56 = vand.u32 4294901760, %v15806_v5  ;;  %v4862_v28 = vsub.f32 %v13042_v29, %v4861_v45 }
 0x329   : > { %4669 = vmatpush.msra.mxu0 %v15804_v59  ;;  %4834 = vmatpush.msra.mxu3 %v4833_v38  ;;  %v4851_v38 = vand.u32 4294901760, %v4850_v24  ;;  %v4873_v6 = vand.u32 4294901760, %v13087_v62  ;;  %v13132_v49 = vsub.f32 %v6674_v54, %v6674_v54  ;;  %v6658_v24 = vsel %vm272_vm15, 1.0, %v15580_v25 }
 0x32a   : > { %7406 = vmatpush.msk.msra.mxu1 %vm15805_vm13, %v15642_v30  ;;  %7421 = vmatpush.msk.msra.mxu2 %vm400_vm1, %v15642_v30  ;;  %v4857_v54 = vand.u32 4294901760, %v4856_v21  ;;  %v4868_v59 = vsub.f32 %v13063_v61, %v15489_v22  ;;  %v4879_v5 = vand.u32 4294901760, %v13114_v44  ;;  %v4863_v21 = vand.u32 4294901760, %v4862_v28 }
 0x32b   : > { %4673 = vmatpush.msra.mxu0 %v15807_v56  ;;  %4840 = vmatpush.msra.mxu3 %v4839_v58  ;;  %v15808_v58 = vand.u32 4294901760, %v12508_v63  ;;  %v6642_v56 = vsel %vm256_vm7, 1.0, %v15580_v25  ;;  %v13164_v63 = vsub.f32 %v6658_v24, %v6658_v24  ;;  %v4885_v22 = vand.u32 4294901760, %v13132_v49 }
 0x32c   : > { %7407 = vmatpush.msk.msra.mxu1 %vm367_vm6, %v15642_v30  ;;  %7422 = vmatpush.msk.msra.mxu2 %vm384_vm9, %v15642_v30  ;;  %vm15809_vm6 = vcmp.eq.s32.totalorder %v8150_v50, %v12328_v17  ;;  %vm15811_vm13 = vcmp.eq.s32.totalorder %v8153_v51, %v12328_v17  ;;  %v4869_v28 = vand.u32 4294901760, %v4868_v59  ;;  %v4880_v24 = vsub.f32 %v13114_v44, %v4879_v5 }
 0x32d   : > { %4677 = vmatpush.msra.mxu0 %v15808_v58  ;;  %4846 = vmatpush.msra.mxu3 %v4845_v37  ;;  %v15810_v37 = vand.u32 4294901760, %v12533_v40  ;;  %v4874_v58 = vsub.f32 %v13087_v62, %v4873_v6  ;;  %v13180_v40 = vsub.f32 %v6642_v56, %v6642_v56  ;;  %v4891_v56 = vand.u32 4294901760, %v13164_v63 }
 0x32e   : > { %7408 = vmatpush.msk.msra.mxu1 %vm15809_vm6, %v15642_v30  ;;  %7423 = vmatpush.msk.msra.mxu2 %vm368_vm11, %v15642_v30  ;;  %vm15813_vm6 = vcmp.eq.s32.totalorder %v8153_v51, %v12693_v60  ;;  %v4886_v59 = vsub.f32 %v13132_v49, %v4885_v22 }
 0x32f   : > { %4681 = vmatpush.msra.mxu0 %v15810_v37  ;;  %4852 = vmatpush.msra.mxu3 %v4851_v38  ;;  %v15812_v38 = vand.u32 4294901760, %v12556_v43  ;;  %v15814_v43 = vand.u32 4294901760, %v12588_v33  ;;  %v4897_v37 = vand.u32 4294901760, %v13180_v40  ;;  %v15816_v33 = vand.u32 4294901760, %v12608_v2 }
 0x330   : > { %7409 = vmatpush.msk.msra.mxu1 %vm15811_vm13, %v15642_v30  ;;  %7424 = vmatpush.msk.msra.mxu2 %vm352_vm2, %v15642_v30  ;;  %vm15817_vm13 = vcmp.eq.s32.totalorder %v8247_v34, %v12328_v17  ;;  %v4887_v2 = vand.u32 4294901760, %v4886_v59 }
 0x331   : > { %4685 = vmatpush.msra.mxu0 %v15812_v38  ;;  %4858 = vmatpush.msra.mxu3 %v4857_v54  ;;  %v4875_v54 = vand.u32 4294901760, %v4874_v58  ;;  %v4892_v58 = vsub.f32 %v13164_v63, %v4891_v56  ;;  %v15818_v38 = vand.u32 4294901760, %v12632_v39 }
 0x332   : > { %7410 = vmatpush.msk.msra.mxu1 %vm319_vm10, %v15642_v30  ;;  %7425 = vmatpush.msk.msra.mxu2 %vm15813_vm6, %v15642_v30  ;;  %vm15815_vm10 = vcmp.eq.s32.totalorder %v8234_v31, %v12328_v17  ;;  %vm15819_vm6 = vcmp.eq.s32.totalorder %v8250_v35, %v12328_v17 }
 0x333   : > { %4689 = vmatpush.msra.mxu0 %v15814_v43  ;;  %4864 = vmatpush.msra.mxu3 %v4863_v21  ;;  %v4881_v21 = vand.u32 4294901760, %v4880_v24  ;;  %v15820_v24 = vand.u32 4294901760, %v12651_v16  ;;  %v4893_v39 = vand.u32 4294901760, %v4892_v58  ;;  %v15822_v43 = vand.u32 4294901760, %v12669_v3 }
 0x334   : > { %7411 = vmatpush.msk.msra.mxu1 %vm15815_vm10, %v15642_v30  ;;  %7426 = vmatpush.msk.msra.mxu2 %vm320_vm14, %v15642_v30  ;;  %vm15821_vm10 = vcmp.eq.s32.totalorder %v7991_v7, %v12328_v17  ;;  %v15824_v3 = vand.u32 4294901760, %v12688_v23  ;;  %v15826_v58 = vand.u32 4294901760, %v12830_v18 }
 0x335   : > { %4693 = vmatpush.msra.mxu0 %v15816_v33  ;;  %4870 = vmatpush.msra.mxu3 %v4869_v28  ;;  %v4898_v28 = vsub.f32 %v13180_v40, %v4897_v37 }
 0x336   : > { %7412 = vmatpush.msk.msra.mxu1 %vm15817_vm13, %v15642_v30  ;;  %7427 = vmatpush.msk.msra.mxu2 %vm304_vm4, %v15642_v30  ;;  %vm15823_vm13 = vcmp.eq.s32.totalorder %v7994_v8, %v12693_v60 }
 0x337   : > { %4697 = vmatpush.msra.mxu0 %v15818_v38  ;;  %4876 = vmatpush.msra.mxu3 %v4875_v54  ;;  %v3880_v54 = vpop.f32.mrf.mxu1  ;;  %v4899_v17 = vand.u32 4294901760, %v4898_v28  ;;  %v15829_v28 = vand.u32 4294901760, %v12846_v27 }
 0x338   : > { %7413 = vmatpush.msk.msra.mxu1 %vm15819_vm6, %v15642_v30  ;;  %7428 = vmatpush.msk.msra.mxu2 %vm288_vm8, %v15642_v30  ;;  %v3934_v33 = vpop.f32.mrf.mxu2  ;;  %vm15825_vm6 = vcmp.eq.s32.totalorder %v7997_v9, %v12693_v60 }
 0x339   : > { %4701 = vmatpush.msra.mxu0 %v15820_v24  ;;  %4882 = vmatpush.msra.mxu3 %v4881_v21  ;;  %v3779_v59 = vpop.f32.mrf.mxu0  ;;  %v15831_v24 = vand.u32 4294901760, %v12863_v42 }
 0x33a   : > { %7414 = vmatpush.msk.msra.mxu1 %vm15821_vm10, %v15642_v30  ;;  %7429 = vmatpush.msk.msra.mxu2 %vm272_vm15, %v15642_v30  ;;  %v3881_v16 = vadd.f32 %v3880_v54, %v3779_v59  ;;  %vm15828_vm10 = vcmp.eq.s32.totalorder %v8000_v10, %v12693_v60  ;;  %v15833_v54 = vand.u32 4294901760, %v12756_v41  ;;  %v15835_v41 = vand.u32 4294901760, %v12906_v19 }
 0x33b   : > { %4705 = vmatpush.msra.mxu0 %v15822_v43  ;;  %4888 = vmatpush.msra.mxu3 %v4887_v2  ;;  %v3973_v38 = vpop.f32.mrf.mxu3  ;;  %v15827_v2 = vand.u32 4294901760, %v12714_v55  ;;  %v15830_v55 = vand.u32 4294901760, %v12739_v53  ;;  %v15834_v53 = vand.u32 4294901760, %v12877_v36  ;;  %v15838_v59 = vand.u32 4294901760, %v12983_v4 }
 0x33c   : > { %4760 = vmatmul.f32.vlgmr.msra.gmra.mxu1 %v8738_v47  ;;  %7430 = vmatpush.msk.msra.mxu2 %vm256_vm7, %v15642_v30  ;;  %v3935_v21 = vadd.f32 %v3934_v33, %v3881_v16 }
 0x33d   : > { %7431 = vmatpush.msk.msrb.mxu1 %vm15823_vm13, %v15642_v30  ;;  %4709 = vmatpush.msra.mxu0 %v15824_v3 }
 0x33e   : > { %4894 = vmatpush.msra.mxu3 %v4893_v39  ;;  %4801 = vmatmul.f32.vlgmr.msra.gmra.mxu2 %v15796_v0  ;;  %v13268_v23 = vadd.f32 %v3973_v38, %v3935_v21  ;;  %v15832_v39 = vld [vmem:[#allocation15_spill] sm:$0xff] }
 0x33f   : > { %7432 = vmatpush.msk.msrb.mxu1 %vm15825_vm6, %v15642_v30  ;;  %5002 = vmatpush.msrb.mxu2 %v15826_v58  ;;  %v13294_v43 = vperm.slane %v15832_v39, 4 }
 0x340   : > { %4713 = vmatpush.msra.mxu0 %v15827_v2  ;;  %4900 = vmatpush.msra.mxu3 %v4899_v17 }
 0x341   : > { %4902 = vmatmul.f32.vlgmr.msra.gmra.mxu3 %v8738_v47  ;;  %7433 = vmatpush.msk.msrb.mxu1 %vm15828_vm10, %v15642_v30  ;;  %vm257_vm5 = vcmp.eq.s32.totalorder %v7991_v7, %v13294_v43 }
 0x342   : > { %5006 = vmatpush.msrb.mxu2 %v15829_v28  ;;  %7447 = vmatpush.msk.msrb.mxu3 %vm15823_vm13, %v15642_v30  ;;  %vm497_vm13 = vcmp.eq.s32.totalorder %v7994_v8, %v13294_v43 }
 0x343   : > { %4717 = vmatpush.msra.mxu0 %v15830_v55  ;;  %7434 = vmatpush.msk.msrb.mxu1 %vm448_vm12, %v15642_v30 }
 0x344   : > { %5010 = vmatpush.msrb.mxu2 %v15831_v24  ;;  %7448 = vmatpush.msk.msrb.mxu3 %vm15825_vm6, %v15642_v30  ;;  %vm15491_vm6 = vcmp.eq.s32.totalorder %v8000_v10, %v13294_v43 }
 0x345   : > { %4721 = vmatpush.msra.mxu0 %v15833_v54  ;;  %7435 = vmatpush.msk.msrb.mxu1 %vm432_vm0, %v15642_v30  ;;  %v6851_v16 = vsel %vm15491_vm6, 1.0, %v15580_v25 }
 0x346   : > { %4723 = vmatmul.f32.vlgmr.msra.gmra.mxu0 %v8738_v47  ;;  %5014 = vmatpush.msrb.mxu2 %v15834_v53 }
 0x347   : > { %4908 = vmatpush.msrb.mxu0 %v12830_v18  ;;  %7449 = vmatpush.msk.msrb.mxu3 %vm15828_vm10, %v15642_v30  ;;  %v15836_v18 = vand.u32 4294901760, %v12945_v32  ;;  %vm15499_vm10 = vcmp.eq.s32.totalorder %v8015_v15, %v13294_v43 }
 0x348   : > { %7436 = vmatpush.msk.msrb.mxu1 %vm416_vm3, %v15642_v30  ;;  %5018 = vmatpush.msrb.mxu2 %v15835_v41 }
 0x349   : > { %4911 = vmatpush.msrb.mxu0 %v12846_v27  ;;  %7450 = vmatpush.msk.msrb.mxu3 %vm448_vm12, %v15642_v30  ;;  %vm481_vm12 = vcmp.eq.s32.totalorder %v7997_v9, %v13294_v43  ;;  %v15837_v27 = vand.u32 4294901760, %v12959_v20 }
 0x34a   : > { %7437 = vmatpush.msk.msrb.mxu1 %vm400_vm1, %v15642_v30  ;;  %5022 = vmatpush.msrb.mxu2 %v15836_v18  ;;  %v6867_v17 = vsel %vm481_vm12, 1.0, %v15580_v25 }
 0x34b   : > { %4914 = vmatpush.msrb.mxu0 %v12863_v42  ;;  %7451 = vmatpush.msk.msrb.mxu3 %vm432_vm0, %v15642_v30  ;;  %v6883_v42 = vsel %vm497_vm13, 1.0, %v15580_v25  ;;  %vm15493_vm0 = vcmp.eq.s32.totalorder %v8003_v11, %v13294_v43 }
 0x34c   : > { %7438 = vmatpush.msk.msrb.mxu1 %vm384_vm9, %v15642_v30  ;;  %5026 = vmatpush.msrb.mxu2 %v15837_v27 }
 0x34d   : > { %4917 = vmatpush.msrb.mxu0 %v12877_v36  ;;  %7452 = vmatpush.msk.msrb.mxu3 %vm416_vm3, %v15642_v30  ;;  %v13368_v36 = vsub.f32 %v6883_v42, %v6883_v42  ;;  %vm15839_vm3 = vcmp.eq.s32.totalorder %v8153_v51, %v12693_v60 }
 0x34e   : > { %7439 = vmatpush.msk.msrb.mxu1 %vm368_vm11, %v15642_v30  ;;  %5030 = vmatpush.msrb.mxu2 %v15838_v59 }
 0x34f   : > { %4920 = vmatpush.msrb.mxu0 %v12906_v19  ;;  %7453 = vmatpush.msk.msrb.mxu3 %vm400_vm1, %v15642_v30  ;;  %v13387_v19 = vsub.f32 %v6867_v17, %v6867_v17  ;;  %vm433_vm1 = vcmp.eq.s32.totalorder %v8006_v12, %v13294_v43  ;;  %v5148_v3 = vand.u32 4294901760, %v13368_v36 }
 0x350   : > { %7440 = vmatpush.msk.msrb.mxu1 %vm352_vm2, %v15642_v30  ;;  %5034 = vmatpush.msrb.mxu2 %v4855_v57  ;;  %v13397_v57 = vsub.f32 %v6851_v16, %v6851_v16 }
 0x351   : > { %4923 = vmatpush.msrb.mxu0 %v12945_v32  ;;  %7454 = vmatpush.msk.msrb.mxu3 %vm384_vm9, %v15642_v30  ;;  %v6835_v32 = vsel %vm15493_vm0, 1.0, %v15580_v25  ;;  %vm15495_vm9 = vcmp.eq.s32.totalorder %v8009_v13, %v13294_v43  ;;  %v15521_v33 = vand.u32 4294901760, %v13387_v19  ;;  %v5149_v38 = vsub.f32 %v13368_v36, %v5148_v3 }
 0x352   : > { %7441 = vmatpush.msk.msrb.mxu1 %vm15839_vm3, %v15642_v30  ;;  %5038 = vmatpush.msrb.mxu2 %v4861_v45  ;;  %v15840_v45 = vand.u32 4294901760, %v13063_v61  ;;  %v13427_v21 = vsub.f32 %v6835_v32, %v6835_v32  ;;  %v6803_v58 = vsel %vm15495_vm9, 1.0, %v15580_v25  ;;  %v4079_v16 = vpop.f32.mrf.mxu1 }
 0x353   : > { %4926 = vmatpush.msrb.mxu0 %v12959_v20  ;;  %7455 = vmatpush.msk.msrb.mxu3 %vm368_vm11, %v15642_v30  ;;  %v6819_v20 = vsel %vm433_vm1, 1.0, %v15580_v25  ;;  %vm15498_vm11 = vcmp.eq.s32.totalorder %v8012_v14, %v13294_v43  ;;  %v13473_v28 = vsub.f32 %v6803_v58, %v6803_v58  ;;  %v5150_v55 = vand.u32 4294901760, %v5149_v38 }
 0x354   : > { %7442 = vmatpush.msk.msrb.mxu1 %vm320_vm14, %v15642_v30  ;;  %5042 = vmatpush.msrb.mxu2 %v15840_v45  ;;  %v13450_v2 = vsub.f32 %v6819_v20, %v6819_v20 }
 0x355   : > { %4929 = vmatpush.msrb.mxu0 %v12983_v4  ;;  %7456 = vmatpush.msk.msrb.mxu3 %vm352_vm2, %v15642_v30  ;;  %v15515_v4 = vand.u32 4294901760, %v13397_v57  ;;  %vm15841_vm2 = vmmov %vm15839_vm3  ;;  %v15512_v18 = vand.u32 4294901760, %v13473_v28  ;;  %vm15511_vm3 = vcmp.eq.s32.totalorder %v8156_v52, %v13294_v43 }
 0x356   : > { %7443 = vmatpush.msk.msrb.mxu1 %vm304_vm4, %v15642_v30  ;;  %5046 = vmatpush.msrb.mxu2 %v4873_v6  ;;  %v5155_v6 = vsub.f32 %v13387_v19, %v15521_v33  ;;  %v15513_v24 = vand.u32 4294901760, %v13450_v2  ;;  %v6707_v60 = vsel %vm15511_vm3, 1.0, %v15580_v25 }
 0x357   : > { %4932 = vmatpush.msrb.mxu0 %v13018_v1  ;;  %7457 = vmatpush.msk.msrb.mxu3 %vm15841_vm2, %v15642_v30  ;;  %v6787_v1 = vsel %vm15498_vm11, 1.0, %v15580_v25  ;;  %v5179_v38 = vsub.f32 %v13473_v28, %v15512_v18  ;;  %vm273_vm2 = vcmp.eq.s32.totalorder %v8250_v35, %v13294_v43 }
 0x358   : > { %7444 = vmatpush.msk.msrb.mxu1 %vm288_vm8, %v15642_v30  ;;  %5050 = vmatpush.msrb.mxu2 %v4879_v5  ;;  %v15514_v5 = vand.u32 4294901760, %v13427_v21  ;;  %v13492_v54 = vsub.f32 %v6787_v1, %v6787_v1  ;;  %v5173_v32 = vsub.f32 %v13450_v2, %v15513_v24 }
 0x359   : > { %4935 = vmatpush.msrb.mxu0 %v13042_v29  ;;  %7458 = vmatpush.msk.msrb.mxu3 %vm320_vm14, %v15642_v30  ;;  %v5161_v29 = vsub.f32 %v13397_v57, %v15515_v4  ;;  %vm15500_vm14 = vcmp.eq.s32.totalorder %v8072_v26, %v13294_v43 }
 0x35a   : > { %7445 = vmatpush.msk.msrb.mxu1 %vm272_vm15, %v15642_v30  ;;  %5054 = vmatpush.msrb.mxu2 %v4885_v22  ;;  %v6771_v22 = vsel %vm15499_vm10, 1.0, %v15580_v25  ;;  %v5167_v53 = vsub.f32 %v13427_v21, %v15514_v5  ;;  %v4120_v42 = vpop.f32.mrf.mxu2 }
 0x35b   : > { %4938 = vmatpush.msrb.mxu0 %v13063_v61  ;;  %7459 = vmatpush.msk.msrb.mxu3 %vm304_vm4, %v15642_v30  ;;  %vm15502_vm4 = vcmp.eq.s32.totalorder %v8150_v50, %v13294_v43  ;;  %v5156_v61 = vand.u32 4294901760, %v5155_v6  ;;  %v13523_v17 = vsub.f32 %v6771_v22, %v6771_v22 }
 0x35c   : > { %7446 = vmatpush.msk.msrb.mxu1 %vm256_vm7, %v15642_v30  ;;  %5058 = vmatpush.msrb.mxu2 %v4891_v56  ;;  %v4042_v41 = vpop.f32.mrf.mxu0  ;;  %v6755_v56 = vsel %vm15500_vm14, 1.0, %v15580_v25  ;;  %v5168_v58 = vand.u32 4294901760, %v5167_v53  ;;  %v5180_v53 = vand.u32 4294901760, %v5179_v38 }
 0x35d   : > { %4941 = vmatpush.msrb.mxu0 %v13087_v62  ;;  %7460 = vmatpush.msk.msrb.mxu3 %vm288_vm8, %v15642_v30  ;;  %v5162_v62 = vand.u32 4294901760, %v5161_v29  ;;  %v4043_v27 = vadd.f32 %v4042_v41, %v13268_v23  ;;  %v4221_v59 = vpop.f32.mrf.mxu3  ;;  %vm15505_vm8 = vcmp.eq.s32.totalorder %v8153_v51, %v13294_v43  ;;  %v6739_v23 = vsel %vm15502_vm4, 1.0, %v15580_v25 }
 0x35e   : > { %4995 = vmatmul.f32.vlgmr.msrb.gmra.mxu1 %v15791_v46  ;;  %5062 = vmatpush.msrb.mxu2 %v4897_v37  ;;  %v13531_v45 = vadd.f32 %v4221_v59, %v4120_v42  ;;  %v15510_v37 = vand.u32 4294901760, %v13492_v54  ;;  %v13545_v20 = vsub.f32 %v6755_v56, %v6755_v56  ;;  %v6723_v1 = vsel %vm15505_vm8, 1.0, %v15580_v25 }
 0x35f   : > { %5151 = vmatpush.msra.mxu1 %v5150_v55  ;;  %4944 = vmatpush.msrb.mxu0 %v13114_v44  ;;  %v13543_v44 = vadd.f32 %v4079_v16, %v4043_v27  ;;  %v15508_v6 = vand.u32 4294901760, %v13523_v17  ;;  %v13563_v29 = vsub.f32 %v6739_v23, %v6739_v23  ;;  %v5174_v55 = vand.u32 4294901760, %v5173_v32 }
 0x360   : > { %7461 = vmatpush.msk.msrb.mxu3 %vm272_vm15, %v15642_v30  ;;  %5064 = vmatmul.f32.vlgmr.msrb.gmra.mxu2 %v8738_v47  ;;  %vm305_vm15 = vcmp.eq.s32.totalorder %v8234_v31, %v13294_v43  ;;  %v15507_v22 = vand.u32 4294901760, %v13545_v20 }
 0x361   : > { %5157 = vmatpush.msra.mxu1 %v5156_v61  ;;  %5249 = vmatpush.msra.mxu2 %v13368_v36  ;;  %v13581_v61 = vsub.f32 %v6723_v1, %v6723_v1  ;;  %v6691_v41 = vsel %vm305_vm15, 1.0, %v15580_v25  ;;  %v5191_v56 = vsub.f32 %v13523_v17, %v15508_v6 }
 0x362   : > { %4947 = vmatpush.msrb.mxu0 %v13132_v49  ;;  %7462 = vmatpush.msk.msrb.mxu3 %vm256_vm7, %v15642_v30  ;;  %v5185_v49 = vsub.f32 %v13492_v54, %v15510_v37  ;;  %vm289_vm7 = vcmp.eq.s32.totalorder %v8247_v34, %v13294_v43  ;;  %v5197_v59 = vsub.f32 %v13545_v20, %v15507_v22 }
 0x363   : > { %5101 = vmatmul.f32.vlgmr.msrb.gmra.mxu3 %v8738_v47  ;;  %5163 = vmatpush.msra.mxu1 %v5162_v62  ;;  %v13599_v62 = vsub.f32 %v6707_v60, %v6707_v60  ;;  %v6675_v42 = vsel %vm289_vm7, 1.0, %v15580_v25  ;;  %v15503_v16 = vand.u32 4294901760, %v13581_v61  ;;  %v13614_v32 = vsub.f32 %v6691_v41, %v6691_v41 }
 0x364   : > { %5252 = vmatpush.msra.mxu2 %v13387_v19  ;;  %7479 = vmatpush.msk.msra.mxu3 %vm497_vm13, %v15642_v30  ;;  %v5186_v27 = vand.u32 4294901760, %v5185_v49  ;;  %v5192_v23 = vand.u32 4294901760, %v5191_v56  ;;  %v13635_v1 = vsub.f32 %v6675_v42, %v6675_v42  ;;  %v6643_v49 = vsel %vm257_vm5, 1.0, %v15580_v25 }
 0x365   : > { %4950 = vmatpush.msrb.mxu0 %v13164_v63  ;;  %5169 = vmatpush.msra.mxu1 %v5168_v58  ;;  %v15504_v63 = vand.u32 4294901760, %v13563_v29  ;;  %v15497_v38 = vand.u32 4294901760, %v13599_v62  ;;  %v5198_v60 = vand.u32 4294901760, %v5197_v59  ;;  %v15492_v41 = vand.u32 4294901760, %v13614_v32 }
 0x366   : > { %5255 = vmatpush.msra.mxu2 %v13397_v57  ;;  %7480 = vmatpush.msk.msra.mxu3 %vm481_vm12, %v15642_v30  ;;  %v15494_v59 = vand.u32 4294901760, %v13635_v1 }
 0x367   : > { %4953 = vmatpush.msrb.mxu0 %v13180_v40  ;;  %5175 = vmatpush.msra.mxu1 %v5174_v55  ;;  %v6659_v40 = vsel %vm273_vm2, 1.0, %v15580_v25  ;;  %v5203_v58 = vsub.f32 %v13563_v29, %v15504_v63  ;;  %v13638_v55 = vperm.slane %v15832_v39, 5  ;;  %v5215_v42 = vsub.f32 %v13599_v62, %v15497_v38 }
 0x368   : > { %4956 = vmatmul.f32.vlgmr.msrb.gmra.mxu0 %v15686_v48  ;;  %5258 = vmatpush.msra.mxu2 %v13427_v21  ;;  %v13657_v56 = vsub.f32 %v6659_v40, %v6659_v40  ;;  %v13672_v40 = vsub.f32 %v6643_v49, %v6643_v49 }
 0x369   : > { %7463 = vmatpush.msk.msra.mxu0 %vm497_vm13, %v15642_v30  ;;  %7481 = vmatpush.msk.msra.mxu3 %vm15491_vm6, %v15642_v30 }
 0x36a   : > { %5181 = vmatpush.msra.mxu1 %v5180_v53  ;;  %5261 = vmatpush.msra.mxu2 %v13450_v2  ;;  %v5209_v53 = vsub.f32 %v13581_v61, %v15503_v16  ;;  %v15496_v49 = vand.u32 4294901760, %v13657_v56 }
 0x36b   : > { %7464 = vmatpush.msk.msra.mxu0 %vm481_vm12, %v15642_v30  ;;  %7482 = vmatpush.msk.msra.mxu3 %vm15493_vm0, %v15642_v30 }
 0x36c   : > { %5187 = vmatpush.msra.mxu1 %v5186_v27  ;;  %5264 = vmatpush.msra.mxu2 %v13473_v28  ;;  %v5204_v27 = vand.u32 4294901760, %v5203_v58  ;;  %v5221_v58 = vsub.f32 %v13614_v32, %v15492_v41  ;;  %v15501_v41 = vand.u32 4294901760, %v13672_v40 }
 0x36d   : > { %7465 = vmatpush.msk.msra.mxu0 %vm15491_vm6, %v15642_v30  ;;  %7483 = vmatpush.msk.msra.mxu3 %vm433_vm1, %v15642_v30  ;;  %vm15517_vm6 = vcmp.eq.s32.totalorder %v7994_v8, %v13638_v55 }
 0x36e   : > { %5193 = vmatpush.msra.mxu1 %v5192_v23  ;;  %5267 = vmatpush.msra.mxu2 %v13492_v54  ;;  %v5210_v23 = vand.u32 4294901760, %v5209_v53  ;;  %v5227_v53 = vsub.f32 %v13635_v1, %v15494_v59  ;;  %v5233_v59 = vsub.f32 %v13657_v56, %v15496_v49  ;;  %v5239_v49 = vsub.f32 %v13672_v40, %v15501_v41 }
 0x36f   : > { %7466 = vmatpush.msk.msra.mxu0 %vm15493_vm0, %v15642_v30  ;;  %7484 = vmatpush.msk.msra.mxu3 %vm15495_vm9, %v15642_v30  ;;  %vm15519_vm0 = vcmp.eq.s32.totalorder %v7997_v9, %v13638_v55 }
 0x370   : > { %5199 = vmatpush.msra.mxu1 %v5198_v60  ;;  %5270 = vmatpush.msra.mxu2 %v13523_v17  ;;  %v5216_v60 = vand.u32 4294901760, %v5215_v42  ;;  %v5222_v42 = vand.u32 4294901760, %v5221_v58  ;;  %v5228_v58 = vand.u32 4294901760, %v5227_v53 }
 0x371   : > { %7467 = vmatpush.msk.msra.mxu0 %vm433_vm1, %v15642_v30  ;;  %7485 = vmatpush.msk.msra.mxu3 %vm15498_vm11, %v15642_v30 }
 0x372   : > { %5205 = vmatpush.msra.mxu1 %v5204_v27  ;;  %5273 = vmatpush.msra.mxu2 %v13545_v20  ;;  %v6884_v27 = vsel %vm15517_vm6, 1.0, %v15580_v25 }
 0x373   : > { %7468 = vmatpush.msk.msra.mxu0 %vm15495_vm9, %v15642_v30  ;;  %7486 = vmatpush.msk.msra.mxu3 %vm15499_vm10, %v15642_v30  ;;  %vm15522_vm9 = vcmp.eq.s32.totalorder %v8000_v10, %v13638_v55  ;;  %v13738_v38 = vsub.f32 %v6884_v27, %v6884_v27 }
 0x374   : > { %5211 = vmatpush.msra.mxu1 %v5210_v23  ;;  %5276 = vmatpush.msra.mxu2 %v13563_v29  ;;  %v6868_v23 = vsel %vm15519_vm0, 1.0, %v15580_v25  ;;  %v6852_v27 = vsel %vm15522_vm9, 1.0, %v15580_v25  ;;  %v4314_v6 = vpop.f32.mrf.mxu1 }
 0x375   : > { %7469 = vmatpush.msk.msra.mxu0 %vm15498_vm11, %v15642_v30  ;;  %7487 = vmatpush.msk.msra.mxu3 %vm15500_vm14, %v15642_v30  ;;  %vm450_vm11 = vcmp.eq.s32.totalorder %v8003_v11, %v13638_v55  ;;  %v13751_v53 = vsub.f32 %v6868_v23, %v6868_v23 }
 0x376   : > { %5217 = vmatpush.msra.mxu1 %v5216_v60  ;;  %5279 = vmatpush.msra.mxu2 %v13581_v61  ;;  %v5234_v60 = vand.u32 4294901760, %v5233_v59  ;;  %v5240_v59 = vand.u32 4294901760, %v5239_v49  ;;  %v6836_v23 = vsel %vm450_vm11, 1.0, %v15580_v25 }
 0x377   : > { %7470 = vmatpush.msk.msra.mxu0 %vm15499_vm10, %v15642_v30  ;;  %7488 = vmatpush.msk.msra.mxu3 %vm15502_vm4, %v15642_v30  ;;  %vm15526_vm10 = vcmp.eq.s32.totalorder %v8006_v12, %v13638_v55  ;;  %v15509_v41 = vand.u32 4294901760, %v13751_v53 }
 0x378   : > { %5223 = vmatpush.msra.mxu1 %v5222_v42  ;;  %5282 = vmatpush.msra.mxu2 %v13599_v62  ;;  %v15506_v42 = vand.u32 4294901760, %v13738_v38  ;;  %v6820_v49 = vsel %vm15526_vm10, 1.0, %v15580_v25 }
 0x379   : > { %7471 = vmatpush.msk.msra.mxu0 %vm15500_vm14, %v15642_v30  ;;  %7489 = vmatpush.msk.msra.mxu3 %vm15505_vm8, %v15642_v30  ;;  %vm15527_vm14 = vcmp.eq.s32.totalorder %v8009_v13, %v13638_v55  ;;  %v13807_v16 = vsub.f32 %v6820_v49, %v6820_v49  ;;  %v5496_v49 = vsub.f32 %v13751_v53, %v15509_v41 }
 0x37a   : > { %5229 = vmatpush.msra.mxu1 %v5228_v58  ;;  %5285 = vmatpush.msra.mxu2 %v13614_v32  ;;  %v13781_v58 = vsub.f32 %v6852_v27, %v6852_v27  ;;  %v13799_v27 = vsub.f32 %v6836_v23, %v6836_v23  ;;  %v6804_v63 = vsel %vm15527_vm14, 1.0, %v15580_v25 }
 0x37b   : > { %7472 = vmatpush.msk.msra.mxu0 %vm15502_vm4, %v15642_v30  ;;  %7490 = vmatpush.msk.msra.mxu3 %vm15511_vm3, %v15642_v30  ;;  %vm402_vm4 = vcmp.eq.s32.totalorder %v8012_v14, %v13638_v55  ;;  %v13843_v37 = vsub.f32 %v6804_v63, %v6804_v63  ;;  %v15520_v63 = vand.u32 4294901760, %v13807_v16 }
 0x37c   : > { %5235 = vmatpush.msra.mxu1 %v5234_v60  ;;  %5288 = vmatpush.msra.mxu2 %v13635_v1  ;;  %v5490_v60 = vsub.f32 %v13738_v38, %v15506_v42  ;;  %v6788_v22 = vsel %vm402_vm4, 1.0, %v15580_v25  ;;  %v15518_v41 = vand.u32 4294901760, %v13799_v27 }
 0x37d   : > { %7473 = vmatpush.msk.msra.mxu0 %vm15505_vm8, %v15642_v30  ;;  %7491 = vmatpush.msk.msra.mxu3 %vm305_vm15, %v15642_v30  ;;  %vm386_vm8 = vcmp.eq.s32.totalorder %v8015_v15, %v13638_v55  ;;  %v4383_v5 = vpop.f32.mrf.mxu2  ;;  %v13868_v4 = vsub.f32 %v6788_v22, %v6788_v22 }
 0x37e   : > { %5241 = vmatpush.msra.mxu1 %v5240_v59  ;;  %5291 = vmatpush.msra.mxu2 %v13657_v56  ;;  %v15516_v59 = vand.u32 4294901760, %v13781_v58  ;;  %v4275_v23 = vpop.f32.mrf.mxu0 }
 0x37f   : > { %7474 = vmatpush.msk.msra.mxu0 %vm15511_vm3, %v15642_v30  ;;  %7492 = vmatpush.msk.msra.mxu3 %vm289_vm7, %v15642_v30  ;;  %v4276_v42 = vadd.f32 %v4275_v23, %v13531_v45  ;;  %v6772_v45 = vsel %vm386_vm8, 1.0, %v15580_v25  ;;  %vm370_vm3 = vcmp.eq.s32.totalorder %v8072_v26, %v13638_v55  ;;  %v5491_v23 = vand.u32 4294901760, %v5490_v60 }
 0x380   : > { %5243 = vmatmul.f32.vlgmr.msra.gmra.mxu1 %v8738_v47  ;;  %5294 = vmatpush.msra.mxu2 %v13672_v40  ;;  %v5502_v24 = vsub.f32 %v13781_v58, %v15516_v59  ;;  %v13880_v60 = vsub.f32 %v6772_v45, %v6772_v45  ;;  %v6756_v22 = vsel %vm370_vm3, 1.0, %v15580_v25  ;;  %v5508_v59 = vsub.f32 %v13799_v27, %v15518_v41 }
 0x381   : > { %7495 = vmatpush.msk.msrb.mxu1 %vm497_vm13, %v15642_v30  ;;  %7475 = vmatpush.msk.msra.mxu0 %vm305_vm15, %v15642_v30  ;;  %v4315_v18 = vadd.f32 %v4314_v6, %v4276_v42  ;;  %vm354_vm13 = vcmp.eq.s32.totalorder %v8150_v50, %v13638_v55  ;;  %v5497_v6 = vand.u32 4294901760, %v5496_v49  ;;  %v4420_v49 = vpop.f32.mrf.mxu3  ;;  %v5514_v45 = vsub.f32 %v13807_v16, %v15520_v63 }
 0x382   : > { %7493 = vmatpush.msk.msra.mxu3 %vm273_vm2, %v15642_v30  ;;  %5297 = vmatmul.f32.vlgmr.msra.gmra.mxu2 %v15686_v48  ;;  %v6740_v41 = vsel %vm354_vm13, 1.0, %v15580_v25  ;;  %v15846_v36 = vand.u32 4294901760, %v13880_v60 }
 0x383   : > { %7496 = vmatpush.msk.msrb.mxu1 %vm481_vm12, %v15642_v30  ;;  %7511 = vmatpush.msk.msrb.mxu2 %vm15517_vm6, %v15642_v30  ;;  %v4384_v42 = vadd.f32 %v4383_v5, %v4315_v18  ;;  %vm15842_vm12 = vcmp.eq.s32.totalorder %v8000_v10, %v13294_v43  ;;  %v15523_v5 = vand.u32 4294901760, %v13843_v37  ;;  %vm338_vm6 = vcmp.eq.s32.totalorder %v8153_v51, %v13638_v55 }
 0x384   : > { %7476 = vmatpush.msk.msra.mxu0 %vm289_vm7, %v15642_v30  ;;  %7494 = vmatpush.msk.msra.mxu3 %vm257_vm5, %v15642_v30 }
 0x385   : > { %5336 = vmatmul.f32.vlgmr.msra.gmra.mxu3 %v15791_v46  ;;  %7497 = vmatpush.msk.msrb.mxu1 %vm15842_vm12, %v15642_v30  ;;  %v4421_v18 = vadd.f32 %v4420_v49, %v4384_v42  ;;  %vm15843_vm12 = vcmp.eq.s32.totalorder %v8003_v11, %v13294_v43  ;;  %v5525_v42 = vand.u32 4294901760, %v13868_v4  ;;  %v13917_v49 = vsub.f32 %v6756_v22, %v6756_v22 }
 0x386   : > { %7512 = vmatpush.msk.msrb.mxu2 %vm15519_vm0, %v15642_v30  ;;  %5492 = vmatpush.msrb.mxu3 %v5491_v23  ;;  %v5503_v23 = vand.u32 4294901760, %v5502_v24  ;;  %vm322_vm0 = vcmp.eq.s32.totalorder %v8156_v52, %v13638_v55  ;;  %v6724_v24 = vsel %vm338_vm6, 1.0, %v15580_v25  ;;  %v5509_v22 = vand.u32 4294901760, %v5508_v59 }
 0x387   : > { %7477 = vmatpush.msk.msra.mxu0 %vm273_vm2, %v15642_v30  ;;  %7498 = vmatpush.msk.msrb.mxu1 %vm15843_vm12, %v15642_v30  ;;  %v6492_v63 = vrot.slane %v4421_v18, 7  ;;  %v13941_v18 = vsub.f32 %v6740_v41, %v6740_v41  ;;  %vm306_vm12 = vcmp.eq.s32.totalorder %v8234_v31, %v13638_v55  ;;  %v5515_v59 = vand.u32 4294901760, %v5514_v45 }
 0x388   : > { %7513 = vmatpush.msk.msrb.mxu2 %vm15522_vm9, %v15642_v30  ;;  %5498 = vmatpush.msrb.mxu3 %v5497_v6  ;;  %v5520_v6 = vsub.f32 %v13843_v37, %v15523_v5  ;;  %vm15844_vm9 = vcmask 1040384   ;;  %v6708_v41 = vsel %vm322_vm0, 1.0, %v15580_v25  ;;  %v5526_v5 = vsub.f32 %v13868_v4, %v5525_v42 }
 0x389   : > { %7478 = vmatpush.msk.msra.mxu0 %vm257_vm5, %v15642_v30  ;;  %7499 = vmatpush.msk.msrb.mxu1 %vm433_vm1, %v15642_v30  ;;  %v13952_v33 = vsel %vm15844_vm9, %v13543_v44, %v6492_v63  ;;  %v5537_v48 = vand.u32 4294901760, %v13917_v49  ;;  %v13964_v46 = vsub.f32 %v6724_v24, %v6724_v24  ;;  %vm290_vm1 = vcmp.eq.s32.totalorder %v8247_v34, %v13638_v55 }
 0x38a   : > { %5142 = vmatmul.f32.vlgmr.msra.gmra.mxu0 %v15796_v0  ;;  %7514 = vmatpush.msk.msrb.mxu2 %vm450_vm11, %v15642_v30  ;;  %vm15845_vm9 = vcmp.eq.s32.totalorder %v8009_v13, %v13294_v43  ;;  %v6692_v44 = vsel %vm306_vm12, 1.0, %v15580_v25  ;;  %v15847_v63 = vand.u32 4294901760, %v13387_v19  ;;  %v5521_v45 = vand.u32 4294901760, %v5520_v6 }
 0x38b   : > { %5343 = vmatpush.msrb.mxu0 %v5148_v3  ;;  %5504 = vmatpush.msrb.mxu3 %v5503_v23  ;;  %v5532_v3 = vsub.f32 %v13880_v60, %v15846_v36  ;;  %v15528_v23 = vand.u32 4294901760, %v13941_v18  ;;  %v13986_v24 = vsub.f32 %v6708_v41, %v6708_v41  ;;  %v6676_v19 = vsel %vm290_vm1, 1.0, %v15580_v25 }
 0x38c   : > { %7500 = vmatpush.msk.msrb.mxu1 %vm15845_vm9, %v15642_v30  ;;  %7515 = vmatpush.msk.msrb.mxu2 %vm15526_vm10, %v15642_v30  ;;  %vm15848_vm9 = vcmp.eq.s32.totalorder %v8012_v14, %v13294_v43  ;;  %vm274_vm10 = vcmp.eq.s32.totalorder %v8250_v35, %v13638_v55  ;;  %v5527_v6 = vand.u32 4294901760, %v5526_v5  ;;  %v5538_v41 = vsub.f32 %v13917_v49, %v5537_v48 }
 0x38d   : > { %5347 = vmatpush.msrb.mxu0 %v15847_v63  ;;  %5510 = vmatpush.msrb.mxu3 %v5509_v22  ;;  %v15849_v22 = vand.u32 4294901760, %v13397_v57  ;;  %v15529_v36 = vand.u32 4294901760, %v13964_v46  ;;  %v14008_v63 = vsub.f32 %v6692_v44, %v6692_v44  ;;  %v5533_v57 = vand.u32 4294901760, %v5532_v3 }
 0x38e   : > { %7501 = vmatpush.msk.msrb.mxu1 %vm15848_vm9, %v15642_v30  ;;  %7516 = vmatpush.msk.msrb.mxu2 %vm15527_vm14, %v15642_v30  ;;  %vm15850_vm9 = vcmp.eq.s32.totalorder %v8015_v15, %v13294_v43  ;;  %vm258_vm14 = vcmp.eq.s32.totalorder %v7991_v7, %v13638_v55  ;;  %v15851_v5 = vand.u32 4294901760, %v13427_v21  ;;  %v5555_v44 = vand.u32 4294901760, %v13986_v24 }
 0x38f   : > { %5351 = vmatpush.msrb.mxu0 %v15849_v22  ;;  %5516 = vmatpush.msrb.mxu3 %v5515_v59  ;;  %v5544_v59 = vsub.f32 %v13941_v18, %v15528_v23  ;;  %v14026_v22 = vsub.f32 %v6676_v19, %v6676_v19  ;;  %v6660_v3 = vsel %vm274_vm10, 1.0, %v15580_v25  ;;  %v15853_v21 = vand.u32 4294901760, %v13450_v2 }
 0x390   : > { %7502 = vmatpush.msk.msrb.mxu1 %vm15850_vm9, %v15642_v30  ;;  %7517 = vmatpush.msk.msrb.mxu2 %vm402_vm4, %v15642_v30  ;;  %vm15852_vm9 = vcmp.eq.s32.totalorder %v8072_v26, %v13294_v43  ;;  %v5550_v19 = vsub.f32 %v13964_v46, %v15529_v36  ;;  %v6644_v23 = vsel %vm258_vm14, 1.0, %v15580_v25  ;;  %v14058_v2 = vsub.f32 %v6660_v3, %v6660_v3 }
 0x391   : > { %5355 = vmatpush.msrb.mxu0 %v15851_v5  ;;  %5522 = vmatpush.msrb.mxu3 %v5521_v45  ;;  %v5539_v45 = vand.u32 4294901760, %v5538_v41  ;;  %v5561_v5 = vand.u32 4294901760, %v14008_v63  ;;  %v5545_v41 = vand.u32 4294901760, %v5544_v59  ;;  %v5567_v36 = vand.u32 4294901760, %v14026_v22 }
 0x392   : > { %7503 = vmatpush.msk.msrb.mxu1 %vm15852_vm9, %v15642_v30  ;;  %7518 = vmatpush.msk.msrb.mxu2 %vm386_vm8, %v15642_v30  ;;  %vm15854_vm9 = vcmp.eq.s32.totalorder %v8150_v50, %v13294_v43  ;;  %v5551_v59 = vand.u32 4294901760, %v5550_v19 }
 0x393   : > { %5359 = vmatpush.msrb.mxu0 %v15853_v21  ;;  %5528 = vmatpush.msrb.mxu3 %v5527_v6  ;;  %v15855_v6 = vand.u32 4294901760, %v13473_v28  ;;  %v5556_v21 = vsub.f32 %v13986_v24, %v5555_v44  ;;  %v14074_v28 = vsub.f32 %v6644_v23, %v6644_v23  ;;  %v5562_v3 = vsub.f32 %v14008_v63, %v5561_v5 }
 0x394   : > { %7504 = vmatpush.msk.msrb.mxu1 %vm15854_vm9, %v15642_v30  ;;  %7519 = vmatpush.msk.msrb.mxu2 %vm370_vm3, %v15642_v30  ;;  %vm15856_vm9 = vcmp.eq.s32.totalorder %v8153_v51, %v13294_v43  ;;  %v5573_v23 = vand.u32 4294901760, %v14058_v2  ;;  %v5568_v19 = vsub.f32 %v14026_v22, %v5567_v36 }
 0x395   : > { %5363 = vmatpush.msrb.mxu0 %v15855_v6  ;;  %5534 = vmatpush.msrb.mxu3 %v5533_v57  ;;  %v15857_v57 = vand.u32 4294901760, %v13492_v54  ;;  %v15859_v54 = vand.u32 4294901760, %v13523_v17  ;;  %v5579_v6 = vand.u32 4294901760, %v14074_v28  ;;  %v15860_v17 = vand.u32 4294901760, %v13545_v20 }
 0x396   : > { %7505 = vmatpush.msk.msrb.mxu1 %vm15856_vm9, %v15642_v30  ;;  %7520 = vmatpush.msk.msrb.mxu2 %vm354_vm13, %v15642_v30  ;;  %vm15858_vm9 = vcmp.eq.s32.totalorder %v8156_v52, %v13294_v43  ;;  %v5569_v20 = vand.u32 4294901760, %v5568_v19  ;;  %v15865_v43 = vand.u32 4294901760, %v13614_v32  ;;  %v15870_v32 = vand.u32 4294901760, %v13751_v53 }
 0x397   : > { %5367 = vmatpush.msrb.mxu0 %v15857_v57  ;;  %5540 = vmatpush.msrb.mxu3 %v5539_v45  ;;  %v5557_v45 = vand.u32 4294901760, %v5556_v21  ;;  %v5574_v21 = vsub.f32 %v14058_v2, %v5573_v23  ;;  %v15861_v57 = vand.u32 4294901760, %v13563_v29  ;;  %v15872_v19 = vand.u32 4294901760, %v13657_v56 }
 0x398   : > { %7506 = vmatpush.msk.msrb.mxu1 %vm15858_vm9, %v15642_v30  ;;  %7521 = vmatpush.msk.msrb.mxu2 %vm338_vm6, %v15642_v30  ;;  %v15877_v56 = vand.u32 4294901760, %v13799_v27 }
 0x399   : > { %5371 = vmatpush.msrb.mxu0 %v15859_v54  ;;  %5546 = vmatpush.msrb.mxu3 %v5545_v41  ;;  %v5563_v41 = vand.u32 4294901760, %v5562_v3  ;;  %v15862_v3 = vand.u32 4294901760, %v13581_v61  ;;  %v5575_v29 = vand.u32 4294901760, %v5574_v21  ;;  %v15863_v54 = vand.u32 4294901760, %v13599_v62 }
 0x39a   : > { %7507 = vmatpush.msk.msrb.mxu1 %vm305_vm15, %v15642_v30  ;;  %7522 = vmatpush.msk.msrb.mxu2 %vm322_vm0, %v15642_v30  ;;  %vm15866_vm15 = vcmp.eq.s32.totalorder %v7997_v9, %v13638_v55  ;;  %v15867_v62 = vand.u32 4294901760, %v13738_v38 }
 0x39b   : > { %5375 = vmatpush.msrb.mxu0 %v15860_v17  ;;  %5552 = vmatpush.msrb.mxu3 %v5551_v59  ;;  %v5580_v59 = vsub.f32 %v14074_v28, %v5579_v6  ;;  %v15873_v17 = vand.u32 4294901760, %v13781_v58  ;;  %vm15874_vm9 = vmmov %vm15866_vm15 }
 0x39c   : > { %7508 = vmatpush.msk.msrb.mxu1 %vm289_vm7, %v15642_v30  ;;  %7523 = vmatpush.msk.msrb.mxu2 %vm306_vm12, %v15642_v30  ;;  %vm15869_vm7 = vcmp.eq.s32.totalorder %v8000_v10, %v13638_v55 }
 0x39d   : > { %5379 = vmatpush.msrb.mxu0 %v15861_v57  ;;  %5558 = vmatpush.msrb.mxu3 %v5557_v45  ;;  %v5581_v61 = vand.u32 4294901760, %v5580_v59  ;;  %v15868_v45 = vand.u32 4294901760, %v13635_v1  ;;  %v14180_v1 = vperm.slane %v15832_v39, 6  ;;  %v15886_v59 = vand.u32 4294901760, %v13964_v46 }
 0x39e   : > { %7509 = vmatpush.msk.msrb.mxu1 %vm273_vm2, %v15642_v30  ;;  %7524 = vmatpush.msk.msrb.mxu2 %vm290_vm1, %v15642_v30 }
 0x39f   : > { %5383 = vmatpush.msrb.mxu0 %v15862_v3  ;;  %5564 = vmatpush.msrb.mxu3 %v5563_v41  ;;  %v15875_v41 = vand.u32 4294901760, %v13672_v40  ;;  %v15880_v40 = vand.u32 4294901760, %v13807_v16 }
 0x3a0   : > { %7510 = vmatpush.msk.msrb.mxu1 %vm257_vm5, %v15642_v30  ;;  %7525 = vmatpush.msk.msrb.mxu2 %vm274_vm10, %v15642_v30  ;;  %vm15864_vm5 = vcmp.eq.s32.totalorder %v7994_v8, %v13638_v55 }
 0x3a1   : > { %5387 = vmatpush.msrb.mxu0 %v15863_v54  ;;  %5570 = vmatpush.msrb.mxu3 %v5569_v20  ;;  %vm15871_vm2 = vmmov %vm15864_vm5 }
 0x3a2   : > { %5442 = vmatmul.f32.vlgmr.msrb.gmra.mxu1 %v8738_v47  ;;  %7526 = vmatpush.msk.msrb.mxu2 %vm258_vm14, %v15642_v30 }
 0x3a3   : > { %7527 = vmatpush.msk.msra.mxu1 %vm15864_vm5, %v15642_v30  ;;  %5391 = vmatpush.msrb.mxu0 %v15865_v43  ;;  %vm15876_vm5 = vcmp.eq.s32.totalorder %v8006_v12, %v13638_v55 }
 0x3a4   : > { %5576 = vmatpush.msrb.mxu3 %v5575_v29  ;;  %5483 = vmatmul.f32.vlgmr.msrb.gmra.mxu2 %v15796_v0 }
 0x3a5   : > { %7528 = vmatpush.msk.msra.mxu1 %vm15866_vm15, %v15642_v30  ;;  %5684 = vmatpush.msra.mxu2 %v15867_v62  ;;  %vm15878_vm15 = vmmov %vm15869_vm7 }
 0x3a6   : > { %5395 = vmatpush.msrb.mxu0 %v15868_v45  ;;  %5582 = vmatpush.msrb.mxu3 %v5581_v61 }
 0x3a7   : > { %5584 = vmatmul.f32.vlgmr.msrb.gmra.mxu3 %v8738_v47  ;;  %7529 = vmatpush.msk.msra.mxu1 %vm15869_vm7, %v15642_v30  ;;  %vm15879_vm7 = vcmp.eq.s32.totalorder %v8009_v13, %v13638_v55 }
 0x3a8   : > { %5688 = vmatpush.msra.mxu2 %v15870_v32  ;;  %7543 = vmatpush.msk.msra.mxu3 %vm15871_vm2, %v15642_v30  ;;  %vm499_vm2 = vcmp.eq.s32.totalorder %v7994_v8, %v14180_v1 }
 0x3a9   : > { %5399 = vmatpush.msrb.mxu0 %v15872_v19  ;;  %7530 = vmatpush.msk.msra.mxu1 %vm450_vm11, %v15642_v30 }
 0x3aa   : > { %5692 = vmatpush.msra.mxu2 %v15873_v17  ;;  %7544 = vmatpush.msk.msra.mxu3 %vm15874_vm9, %v15642_v30  ;;  %vm15882_vm9 = vmmov %vm15876_vm5 }
 0x3ab   : > { %5403 = vmatpush.msrb.mxu0 %v15875_v41  ;;  %7531 = vmatpush.msk.msra.mxu1 %vm15876_vm5, %v15642_v30  ;;  %vm15883_vm5 = vmmov %vm15879_vm7 }
 0x3ac   : > { %5405 = vmatmul.f32.vlgmr.msrb.gmra.mxu0 %v8738_v47  ;;  %5696 = vmatpush.msra.mxu2 %v15877_v56  ;;  %v15887_v56 = vld [vmem:[#allocation12_spill] sm:$0xff] }
 0x3ad   : > { %5590 = vmatpush.msra.mxu0 %v13738_v38  ;;  %7545 = vmatpush.msk.msra.mxu3 %vm15878_vm15, %v15642_v30  ;;  %v15881_v38 = vand.u32 4294901760, %v13843_v37  ;;  %vm15530_vm15 = vcmp.eq.s32.totalorder %v8000_v10, %v14180_v1 }
 0x3ae   : > { %7532 = vmatpush.msk.msra.mxu1 %vm15879_vm7, %v15642_v30  ;;  %5700 = vmatpush.msra.mxu2 %v15880_v40  ;;  %vm15531_vm7 = vcmp.eq.s32.totalorder %v8003_v11, %v14180_v1 }
 0x3af   : > { %5593 = vmatpush.msra.mxu0 %v13751_v53  ;;  %7546 = vmatpush.msk.msra.mxu3 %vm450_vm11, %v15642_v30  ;;  %v6885_v53 = vsel %vm499_vm2, 1.0, %v15580_v25  ;;  %vm483_vm11 = vcmp.eq.s32.totalorder %v7997_v9, %v14180_v1  ;;  %v6837_v57 = vsel %vm15531_vm7, 1.0, %v15580_v25 }
 0x3b0   : > { %7533 = vmatpush.msk.msra.mxu1 %vm402_vm4, %v15642_v30  ;;  %5704 = vmatpush.msra.mxu2 %v15881_v38  ;;  %v14251_v21 = vsub.f32 %v6885_v53, %v6885_v53  ;;  %v14319_v29 = vsub.f32 %v6837_v57, %v6837_v57 }
 0x3b1   : > { %5596 = vmatpush.msra.mxu0 %v13781_v58  ;;  %7547 = vmatpush.msk.msra.mxu3 %vm15882_vm9, %v15642_v30  ;;  %v15884_v58 = vand.u32 4294901760, %v13880_v60  ;;  %vm275_vm9 = vcmp.eq.s32.totalorder %v8250_v35, %v14180_v1 }
 0x3b2   : > { %7534 = vmatpush.msk.msra.mxu1 %vm386_vm8, %v15642_v30  ;;  %5708 = vmatpush.msra.mxu2 %v5525_v42 }
 0x3b3   : > { %5599 = vmatpush.msra.mxu0 %v13799_v27  ;;  %7548 = vmatpush.msk.msra.mxu3 %vm15883_vm5, %v15642_v30  ;;  %v6869_v27 = vsel %vm483_vm11, 1.0, %v15580_v25  ;;  %vm259_vm5 = vcmp.eq.s32.totalorder %v7991_v7, %v14180_v1 }
 0x3b4   : > { %7535 = vmatpush.msk.msra.mxu1 %vm370_vm3, %v15642_v30  ;;  %5712 = vmatpush.msra.mxu2 %v15884_v58  ;;  %v14279_v42 = vsub.f32 %v6869_v27, %v6869_v27 }
 0x3b5   : > { %5602 = vmatpush.msra.mxu0 %v13807_v16  ;;  %7549 = vmatpush.msk.msra.mxu3 %vm402_vm4, %v15642_v30  ;;  %v6853_v16 = vsel %vm15530_vm15, 1.0, %v15580_v25  ;;  %vm435_vm4 = vcmp.eq.s32.totalorder %v8006_v12, %v14180_v1 }
 0x3b6   : > { %7536 = vmatpush.msk.msra.mxu1 %vm354_vm13, %v15642_v30  ;;  %5716 = vmatpush.msra.mxu2 %v5537_v48  ;;  %v15885_v48 = vand.u32 4294901760, %v13941_v18  ;;  %v14299_v20 = vsub.f32 %v6853_v16, %v6853_v16  ;;  %v15561_v3 = vand.u32 4294901760, %v14279_v42 }
 0x3b7   : > { %5605 = vmatpush.msra.mxu0 %v13843_v37  ;;  %7550 = vmatpush.msk.msra.mxu3 %vm386_vm8, %v15642_v30  ;;  %v5830_v37 = vand.u32 4294901760, %v14251_v21  ;;  %vm15532_vm8 = vcmp.eq.s32.totalorder %v8009_v13, %v14180_v1 }
 0x3b8   : > { %7537 = vmatpush.msk.msra.mxu1 %vm338_vm6, %v15642_v30  ;;  %5720 = vmatpush.msra.mxu2 %v15885_v48  ;;  %v6805_v54 = vsel %vm15532_vm8, 1.0, %v15580_v25  ;;  %v15559_v61 = vand.u32 4294901760, %v14299_v20 }
 0x3b9   : > { %5608 = vmatpush.msra.mxu0 %v13868_v4  ;;  %7551 = vmatpush.msk.msra.mxu3 %vm370_vm3, %v15642_v30  ;;  %v6821_v4 = vsel %vm435_vm4, 1.0, %v15580_v25  ;;  %vm15535_vm3 = vcmp.eq.s32.totalorder %v8012_v14, %v14180_v1  ;;  %v14365_v62 = vsub.f32 %v6805_v54, %v6805_v54 }
 0x3ba   : > { %7538 = vmatpush.msk.msra.mxu1 %vm322_vm0, %v15642_v30  ;;  %5724 = vmatpush.msra.mxu2 %v15886_v59  ;;  %v14342_v43 = vsub.f32 %v6821_v4, %v6821_v4  ;;  %v5843_v45 = vsub.f32 %v14299_v20, %v15559_v61 }
 0x3bb   : > { %5611 = vmatpush.msra.mxu0 %v13880_v60  ;;  %7552 = vmatpush.msk.msra.mxu3 %vm354_vm13, %v15642_v30  ;;  %v5831_v60 = vsub.f32 %v14251_v21, %v5830_v37  ;;  %vm15539_vm13 = vcmp.eq.s32.totalorder %v8150_v50, %v14180_v1  ;;  %v15554_v41 = vand.u32 4294901760, %v14365_v62 }
 0x3bc   : > { %7539 = vmatpush.msk.msra.mxu1 %vm306_vm12, %v15642_v30  ;;  %5728 = vmatpush.msra.mxu2 %v5555_v44  ;;  %v5837_v44 = vsub.f32 %v14279_v42, %v15561_v3  ;;  %v15555_v32 = vand.u32 4294901760, %v14342_v43  ;;  %v5844_v40 = vand.u32 4294901760, %v5843_v45 }
 0x3bd   : > { %5614 = vmatpush.msra.mxu0 %v13917_v49  ;;  %7553 = vmatpush.msk.msra.mxu3 %vm338_vm6, %v15642_v30  ;;  %v6789_v49 = vsel %vm15535_vm3, 1.0, %v15580_v25  ;;  %vm15536_vm6 = vcmp.eq.s32.totalorder %v8015_v15, %v14180_v1  ;;  %v5861_v27 = vsub.f32 %v14365_v62, %v15554_v41 }
 0x3be   : > { %7540 = vmatpush.msk.msra.mxu1 %vm290_vm1, %v15642_v30  ;;  %5732 = vmatpush.msra.mxu2 %v5561_v5  ;;  %v15558_v5 = vand.u32 4294901760, %v14319_v29  ;;  %v14384_v19 = vsub.f32 %v6789_v49, %v6789_v49  ;;  %v5855_v38 = vsub.f32 %v14342_v43, %v15555_v32 }
 0x3bf   : > { %5617 = vmatpush.msra.mxu0 %v13941_v18  ;;  %7554 = vmatpush.msk.msra.mxu3 %vm322_vm0, %v15642_v30  ;;  %v5832_v18 = vand.u32 4294901760, %v5831_v60  ;;  %vm15537_vm0 = vcmp.eq.s32.totalorder %v8072_v26, %v14180_v1  ;;  %v5862_v54 = vand.u32 4294901760, %v5861_v27 }
 0x3c0   : > { %7541 = vmatpush.msk.msra.mxu1 %vm274_vm10, %v15642_v30  ;;  %5736 = vmatpush.msra.mxu2 %v5567_v36  ;;  %v6773_v36 = vsel %vm15536_vm6, 1.0, %v15580_v25  ;;  %v5849_v17 = vsub.f32 %v14319_v29, %v15558_v5  ;;  %v15550_v53 = vand.u32 4294901760, %v14384_v19  ;;  %v5856_v59 = vand.u32 4294901760, %v5855_v38 }
 0x3c1   : > { %5620 = vmatpush.msra.mxu0 %v13964_v46  ;;  %7555 = vmatpush.msk.msra.mxu3 %vm306_vm12, %v15642_v30  ;;  %v5838_v46 = vand.u32 4294901760, %v5837_v44  ;;  %vm15542_vm12 = vcmp.eq.s32.totalorder %v8153_v51, %v14180_v1 }
 0x3c2   : > { %7542 = vmatpush.msk.msra.mxu1 %vm258_vm14, %v15642_v30  ;;  %5740 = vmatpush.msra.mxu2 %v5573_v23  ;;  %v6757_v23 = vsel %vm15537_vm0, 1.0, %v15580_v25  ;;  %v5850_v58 = vand.u32 4294901760, %v5849_v17  ;;  %v6725_v16 = vsel %vm15542_vm12, 1.0, %v15580_v25 }
 0x3c3   : > { %5623 = vmatpush.msra.mxu0 %v13986_v24  ;;  %7556 = vmatpush.msk.msra.mxu3 %vm290_vm1, %v15642_v30  ;;  %v14414_v24 = vsub.f32 %v6773_v36, %v6773_v36  ;;  %vm15546_vm1 = vcmp.eq.s32.totalorder %v8156_v52, %v14180_v1  ;;  %v14468_v60 = vsub.f32 %v6725_v16, %v6725_v16  ;;  %v14525_v16 = vperm.slane %v15832_v39, 7 }
 0x3c4   : > { %5677 = vmatmul.f32.vlgmr.msra.gmra.mxu1 %v15887_v56  ;;  %5744 = vmatpush.msra.mxu2 %v5579_v6  ;;  %v6741_v6 = vsel %vm15539_vm13, 1.0, %v15580_v25  ;;  %v6709_v55 = vsel %vm15546_vm1, 1.0, %v15580_v25 }
 0x3c5   : > { %5833 = vmatpush.msrb.mxu1 %v5832_v18  ;;  %5626 = vmatpush.msra.mxu0 %v14008_v63  ;;  %v14432_v63 = vsub.f32 %v6757_v23, %v6757_v23  ;;  %v15549_v48 = vand.u32 4294901760, %v14414_v24  ;;  %v14450_v57 = vsub.f32 %v6741_v6, %v6741_v6  ;;  %v14486_v18 = vsub.f32 %v6709_v55, %v6709_v55 }
 0x3c6   : > { %7557 = vmatpush.msk.msra.mxu3 %vm274_vm10, %v15642_v30  ;;  %5746 = vmatmul.f32.vlgmr.msra.gmra.mxu2 %v8738_v47  ;;  %vm307_vm10 = vcmp.eq.s32.totalorder %v8234_v31, %v14180_v1  ;;  %v15544_v23 = vand.u32 4294901760, %v14468_v60 }
 0x3c7   : > { %5839 = vmatpush.msrb.mxu1 %v5838_v46  ;;  %5931 = vmatpush.msrb.mxu2 %v14251_v21  ;;  %v15548_v4 = vand.u32 4294901760, %v14432_v63  ;;  %v6693_v49 = vsel %vm307_vm10, 1.0, %v15580_v25  ;;  %v5873_v44 = vsub.f32 %v14414_v24, %v15549_v48  ;;  %v15888_v46 = vld [vmem:[#allocation11_spill] sm:$0xff] }
 0x3c8   : > { %5629 = vmatpush.msra.mxu0 %v14026_v22  ;;  %7558 = vmatpush.msk.msra.mxu3 %vm258_vm14, %v15642_v30  ;;  %v5867_v22 = vsub.f32 %v14384_v19, %v15550_v53  ;;  %vm291_vm14 = vcmp.eq.s32.totalorder %v8247_v34, %v14180_v1 }
 0x3c9   : > { %5783 = vmatmul.f32.vlgmr.msra.gmra.mxu3 %v8738_v47  ;;  %5845 = vmatpush.msrb.mxu1 %v5844_v40  ;;  %v6677_v36 = vsel %vm291_vm14, 1.0, %v15580_v25  ;;  %v5879_v17 = vsub.f32 %v14432_v63, %v15548_v4  ;;  %v14501_v40 = vsub.f32 %v6693_v49, %v6693_v49  ;;  %v5874_v38 = vand.u32 4294901760, %v5873_v44 }
 0x3ca   : > { %5934 = vmatpush.msrb.mxu2 %v14279_v42  ;;  %7575 = vmatpush.msk.msrb.mxu3 %vm499_vm2, %v15642_v30  ;;  %v5868_v45 = vand.u32 4294901760, %v5867_v22  ;;  %v14522_v27 = vsub.f32 %v6677_v36, %v6677_v36  ;;  %v5891_v22 = vsub.f32 %v14468_v60, %v15544_v23 }
 0x3cb   : > { %5632 = vmatpush.msra.mxu0 %v14058_v2  ;;  %5851 = vmatpush.msrb.mxu1 %v5850_v58  ;;  %v15547_v2 = vand.u32 4294901760, %v14450_v57  ;;  %v15541_v58 = vand.u32 4294901760, %v14486_v18  ;;  %v5880_v39 = vand.u32 4294901760, %v5879_v17  ;;  %v15540_v55 = vand.u32 4294901760, %v14501_v40 }
 0x3cc   : > { %5937 = vmatpush.msrb.mxu2 %v14299_v20  ;;  %7576 = vmatpush.msk.msrb.mxu3 %vm483_vm11, %v15642_v30  ;;  %v5892_v17 = vand.u32 4294901760, %v5891_v22 }
 0x3cd   : > { %5635 = vmatpush.msra.mxu0 %v14074_v28  ;;  %5857 = vmatpush.msrb.mxu1 %v5856_v59  ;;  %v6661_v28 = vsel %vm275_vm9, 1.0, %v15580_v25  ;;  %v5885_v6 = vsub.f32 %v14450_v57, %v15547_v2  ;;  %v6645_v59 = vsel %vm259_vm5, 1.0, %v15580_v25  ;;  %v5897_v44 = vsub.f32 %v14486_v18, %v15541_v58 }
 0x3ce   : > { %5638 = vmatmul.f32.vlgmr.msra.gmra.mxu0 %v15888_v46  ;;  %5940 = vmatpush.msrb.mxu2 %v14319_v29  ;;  %v14559_v36 = vsub.f32 %v6645_v59, %v6645_v59 }
 0x3cf   : > { %7559 = vmatpush.msk.msrb.mxu0 %vm499_vm2, %v15642_v30  ;;  %7577 = vmatpush.msk.msrb.mxu3 %vm15530_vm15, %v15642_v30  ;;  %v5886_v49 = vand.u32 4294901760, %v5885_v6  ;;  %v5898_v6 = vand.u32 4294901760, %v5897_v44 }
 0x3d0   : > { %5863 = vmatpush.msrb.mxu1 %v5862_v54  ;;  %5943 = vmatpush.msrb.mxu2 %v14342_v43  ;;  %v14544_v54 = vsub.f32 %v6661_v28, %v6661_v28  ;;  %v5903_v28 = vsub.f32 %v14501_v40, %v15540_v55 }
 0x3d1   : > { %7560 = vmatpush.msk.msrb.mxu0 %vm483_vm11, %v15642_v30  ;;  %7578 = vmatpush.msk.msrb.mxu3 %vm15531_vm7, %v15642_v30 }
 0x3d2   : > { %5869 = vmatpush.msrb.mxu1 %v5868_v45  ;;  %5946 = vmatpush.msrb.mxu2 %v14365_v62  ;;  %v15534_v45 = vand.u32 4294901760, %v14522_v27 }
 0x3d3   : > { %7561 = vmatpush.msk.msrb.mxu0 %vm15530_vm15, %v15642_v30  ;;  %7579 = vmatpush.msk.msrb.mxu3 %vm435_vm4, %v15642_v30  ;;  %vm15552_vm15 = vcmp.eq.s32.totalorder %v7994_v8, %v14525_v16 }
 0x3d4   : > { %5875 = vmatpush.msrb.mxu1 %v5874_v38  ;;  %5949 = vmatpush.msrb.mxu2 %v14384_v19  ;;  %v15533_v38 = vand.u32 4294901760, %v14544_v54  ;;  %v5909_v59 = vsub.f32 %v14522_v27, %v15534_v45  ;;  %v6886_v22 = vsel %vm15552_vm15, 1.0, %v15580_v25 }
 0x3d5   : > { %7562 = vmatpush.msk.msrb.mxu0 %vm15531_vm7, %v15642_v30  ;;  %7580 = vmatpush.msk.msrb.mxu3 %vm15532_vm8, %v15642_v30  ;;  %vm15556_vm7 = vcmp.eq.s32.totalorder %v7997_v9, %v14525_v16  ;;  %v14625_v45 = vsub.f32 %v6886_v22, %v6886_v22 }
 0x3d6   : > { %5881 = vmatpush.msrb.mxu1 %v5880_v39  ;;  %5952 = vmatpush.msrb.mxu2 %v14414_v24  ;;  %v15538_v39 = vand.u32 4294901760, %v14559_v36  ;;  %v5915_v44 = vsub.f32 %v14544_v54, %v15533_v38 }
 0x3d7   : > { %7563 = vmatpush.msk.msrb.mxu0 %vm435_vm4, %v15642_v30  ;;  %7581 = vmatpush.msk.msrb.mxu3 %vm15535_vm3, %v15642_v30 }
 0x3d8   : > { %5887 = vmatpush.msrb.mxu1 %v5886_v49  ;;  %5955 = vmatpush.msrb.mxu2 %v14432_v63  ;;  %v5904_v49 = vand.u32 4294901760, %v5903_v28  ;;  %v5910_v28 = vand.u32 4294901760, %v5909_v59  ;;  %v5921_v38 = vsub.f32 %v14559_v36, %v15538_v39 }
 0x3d9   : > { %7564 = vmatpush.msk.msrb.mxu0 %vm15532_vm8, %v15642_v30  ;;  %7582 = vmatpush.msk.msrb.mxu3 %vm15536_vm6, %v15642_v30  ;;  %vm468_vm8 = vcmp.eq.s32.totalorder %v8000_v10, %v14525_v16 }
 0x3da   : > { %5893 = vmatpush.msrb.mxu1 %v5892_v17  ;;  %5958 = vmatpush.msrb.mxu2 %v14450_v57  ;;  %v6870_v17 = vsel %vm15556_vm7, 1.0, %v15580_v25  ;;  %v6854_v22 = vsel %vm468_vm8, 1.0, %v15580_v25 }
 0x3db   : > { %7565 = vmatpush.msk.msrb.mxu0 %vm15535_vm3, %v15642_v30  ;;  %7583 = vmatpush.msk.msrb.mxu3 %vm15537_vm0, %v15642_v30  ;;  %vm15562_vm3 = vcmp.eq.s32.totalorder %v8003_v11, %v14525_v16  ;;  %v14638_v59 = vsub.f32 %v6870_v17, %v6870_v17 }
 0x3dc   : > { %5899 = vmatpush.msrb.mxu1 %v5898_v6  ;;  %5961 = vmatpush.msrb.mxu2 %v14468_v60  ;;  %v5916_v6 = vand.u32 4294901760, %v5915_v44  ;;  %v15543_v44 = vand.u32 4294901760, %v14625_v45  ;;  %v6838_v17 = vsel %vm15562_vm3, 1.0, %v15580_v25 }
 0x3dd   : > { %7566 = vmatpush.msk.msrb.mxu0 %vm15536_vm6, %v15642_v30  ;;  %7584 = vmatpush.msk.msrb.mxu3 %vm15539_vm13, %v15642_v30  ;;  %vm15564_vm6 = vcmp.eq.s32.totalorder %v8006_v12, %v14525_v16  ;;  %v15545_v39 = vand.u32 4294901760, %v14638_v59 }
 0x3de   : > { %5905 = vmatpush.msrb.mxu1 %v5904_v49  ;;  %5964 = vmatpush.msrb.mxu2 %v14486_v18  ;;  %v5922_v49 = vand.u32 4294901760, %v5921_v38  ;;  %v6822_v38 = vsel %vm15564_vm6, 1.0, %v15580_v25 }
 0x3df   : > { %7567 = vmatpush.msk.msrb.mxu0 %vm15537_vm0, %v15642_v30  ;;  %7585 = vmatpush.msk.msrb.mxu3 %vm15542_vm12, %v15642_v30  ;;  %vm15566_vm0 = vcmp.eq.s32.totalorder %v8009_v13, %v14525_v16  ;;  %v14694_v55 = vsub.f32 %v6822_v38, %v6822_v38 }
 0x3e0   : > { %5911 = vmatpush.msrb.mxu1 %v5910_v28  ;;  %5967 = vmatpush.msrb.mxu2 %v14501_v40  ;;  %v14668_v28 = vsub.f32 %v6854_v22, %v6854_v22  ;;  %v14686_v22 = vsub.f32 %v6838_v17, %v6838_v17  ;;  %v6806_v58 = vsel %vm15566_vm0, 1.0, %v15580_v25  ;;  %v6178_v17 = vsub.f32 %v14638_v59, %v15545_v39 }
 0x3e1   : > { %7568 = vmatpush.msk.msrb.mxu0 %vm15539_vm13, %v15642_v30  ;;  %7586 = vmatpush.msk.msrb.mxu3 %vm15546_vm1, %v15642_v30  ;;  %vm404_vm13 = vcmp.eq.s32.totalorder %v8012_v14, %v14525_v16  ;;  %v14729_v23 = vsub.f32 %v6806_v58, %v6806_v58  ;;  %v15557_v4 = vand.u32 4294901760, %v14694_v55 }
 0x3e2   : > { %5917 = vmatpush.msrb.mxu1 %v5916_v6  ;;  %5970 = vmatpush.msrb.mxu2 %v14522_v27  ;;  %v6172_v6 = vsub.f32 %v14625_v45, %v15543_v44  ;;  %v6790_v38 = vsel %vm404_vm13, 1.0, %v15580_v25  ;;  %v15553_v44 = vand.u32 4294901760, %v14686_v22 }
 0x3e3   : > { %7569 = vmatpush.msk.msrb.mxu0 %vm15542_vm12, %v15642_v30  ;;  %7587 = vmatpush.msk.msrb.mxu3 %vm307_vm10, %v15642_v30  ;;  %vm388_vm12 = vcmp.eq.s32.totalorder %v8015_v15, %v14525_v16  ;;  %v14754_v48 = vsub.f32 %v6790_v38, %v6790_v38 }
 0x3e4   : > { %5923 = vmatpush.msrb.mxu1 %v5922_v49  ;;  %5973 = vmatpush.msrb.mxu2 %v14544_v54  ;;  %v15551_v49 = vand.u32 4294901760, %v14668_v28  ;;  %v6774_v39 = vsel %vm388_vm12, 1.0, %v15580_v25  ;;  %v6173_v2 = vand.u32 4294901760, %v6172_v6  ;;  %v6179_v6 = vand.u32 4294901760, %v6178_v17 }
 0x3e5   : > { %7570 = vmatpush.msk.msrb.mxu0 %vm15546_vm1, %v15642_v30  ;;  %7588 = vmatpush.msk.msrb.mxu3 %vm291_vm14, %v15642_v30  ;;  %vm372_vm1 = vcmp.eq.s32.totalorder %v8072_v26, %v14525_v16  ;;  %v14766_v53 = vsub.f32 %v6774_v39, %v6774_v39  ;;  %v15560_v17 = vand.u32 4294901760, %v14729_v23  ;;  %v6196_v39 = vsub.f32 %v14694_v55, %v15557_v4 }
 0x3e6   : > { %5925 = vmatmul.f32.vlgmr.msrb.gmra.mxu1 %v8738_v47  ;;  %5976 = vmatpush.msrb.mxu2 %v14559_v36  ;;  %v6184_v58 = vsub.f32 %v14668_v28, %v15551_v49  ;;  %v6758_v38 = vsel %vm372_vm1, 1.0, %v15580_v25  ;;  %v6190_v49 = vsub.f32 %v14686_v22, %v15553_v44  ;;  %v15563_v41 = vand.u32 4294901760, %v14754_v48 }
 0x3e7   : > { %7591 = vmatpush.msk.msra.mxu1 %vm499_vm2, %v15642_v30  ;;  %7571 = vmatpush.msk.msrb.mxu0 %vm307_vm10, %v15642_v30  ;;  %vm356_vm2 = vcmp.eq.s32.totalorder %v8150_v50, %v14525_v16  ;;  %v14803_v32 = vsub.f32 %v6758_v38, %v6758_v38  ;;  %v15565_v4 = vand.u32 4294901760, %v14766_v53  ;;  %v6197_v61 = vand.u32 4294901760, %v6196_v39 }
 0x3e8   : > { %7589 = vmatpush.msk.msrb.mxu3 %vm275_vm9, %v15642_v30  ;;  %5979 = vmatmul.f32.vlgmr.msrb.gmra.mxu2 %v15888_v46  ;;  %v6742_v44 = vsel %vm356_vm2, 1.0, %v15580_v25  ;;  %v6191_v38 = vand.u32 4294901760, %v6190_v49  ;;  %v15892_v39 = vand.u32 4294901760, %v14279_v42 }
 0x3e9   : > { %7592 = vmatpush.msk.msra.mxu1 %vm483_vm11, %v15642_v30  ;;  %7607 = vmatpush.msk.msra.mxu2 %vm15552_vm15, %v15642_v30  ;;  %vm15889_vm11 = vcmp.eq.s32.totalorder %v8000_v10, %v14180_v1  ;;  %vm340_vm15 = vcmp.eq.s32.totalorder %v8153_v51, %v14525_v16  ;;  %v14827_v5 = vsub.f32 %v6742_v44, %v6742_v44  ;;  %v15926_v10 = vand.u32 4294901760, %v14729_v23 }
 0x3ea   : > { %7572 = vmatpush.msk.msrb.mxu0 %vm291_vm14, %v15642_v30  ;;  %7590 = vmatpush.msk.msrb.mxu3 %vm259_vm5, %v15642_v30  ;;  %v6208_v44 = vsub.f32 %v14754_v48, %v15563_v41  ;;  %v6214_v21 = vsub.f32 %v14766_v53, %v15565_v4 }
 0x3eb   : > { %6018 = vmatmul.f32.vlgmr.msrb.gmra.mxu3 %v15887_v56  ;;  %7593 = vmatpush.msk.msra.mxu1 %vm15889_vm11, %v15642_v30  ;;  %vm15890_vm11 = vcmp.eq.s32.totalorder %v8003_v11, %v14180_v1 }
 0x3ec   : > { %7608 = vmatpush.msk.msra.mxu2 %vm15556_vm7, %v15642_v30  ;;  %6174 = vmatpush.msra.mxu3 %v6173_v2  ;;  %v6185_v2 = vand.u32 4294901760, %v6184_v58  ;;  %vm324_vm7 = vcmp.eq.s32.totalorder %v8156_v52, %v14525_v16  ;;  %v6726_v58 = vsel %vm340_vm15, 1.0, %v15580_v25 }
 0x3ed   : > { %7573 = vmatpush.msk.msrb.mxu0 %vm275_vm9, %v15642_v30  ;;  %7594 = vmatpush.msk.msra.mxu1 %vm15890_vm11, %v15642_v30  ;;  %vm308_vm11 = vcmp.eq.s32.totalorder %v8234_v31, %v14525_v16  ;;  %v6710_v49 = vsel %vm324_vm7, 1.0, %v15580_v25  ;;  %v14846_v3 = vsub.f32 %v6726_v58, %v6726_v58  ;;  %v15567_v58 = vand.u32 4294901760, %v14827_v5 }
 0x3ee   : > { %7609 = vmatpush.msk.msra.mxu2 %vm468_vm8, %v15642_v30  ;;  %6180 = vmatpush.msra.mxu3 %v6179_v6  ;;  %v6202_v6 = vsub.f32 %v14729_v23, %v15560_v17  ;;  %v6219_v17 = vand.u32 4294901760, %v14803_v32  ;;  %v14868_v41 = vsub.f32 %v6710_v49, %v6710_v49 }
 0x3ef   : > { %7574 = vmatpush.msk.msrb.mxu0 %vm259_vm5, %v15642_v30  ;;  %7595 = vmatpush.msk.msra.mxu1 %vm435_vm4, %v15642_v30  ;;  %vm292_vm4 = vcmp.eq.s32.totalorder %v8247_v34, %v14525_v16 }
 0x3f0   : > { %5824 = vmatmul.f32.vlgmr.msrb.gmra.mxu0 %v15796_v0  ;;  %7610 = vmatpush.msk.msra.mxu2 %vm15562_vm3, %v15642_v30  ;;  %vm15891_vm3 = vcmp.eq.s32.totalorder %v8009_v13, %v14180_v1  ;;  %v6678_v42 = vsel %vm292_vm4, 1.0, %v15580_v25  ;;  %v6220_v49 = vsub.f32 %v14803_v32, %v6219_v17 }
 0x3f1   : > { %6025 = vmatpush.msra.mxu0 %v5830_v37  ;;  %6186 = vmatpush.msra.mxu3 %v6185_v2  ;;  %v6694_v37 = vsel %vm308_vm11, 1.0, %v15580_v25  ;;  %v6203_v2 = vand.u32 4294901760, %v6202_v6  ;;  %v6209_v6 = vand.u32 4294901760, %v6208_v44  ;;  %v6226_v44 = vsub.f32 %v14827_v5, %v15567_v58 }
 0x3f2   : > { %7596 = vmatpush.msk.msra.mxu1 %vm15891_vm3, %v15642_v30  ;;  %7611 = vmatpush.msk.msra.mxu2 %vm15564_vm6, %v15642_v30  ;;  %vm15893_vm3 = vcmp.eq.s32.totalorder %v8012_v14, %v14180_v1  ;;  %vm276_vm6 = vcmp.eq.s32.totalorder %v8250_v35, %v14525_v16  ;;  %v14890_v4 = vsub.f32 %v6694_v37, %v6694_v37  ;;  %v6237_v37 = vand.u32 4294901760, %v14868_v41  ;;  %v4461_v14 = vpop.f32.mrf.mxu0 }
 0x3f3   : > { %6029 = vmatpush.msra.mxu0 %v15892_v39  ;;  %6192 = vmatpush.msra.mxu3 %v6191_v38  ;;  %v15894_v38 = vand.u32 4294901760, %v14299_v20  ;;  %v6231_v39 = vand.u32 4294901760, %v14846_v3  ;;  %v6215_v20 = vand.u32 4294901760, %v6214_v21  ;;  %v6662_v21 = vsel %vm276_vm6, 1.0, %v15580_v25 }
 0x3f4   : > { %7597 = vmatpush.msk.msra.mxu1 %vm15893_vm3, %v15642_v30  ;;  %7612 = vmatpush.msk.msra.mxu2 %vm15566_vm0, %v15642_v30  ;;  %vm15895_vm3 = vcmp.eq.s32.totalorder %v8015_v15, %v14180_v1  ;;  %vm260_vm0 = vcmp.eq.s32.totalorder %v7991_v7, %v14525_v16  ;;  %v4562_v15 = vpop.f32.mrf.mxu1 }
 0x3f5   : > { %6033 = vmatpush.msra.mxu0 %v15894_v38  ;;  %6198 = vmatpush.msra.mxu3 %v6197_v61  ;;  %v15896_v61 = vand.u32 4294901760, %v14319_v29  ;;  %v14908_v38 = vsub.f32 %v6678_v42, %v6678_v42  ;;  %v15898_v29 = vand.u32 4294901760, %v14342_v43  ;;  %v6232_v42 = vsub.f32 %v14846_v3, %v6231_v39 }
 0x3f6   : > { %7598 = vmatpush.msk.msra.mxu1 %vm15895_vm3, %v15642_v30  ;;  %7613 = vmatpush.msk.msra.mxu2 %vm404_vm13, %v15642_v30  ;;  %vm15897_vm3 = vcmp.eq.s32.totalorder %v8072_v26, %v14180_v1  ;;  %v6646_v58 = vsel %vm260_vm0, 1.0, %v15580_v25  ;;  %v14940_v43 = vsub.f32 %v6662_v21, %v6662_v21  ;;  %v6238_v25 = vsub.f32 %v14868_v41, %v6237_v37  ;;  %v4616_v26 = vpop.f32.mrf.mxu2 }
 0x3f7   : > { %6037 = vmatpush.msra.mxu0 %v15896_v61  ;;  %6204 = vmatpush.msra.mxu3 %v6203_v2  ;;  %v6221_v2 = vand.u32 4294901760, %v6220_v49  ;;  %v6243_v61 = vand.u32 4294901760, %v14890_v4  ;;  %v6227_v49 = vand.u32 4294901760, %v6226_v44  ;;  %v6233_v44 = vand.u32 4294901760, %v6232_v42 }
 0x3f8   : > { %7599 = vmatpush.msk.msra.mxu1 %vm15897_vm3, %v15642_v30  ;;  %7614 = vmatpush.msk.msra.mxu2 %vm388_vm12, %v15642_v30  ;;  %vm15899_vm3 = vcmp.eq.s32.totalorder %v8150_v50, %v14180_v1  ;;  %v4655_v50 = vpop.f32.mrf.mxu3 }
 0x3f9   : > { %6041 = vmatpush.msra.mxu0 %v15898_v29  ;;  %6210 = vmatpush.msra.mxu3 %v6209_v6  ;;  %v15900_v6 = vand.u32 4294901760, %v14365_v62  ;;  %v6249_v29 = vand.u32 4294901760, %v14908_v38  ;;  %v14956_v62 = vsub.f32 %v6646_v58, %v6646_v58  ;;  %v6244_v21 = vsub.f32 %v14890_v4, %v6243_v61 }
 0x3fa   : > { %7600 = vmatpush.msk.msra.mxu1 %vm15899_vm3, %v15642_v30  ;;  %7615 = vmatpush.msk.msra.mxu2 %vm372_vm1, %v15642_v30  ;;  %vm15901_vm3 = vcmp.eq.s32.totalorder %v8153_v51, %v14180_v1  ;;  %v6255_v58 = vand.u32 4294901760, %v14940_v43  ;;  %v4724_v51 = vpop.f32.mrf.mxu0 }
 0x3fb   : > { %6045 = vmatpush.msra.mxu0 %v15900_v6  ;;  %6216 = vmatpush.msra.mxu3 %v6215_v20  ;;  %v15902_v20 = vand.u32 4294901760, %v14384_v19  ;;  %v15904_v19 = vand.u32 4294901760, %v14414_v24  ;;  %v6250_v42 = vsub.f32 %v14908_v38, %v6249_v29  ;;  %v6261_v6 = vand.u32 4294901760, %v14956_v62 }
 0x3fc   : > { %7601 = vmatpush.msk.msra.mxu1 %vm15901_vm3, %v15642_v30  ;;  %7616 = vmatpush.msk.msra.mxu2 %vm356_vm2, %v15642_v30  ;;  %vm15903_vm3 = vcmp.eq.s32.totalorder %v8156_v52, %v14180_v1  ;;  %v15905_v24 = vand.u32 4294901760, %v14432_v63  ;;  %v15910_v1 = vand.u32 4294901760, %v14501_v40  ;;  %v15916_v40 = vand.u32 4294901760, %v14544_v54  ;;  %v4761_v52 = vpop.f32.mrf.mxu1 }
 0x3fd   : > { %6049 = vmatpush.msra.mxu0 %v15902_v20  ;;  %6222 = vmatpush.msra.mxu3 %v6221_v2  ;;  %v6239_v2 = vand.u32 4294901760, %v6238_v25  ;;  %v6256_v25 = vsub.f32 %v14940_v43, %v6255_v58  ;;  %v15906_v20 = vand.u32 4294901760, %v14450_v57  ;;  %v6251_v63 = vand.u32 4294901760, %v6250_v42 }
 0x3fe   : > { %7602 = vmatpush.msk.msra.mxu1 %vm15903_vm3, %v15642_v30  ;;  %7617 = vmatpush.msk.msra.mxu2 %vm340_vm15, %v15642_v30  ;;  %v15920_v42 = vand.u32 4294901760, %v14559_v36  ;;  %v4802_v31 = vpop.f32.mrf.mxu2 }
 0x3ff   : > { %6053 = vmatpush.msra.mxu0 %v15904_v19  ;;  %6228 = vmatpush.msra.mxu3 %v6227_v49  ;;  %v6245_v49 = vand.u32 4294901760, %v6244_v21  ;;  %v15907_v21 = vand.u32 4294901760, %v14468_v60  ;;  %v6257_v57 = vand.u32 4294901760, %v6256_v25  ;;  %v15908_v19 = vand.u32 4294901760, %v14486_v18 }
 0x400   : > { %7603 = vmatpush.msk.msra.mxu1 %vm307_vm10, %v15642_v30  ;;  %7618 = vmatpush.msk.msra.mxu2 %vm324_vm7, %v15642_v30  ;;  %vm15909_vm10 = vcmp.eq.s32.totalorder %v7994_v8, %v14525_v16  ;;  %v15912_v18 = vand.u32 4294901760, %v14625_v45  ;;  %v15922_v8 = vand.u32 4294901760, %v14686_v22  ;;  %v4903_v34 = vpop.f32.mrf.mxu3 }
 0x401   : > { %6057 = vmatpush.msra.mxu0 %v15905_v24  ;;  %6234 = vmatpush.msra.mxu3 %v6233_v44  ;;  %v6262_v44 = vsub.f32 %v14956_v62, %v6261_v6  ;;  %v4904_v36 = vadd.f32 %v4903_v34, %v4802_v31 }
 0x402   : > { %7604 = vmatpush.msk.msra.mxu1 %vm291_vm14, %v15642_v30  ;;  %7619 = vmatpush.msk.msra.mxu2 %vm308_vm11, %v15642_v30  ;;  %vm15911_vm14 = vcmp.eq.s32.totalorder %v7997_v9, %v14525_v16  ;;  %v15924_v9 = vand.u32 4294901760, %v14694_v55  ;;  %v4957_v35 = vpop.f32.mrf.mxu0 }
 0x403   : > { %6061 = vmatpush.msra.mxu0 %v15906_v20  ;;  %6240 = vmatpush.msra.mxu3 %v6239_v2  ;;  %v6263_v60 = vand.u32 4294901760, %v6262_v44  ;;  %v15913_v2 = vand.u32 4294901760, %v14522_v27  ;;  %v15918_v27 = vand.u32 4294901760, %v14668_v28  ;;  %vm15919_vm3 = vmmov %vm15911_vm14 }
 0x404   : > { %7605 = vmatpush.msk.msra.mxu1 %vm275_vm9, %v15642_v30  ;;  %7620 = vmatpush.msk.msra.mxu2 %vm292_vm4, %v15642_v30  ;;  %vm15915_vm9 = vmmov %vm15909_vm10 }
 0x405   : > { %6065 = vmatpush.msra.mxu0 %v15907_v21  ;;  %6246 = vmatpush.msra.mxu3 %v6245_v49 }
 0x406   : > { %7606 = vmatpush.msk.msra.mxu1 %vm259_vm5, %v15642_v30  ;;  %7621 = vmatpush.msk.msra.mxu2 %vm276_vm6, %v15642_v30  ;;  %vm15917_vm5 = vcmp.eq.s32.totalorder %v8003_v11, %v14525_v16  ;;  %v15928_v11 = vand.u32 4294901760, %v14754_v48  ;;  %v5065_v7 = vpop.f32.mrf.mxu2 }
 0x407   : > { %6069 = vmatpush.msra.mxu0 %v15908_v19  ;;  %6252 = vmatpush.msra.mxu3 %v6251_v63 }
 0x408   : > { %6124 = vmatmul.f32.vlgmr.msra.gmra.mxu1 %v8738_v47  ;;  %7622 = vmatpush.msk.msra.mxu2 %vm260_vm0, %v15642_v30 }
 0x409   : > { %7623 = vmatpush.msk.msrb.mxu1 %vm15909_vm10, %v15642_v30  ;;  %6073 = vmatpush.msra.mxu0 %v15910_v1  ;;  %vm15921_vm10 = vcmp.eq.s32.totalorder %v8006_v12, %v14525_v16  ;;  %v15930_v12 = vand.u32 4294901760, %v14766_v53 }
 0x40a   : > { %6258 = vmatpush.msra.mxu3 %v6257_v57  ;;  %6165 = vmatmul.f32.vlgmr.msra.gmra.mxu2 %v15796_v0  ;;  %v15914_v0 = vand.u32 4294901760, %v14638_v59 }
 0x40b   : > { %7624 = vmatpush.msk.msrb.mxu1 %vm15911_vm14, %v15642_v30  ;;  %6366 = vmatpush.msrb.mxu2 %v15912_v18  ;;  %vm15923_vm14 = vcmp.eq.s32.totalorder %v8009_v13, %v14525_v16  ;;  %v15931_v13 = vand.u32 4294901760, %v14827_v5 }
 0x40c   : > { %6077 = vmatpush.msra.mxu0 %v15913_v2  ;;  %6264 = vmatpush.msra.mxu3 %v6263_v60 }
 0x40d   : > { %6266 = vmatmul.f32.vlgmr.msra.gmra.mxu3 %v8738_v47  ;;  %7625 = vmatpush.msk.msrb.mxu1 %vm468_vm8, %v15642_v30 }
 0x40e   : > { %6370 = vmatpush.msrb.mxu2 %v15914_v0  ;;  %7639 = vmatpush.msk.msrb.mxu3 %vm15915_vm9, %v15642_v30  ;;  %vm15925_vm9 = vmmov %vm15917_vm5 }
 0x40f   : > { %6081 = vmatpush.msra.mxu0 %v15916_v40  ;;  %7626 = vmatpush.msk.msrb.mxu1 %vm15917_vm5, %v15642_v30  ;;  %vm15929_vm5 = vmmov %vm15923_vm14 }
 0x410   : > { %6374 = vmatpush.msrb.mxu2 %v15918_v27  ;;  %7640 = vmatpush.msk.msrb.mxu3 %vm15919_vm3, %v15642_v30 }
 0x411   : > { %6085 = vmatpush.msra.mxu0 %v15920_v42  ;;  %7627 = vmatpush.msk.msrb.mxu1 %vm15921_vm10, %v15642_v30 }
 0x412   : > { %6087 = vmatmul.f32.vlgmr.msra.gmra.mxu0 %v8738_v47  ;;  %6378 = vmatpush.msrb.mxu2 %v15922_v8 }
 0x413   : > { %6272 = vmatpush.msrb.mxu0 %v14625_v45  ;;  %7641 = vmatpush.msk.msrb.mxu3 %vm468_vm8, %v15642_v30  ;;  %vm15927_vm8 = vmmov %vm15921_vm10 }
 0x414   : > { %7628 = vmatpush.msk.msrb.mxu1 %vm15923_vm14, %v15642_v30  ;;  %6382 = vmatpush.msrb.mxu2 %v15924_v9 }
 0x415   : > { %6275 = vmatpush.msrb.mxu0 %v14638_v59  ;;  %7642 = vmatpush.msk.msrb.mxu3 %vm15925_vm9, %v15642_v30  ;;  %v4563_v59 = vadd.f32 %v4562_v15, %v4461_v14 }
 0x416   : > { %7629 = vmatpush.msk.msrb.mxu1 %vm404_vm13, %v15642_v30  ;;  %6386 = vmatpush.msrb.mxu2 %v15926_v10 }
 0x417   : > { %6278 = vmatpush.msrb.mxu0 %v14668_v28  ;;  %7643 = vmatpush.msk.msrb.mxu3 %vm15927_vm8, %v15642_v30 }
 0x418   : > { %7630 = vmatpush.msk.msrb.mxu1 %vm388_vm12, %v15642_v30  ;;  %6390 = vmatpush.msrb.mxu2 %v15928_v11 }
 0x419   : > { %6281 = vmatpush.msrb.mxu0 %v14686_v22  ;;  %7644 = vmatpush.msk.msrb.mxu3 %vm15929_vm5, %v15642_v30 }
 0x41a   : > { %7631 = vmatpush.msk.msrb.mxu1 %vm372_vm1, %v15642_v30  ;;  %6394 = vmatpush.msrb.mxu2 %v15930_v12 }
 0x41b   : > { %6284 = vmatpush.msrb.mxu0 %v14694_v55  ;;  %7645 = vmatpush.msk.msrb.mxu3 %vm404_vm13, %v15642_v30  ;;  %vm15936_vm13 = vcmask 1045508  }
 0x41c   : > { %7632 = vmatpush.msk.msrb.mxu1 %vm356_vm2, %v15642_v30  ;;  %6398 = vmatpush.msrb.mxu2 %v6219_v17  ;;  %v4958_v17 = vadd.f32 %v4957_v35, %v4904_v36 }
 0x41d   : > { %6287 = vmatpush.msrb.mxu0 %v14729_v23  ;;  %7646 = vmatpush.msk.msrb.mxu3 %vm388_vm12, %v15642_v30  ;;  %vm15937_vm12 = vcmask 1043456  }
 0x41e   : > { %7633 = vmatpush.msk.msrb.mxu1 %vm340_vm15, %v15642_v30  ;;  %6402 = vmatpush.msrb.mxu2 %v15931_v13 }
 0x41f   : > { %6290 = vmatpush.msrb.mxu0 %v14754_v48  ;;  %7647 = vmatpush.msk.msrb.mxu3 %vm372_vm1, %v15642_v30 }
 0x420   : > { %7634 = vmatpush.msk.msrb.mxu1 %vm324_vm7, %v15642_v30  ;;  %6406 = vmatpush.msrb.mxu2 %v6231_v39 }
 0x421   : > { %6293 = vmatpush.msrb.mxu0 %v14766_v53  ;;  %7648 = vmatpush.msk.msrb.mxu3 %vm356_vm2, %v15642_v30 }
 0x422   : > { %7635 = vmatpush.msk.msrb.mxu1 %vm308_vm11, %v15642_v30  ;;  %6410 = vmatpush.msrb.mxu2 %v6237_v37 }
 0x423   : > { %6296 = vmatpush.msrb.mxu0 %v14803_v32  ;;  %7649 = vmatpush.msk.msrb.mxu3 %vm340_vm15, %v15642_v30  ;;  %v5298_v32 = vpop.f32.mrf.mxu2  ;;  %vm15932_vm15 = vcmask 1042434  }
 0x424   : > { %7636 = vmatpush.msk.msrb.mxu1 %vm292_vm4, %v15642_v30  ;;  %6414 = vmatpush.msrb.mxu2 %v6243_v61 }
 0x425   : > { %6299 = vmatpush.msrb.mxu0 %v14827_v5  ;;  %7650 = vmatpush.msk.msrb.mxu3 %vm324_vm7, %v15642_v30  ;;  %v5143_v5 = vpop.f32.mrf.mxu0  ;;  %vm15933_vm7 = vcmask 1044484  }
 0x426   : > { %7637 = vmatpush.msk.msrb.mxu1 %vm276_vm6, %v15642_v30  ;;  %6418 = vmatpush.msrb.mxu2 %v6249_v29 }
 0x427   : > { %6302 = vmatpush.msrb.mxu0 %v14846_v3  ;;  %7651 = vmatpush.msk.msrb.mxu3 %vm308_vm11, %v15642_v30  ;;  %v4996_v3 = vpop.f32.mrf.mxu1 }
 0x428   : > { %7638 = vmatpush.msk.msrb.mxu1 %vm260_vm0, %v15642_v30  ;;  %6422 = vmatpush.msrb.mxu2 %v6255_v58 }
 0x429   : > { %6305 = vmatpush.msrb.mxu0 %v14868_v41  ;;  %7652 = vmatpush.msk.msrb.mxu3 %vm292_vm4, %v15642_v30 }
 0x42a   : > { %6359 = vmatmul.f32.vlgmr.msrb.gmra.mxu1 %v15887_v56  ;;  %6426 = vmatpush.msrb.mxu2 %v6261_v6 }
 0x42b   : > { %6308 = vmatpush.msrb.mxu0 %v14890_v4  ;;  %7653 = vmatpush.msk.msrb.mxu3 %vm276_vm6, %v15642_v30  ;;  %v5484_v48 = vpop.f32.mrf.mxu2  ;;  %vm15934_vm6 = vcmask 1046534  }
 0x42c   : > { %6428 = vmatmul.f32.vlgmr.msrb.gmra.mxu2 %v8738_v47 }
 0x42d   : > { %6311 = vmatpush.msrb.mxu0 %v14908_v38  ;;  %7654 = vmatpush.msk.msrb.mxu3 %vm260_vm0, %v15642_v30  ;;  %v5102_v30 = vpop.f32.mrf.mxu3  ;;  %v5406_v56 = vpop.f32.mrf.mxu0  ;;  %vm15935_vm0 = vcmask 1041408  }
 0x42e   : > { %6465 = vmatmul.f32.vlgmr.msrb.gmra.mxu3 %v8738_v47 }
 0x42f   : > { %6314 = vmatpush.msrb.mxu0 %v14940_v43  ;;  %v5244_v47 = vpop.f32.mrf.mxu1  ;;  %v4617_v43 = vadd.f32 %v4616_v26, %v4563_v59 }
 0x430   : > { %v5245_v37 = vadd.f32 %v5244_v47, %v5143_v5 }
 0x431   : > { %6317 = vmatpush.msrb.mxu0 %v14956_v62  ;;  %v4997_v62 = vadd.f32 %v4996_v3, %v4958_v17  ;;  %v4656_v25 = vadd.f32 %v4655_v50, %v4617_v43 }
 0x432   : > { %6320 = vmatmul.f32.vlgmr.msrb.gmra.mxu0 %v15888_v46  ;;  %v5299_v6 = vadd.f32 %v5298_v32, %v5245_v37 }
 0x433   : > { %v5066_v44 = vadd.f32 %v5065_v7, %v4997_v62  ;;  %v4725_v21 = vadd.f32 %v4724_v51, %v4656_v25 }
 0x435   : > { %v5337_v41 = vpop.f32.mrf.mxu3  ;;  %v5103_v2 = vadd.f32 %v5102_v30, %v5066_v44  ;;  %v4762_v8 = vadd.f32 %v4761_v52, %v4725_v21 }
 0x436   : > { %v5338_v57 = vadd.f32 %v5337_v41, %v5299_v6 }
 0x437   : > { %v5443_v53 = vpop.f32.mrf.mxu1  ;;  %v6494_v12 = vrot.slane %v5103_v2, 5  ;;  %v6493_v50 = vrot.slane %v4762_v8, 6 }
 0x438   : > { %v5407_v0 = vadd.f32 %v5406_v56, %v5338_v57 }
 0x439   : > { %v6513_v52 = vsel %vm15932_vm15, %v6493_v50, %v6494_v12 }
 0x43a   : > { %v5444_v13 = vadd.f32 %v5443_v53, %v5407_v0  ;;  %v6514_v5 = vsel %vm15935_vm0, %v13952_v33, %v6513_v52 }
 0x43c   : > { %v6495_v34 = vrot.slane %v5444_v13, 4 }
 0x43d   : > { %v5585_v4 = vpop.f32.mrf.mxu3 }
 0x43e   : > { %v5586_v39 = vadd.f32 %v5585_v4, %v5484_v48 }
 0x441   : > { %v5678_v23 = vpop.f32.mrf.mxu1 }
 0x449   : > { %v5747_v16 = vpop.f32.mrf.mxu2 }
 0x44b   : > { %v5639_v46 = vpop.f32.mrf.mxu0 }
 0x44c   : > { %v5784_v55 = vpop.f32.mrf.mxu3  ;;  %v5640_v38 = vadd.f32 %v5639_v46, %v5586_v39 }
 0x44e   : > { %v5679_v24 = vadd.f32 %v5678_v23, %v5640_v38 }
 0x450   : > { %v5748_v19 = vadd.f32 %v5747_v16, %v5679_v24 }
 0x452   : > { %v5785_v9 = vadd.f32 %v5784_v55, %v5748_v19 }
 0x454   : > { %v6496_v51 = vrot.slane %v5785_v9, 3 }
 0x456   : > { %v6515_v7 = vsel %vm15933_vm7, %v6495_v34, %v6496_v51 }
 0x463   : > { %v5926_v45 = vpop.f32.mrf.mxu1 }
 0x46b   : > { %v5980_v28 = vpop.f32.mrf.mxu2 }
 0x46d   : > { %v5825_v54 = vpop.f32.mrf.mxu0 }
 0x46e   : > { %v6019_v22 = vpop.f32.mrf.mxu3  ;;  %v5927_v61 = vadd.f32 %v5926_v45, %v5825_v54 }
 0x470   : > { %v5981_v49 = vadd.f32 %v5980_v28, %v5927_v61 }
 0x472   : > { %v6020_v60 = vadd.f32 %v6019_v22, %v5981_v49 }
 0x485   : > { %v6125_v58 = vpop.f32.mrf.mxu1 }
 0x48d   : > { %v6166_v20 = vpop.f32.mrf.mxu2 }
 0x48f   : > { %v6088_v29 = vpop.f32.mrf.mxu0 }
 0x490   : > { %v6267_v63 = vpop.f32.mrf.mxu3  ;;  %v6089_v40 = vadd.f32 %v6088_v29, %v6020_v60 }
 0x491   : > { %v6268_v1 = vadd.f32 %v6267_v63, %v6166_v20 }
 0x492   : > { %v6126_v14 = vadd.f32 %v6125_v58, %v6089_v40 }
 0x494   : > { %v6497_v35 = vrot.slane %v6126_v14, 2 }
 0x4a7   : > { %v6360_v42 = vpop.f32.mrf.mxu1 }
 0x4af   : > { %v6321_v18 = vpop.f32.mrf.mxu0  ;;  %v6429_v11 = vpop.f32.mrf.mxu2 }
 0x4b0   : > { %v6322_v27 = vadd.f32 %v6321_v18, %v6268_v1 }
 0x4b1   : > { %v6466_v26 = vpop.f32.mrf.mxu3 }
 0x4b2   : > { %v6361_v10 = vadd.f32 %v6360_v42, %v6322_v27 }
 0x4b4   : > { %v6430_v15 = vadd.f32 %v6429_v11, %v6361_v10 }
 0x4b6   : > { %v6467_v31 = vadd.f32 %v6466_v26, %v6430_v15 }
 0x4b8   : > { %v6498_v3 = vrot.slane %v6467_v31, 1 }
 0x4ba   : > { %v6516_v30 = vsel %vm15934_vm6, %v6497_v35, %v6498_v3 }
 0x4bb   : > { %v6517_v47 = vsel %vm15936_vm13, %v6515_v7, %v6516_v30 }
 0x4bc   : > { %v6518_v32 = vsel %vm15937_vm12, %v6514_v5, %v6517_v47 }
 0x4bd   : > { %6522 = vst [vmem:[%s13091_s15 + $0x8] sm:$0xff] %v6518_v32 }
 0x4be   : > { %7809 = shalt.err (!%p7806_p11)
}
 0x4bf   : > { %7665 = dma.vmem_to_hbm [thread:$0]  (%p7938_p3), %s6537_s13, 256, %s6539_s8, %s6524_s14  }
 0x4c0 PF: > { %s6550_s29 = sand.u32 1, %s7840_s9   ;;  %p15938_p12 = scmp.ge.s32.totalorder %s7852_s12, 2 }
 0x4c1   : > { %s6551_s28 = scalar_lea.sflag [#allocation4], %s6550_s29 }
 0x4c2   : > { %p7676_p13 = pnand %p15938_p12, %p7907_p6 }
 0x4c4   : > { %p7677_p0 = pneg %p7676_p13 }
 0x4c6   : > { %7835 = dma.done.wait (%p7677_p0), %s6551_s28, 256  }
 0x4c7   : > { %7837 = vsyncadd (%p7677_p0), %s6551_s28, 4294967040  ;;  %p16_p5 = scmp.ge.s32.totalorder %s7925_s23, 4   ;;  %s15939_s9 = smov %s7844_s10 }
 0x4c8   : > { %s15940_s10 = smov %s7848_s11  ;;  %s15941_s11 = smov %s7934_s26 }
 0x4c9   : > { %s15942_s12 = smov %s7925_s23  ;;  %18 = sbr.rel (!%p16_p5) target bundleno = 6 (0x6), region = 78 }
 0x4ce   :  { %6557 = vsyncpa [#allocation3], 1 }
 0x4cf   :  { %6559 = vsyncpa [#allocation3 + $0x1], 1 }
 0x4d0   :  { %6560 = vsyncpa [#allocation6], 1 }
 0x4d1   :  { %6562 = vsyncpa [#allocation6 + $0x1], 1 }
 0x4d2   :  { %6563 = vsyncpa [#allocation4], 1 }
 0x4d3   :  { %6565 = vsyncpa [#allocation4 + $0x1], 1 }

</bundles_post_ra>
